<compile_context>
chip_gen: v5e
topology: v5e:2x2
jax: 0.10.0
libtpu: 0.0.40
codegen_flags: <defaults>
</compile_context>

<pallas_src>
import functools
import numpy as np

import jax
import jax.numpy as jnp
from jax import lax
from jax.experimental import pallas as pl
from jax.experimental.pallas import tpu as pltpu

# ----------------------------- config (small shapes consistent with the module) ----
VOCAB = 64
SEQ = 16
DIM = 32
DEPTH = 2
HEADS = 4
HEAD_DIM = DIM // HEADS
MLP_DIM = 64
BATCH = 2
LN_EPS = 1e-5

VOCAB_PAD = 128          # lane-dense output slab
PACK_COLS = 128          # lane-dense packed-parameter slab


# ----------------------------- packed-parameter layout (static, 8-row aligned) -----
def _round8(n):
    return ((n + 7) // 8) * 8


def _build_pack_spec():
    spec = [("token_embed", VOCAB, DIM), ("pos_embed", SEQ, DIM)]
    for li in range(DEPTH):
        spec += [
            (f"w_in_{li}", DIM, 3 * DIM),
            (f"b_in_{li}", 1, 3 * DIM),
            (f"w_o_{li}", DIM, DIM),
            (f"b_o_{li}", 1, DIM),
            (f"ln1_g_{li}", 1, DIM),
            (f"ln1_b_{li}", 1, DIM),
            (f"w_ff1_{li}", DIM, MLP_DIM),
            (f"b_ff1_{li}", 1, MLP_DIM),
            (f"w_ff2_{li}", MLP_DIM, DIM),
            (f"b_ff2_{li}", 1, DIM),
            (f"ln2_g_{li}", 1, DIM),
            (f"ln2_b_{li}", 1, DIM),
        ]
    spec += [("ln_f_g", 1, DIM), ("ln_f_b", 1, DIM),
             ("w_out", DIM, VOCAB_PAD), ("b_out", 1, VOCAB_PAD)]
    return spec


_PACK_SPEC = _build_pack_spec()
_LAYOUT = {}
_r = 0
for _name, _nr, _nc in _PACK_SPEC:
    _LAYOUT[_name] = (_r, _nr, _nc)
    _r += _round8(_nr)
PACK_ROWS = _r                                   # 584 rows -> ~299 KiB, trivially VMEM resident


def _p(ref, name):
    """Static, zero-cost window into the packed parameter slab."""
    r0, nr, nc = _LAYOUT[name]
    return ref[r0:r0 + nr, 0:nc]


# ----------------------------- fused Pallas kernel ---------------------------------
def _layernorm(h, gamma, beta):
    # PyTorch LayerNorm: biased variance over last dim, affine gamma/beta.
    mean = jnp.mean(h, axis=-1, keepdims=True)
    var = jnp.mean((h - mean) ** 2, axis=-1, keepdims=True)
    return (h - mean) * lax.rsqrt(var + LN_EPS) * gamma + beta


def _fused_transformer_kernel(ids_ref, p_ref, o_ref, *, batch, seq):
    M = batch * seq

    # ---- embedding gather (one-hot matmul on the MXU) + positional add, in-kernel ----
    ids = ids_ref[...]                                                   # (M, 1) int32
    onehot = (lax.broadcasted_iota(jnp.int32, (M, VOCAB), 1) == ids).astype(jnp.float32)
    tok = _p(p_ref, "token_embed")                                       # (VOCAB, DIM)
    pos = _p(p_ref, "pos_embed")                                         # (SEQ, DIM)
    x = jnp.dot(onehot, tok, preferred_element_type=jnp.float32)         # (M, DIM)
    x = x + jnp.concatenate([pos] * batch, axis=0)                       # sublane-aligned tile

    for li in range(DEPTH):                                              # static unroll
        # ---- self-attention block (post-LN) ----
        w_in = _p(p_ref, f"w_in_{li}")                                   # (D, 3D), Q-scale folded
        b_in = _p(p_ref, f"b_in_{li}")                                   # (1, 3D)
        qkv = jnp.dot(x, w_in, preferred_element_type=jnp.float32) + b_in
        q = qkv[:, 0:DIM]
        k = qkv[:, DIM:2 * DIM]
        v = qkv[:, 2 * DIM:3 * DIM]

        def heads_lead(t):
            # (M, D) -> (H*B, S, hd): head slices stacked on the LEADING axis (cheap vreg
            # regrouping, no lane-axis concatenate), then a sublane-aligned leading reshape.
            parts = [t[:, h * HEAD_DIM:(h + 1) * HEAD_DIM] for h in range(HEADS)]
            return jnp.concatenate(parts, axis=0).reshape(HEADS * batch, seq, HEAD_DIM)

        qh, kh, vh = heads_lead(q), heads_lead(k), heads_lead(v)

        # one batched QK^T and one batched PV over the combined (H*B) axis
        s = jnp.einsum("bqd,bkd->bqk", qh, kh,
                       preferred_element_type=jnp.float32)               # (H*B, S, S)
        s = s - jnp.max(s, axis=-1, keepdims=True)
        p = jnp.exp(s)
        p = p / jnp.sum(p, axis=-1, keepdims=True)                       # exact divide (parity)
        o = jnp.einsum("bqk,bkd->bqd", p, vh,
                       preferred_element_type=jnp.float32)               # (H*B, S, hd)
        o = o.reshape(HEADS, M, HEAD_DIM)                                # leading-dim regroup

        # merge heads by accumulating per-head row-blocks of w_o (== concat + matmul, exact)
        w_o_r0, _, _ = _LAYOUT[f"w_o_{li}"]
        attn_out = _p(p_ref, f"b_o_{li}")                                # (1, D) broadcast
        for h in range(HEADS):
            w_o_h = p_ref[w_o_r0 + h * HEAD_DIM: w_o_r0 + (h + 1) * HEAD_DIM, 0:DIM]
            attn_out = attn_out + jnp.dot(o[h], w_o_h,
                                          preferred_element_type=jnp.float32)
        x = _layernorm(x + attn_out, _p(p_ref, f"ln1_g_{li}"), _p(p_ref, f"ln1_b_{li}"))

        # ---- MLP block (post-LN), dropout omitted (eval-mode) ----
        hid = jnp.dot(x, _p(p_ref, f"w_ff1_{li}"),
                      preferred_element_type=jnp.float32) + _p(p_ref, f"b_ff1_{li}")
        hid = jnp.maximum(hid, 0.0)                                      # ReLU
        ff = jnp.dot(hid, _p(p_ref, f"w_ff2_{li}"),
                     preferred_element_type=jnp.float32) + _p(p_ref, f"b_ff2_{li}")
        x = _layernorm(x + ff, _p(p_ref, f"ln2_g_{li}"), _p(p_ref, f"ln2_b_{li}"))

    # ---- final LayerNorm + vocab projection into a lane-dense (M, 128) slab ----
    x = _layernorm(x, _p(p_ref, "ln_f_g"), _p(p_ref, "ln_f_b"))
    logits = jnp.dot(x, _p(p_ref, "w_out"),
                     preferred_element_type=jnp.float32) + _p(p_ref, "b_out")
    o_ref[...] = logits.astype(o_ref.dtype)


def _cost_estimate(batch, seq):
    m = batch * seq
    flops = 2 * m * VOCAB * DIM                                         # embedding one-hot matmul
    per_layer = (2 * m * DIM * 3 * DIM                                  # qkv
                 + 2 * (HEADS * batch) * seq * seq * HEAD_DIM * 2       # QK^T + PV
                 + 2 * m * DIM * DIM                                    # out proj
                 + 2 * m * DIM * MLP_DIM * 2)                           # ff1 + ff2
    flops += DEPTH * per_layer
    flops += 2 * m * DIM * VOCAB_PAD                                    # vocab projection
    transcendentals = DEPTH * (HEADS * batch) * seq * seq + m * (2 * DEPTH + 1)
    bytes_accessed = (PACK_ROWS * PACK_COLS + m + m * VOCAB_PAD) * 4
    return pl.CostEstimate(flops=flops, transcendentals=transcendentals,
                           bytes_accessed=bytes_accessed)


def fused_transformer(token_ids_flat, packed_params, *, batch, seq):
    """token_ids_flat: (B*S, 1) int32 -> (B*S, VOCAB_PAD) f32 logits slab, one pallas_call."""
    M = batch * seq
    return pl.pallas_call(
        functools.partial(_fused_transformer_kernel, batch=batch, seq=seq),
        out_shape=jax.ShapeDtypeStruct((M, VOCAB_PAD), jnp.float32),
        # whole arrays resident in VMEM, no grid -> one launch, two input DMAs, one output DMA
        in_specs=[pl.BlockSpec(memory_space=pltpu.MemorySpace.VMEM),
                  pl.BlockSpec(memory_space=pltpu.MemorySpace.VMEM)],
        out_specs=pl.BlockSpec(memory_space=pltpu.MemorySpace.VMEM),
        cost_estimate=_cost_estimate(batch, seq),
    )(token_ids_flat, packed_params)


# ----------------------------- parameter init + host-side packing ------------------
def init_params(key):
    """Mirrors the nn.Module parameter set (untrained, deterministic)."""
    def nrm(k, shape, scale=0.02):
        return (scale * jax.random.normal(k, shape)).astype(jnp.float32)

    k_emb, k_in, k_o, k_ff1, k_ff2, k_out = jax.random.split(key, 6)
    return {
        "token_embed": nrm(k_emb, (VOCAB, DIM)),
        "pos_embed": jnp.zeros((1, SEQ, DIM), jnp.float32),   # torch.zeros, as in the module
        "w_in": nrm(k_in, (DEPTH, DIM, 3 * DIM)),             # fused in_proj, stored (D, 3D)
        "b_in": jnp.zeros((DEPTH, 3 * DIM), jnp.float32),
        "w_o": nrm(k_o, (DEPTH, DIM, DIM)),
        "b_o": jnp.zeros((DEPTH, DIM), jnp.float32),
        "ln1_g": jnp.ones((DEPTH, DIM), jnp.float32),
        "ln1_b": jnp.zeros((DEPTH, DIM), jnp.float32),
        "w_ff1": nrm(k_ff1, (DEPTH, DIM, MLP_DIM)),
        "b_ff1": jnp.zeros((DEPTH, MLP_DIM), jnp.float32),
        "w_ff2": nrm(k_ff2, (DEPTH, MLP_DIM, DIM)),
        "b_ff2": jnp.zeros((DEPTH, DIM), jnp.float32),
        "ln2_g": jnp.ones((DEPTH, DIM), jnp.float32),
        "ln2_b": jnp.zeros((DEPTH, DIM), jnp.float32),
        "ln_f_g": jnp.ones((DIM,), jnp.float32),
        "ln_f_b": jnp.zeros((DIM,), jnp.float32),
        "w_out": nrm(k_out, (DIM, VOCAB)),
        "b_out": jnp.zeros((VOCAB,), jnp.float32),
    }


def pack_params(params):
    """One-time host-side packing into a single lane-dense (PACK_ROWS, 128) f32 slab.

    Also folds the 1/sqrt(head_dim) attention scale into the Q columns of w_in/b_in and
    zero-pads w_out/b_out to a 128-wide (lane-dense) vocab projection.
    """
    buf = np.zeros((PACK_ROWS, PACK_COLS), np.float32)
    scale = 1.0 / float(np.sqrt(HEAD_DIM))

    def put(name, val):
        r0, nr, nc = _LAYOUT[name]
        a = np.asarray(val, np.float32).reshape(nr, nc)
        buf[r0:r0 + nr, :nc] = a

    put("token_embed", params["token_embed"])
    put("pos_embed", params["pos_embed"].reshape(SEQ, DIM))
    for li in range(DEPTH):
        w_in = np.array(params["w_in"][li], np.float32)
        b_in = np.array(params["b_in"][li], np.float32).reshape(1, 3 * DIM)
        w_in[:, :DIM] *= scale                       # fold 1/sqrt(hd) into Q projection
        b_in[:, :DIM] *= scale
        put(f"w_in_{li}", w_in)
        put(f"b_in_{li}", b_in)
        put(f"w_o_{li}", params["w_o"][li])
        put(f"b_o_{li}", params["b_o"][li])
        put(f"ln1_g_{li}", params["ln1_g"][li])
        put(f"ln1_b_{li}", params["ln1_b"][li])
        put(f"w_ff1_{li}", params["w_ff1"][li])
        put(f"b_ff1_{li}", params["b_ff1"][li])
        put(f"w_ff2_{li}", params["w_ff2"][li])
        put(f"b_ff2_{li}", params["b_ff2"][li])
        put(f"ln2_g_{li}", params["ln2_g"][li])
        put(f"ln2_b_{li}", params["ln2_b"][li])
    put("ln_f_g", params["ln_f_g"])
    put("ln_f_b", params["ln_f_b"])
    w_out_p = np.zeros((DIM, VOCAB_PAD), np.float32)
    w_out_p[:, :VOCAB] = np.asarray(params["w_out"], np.float32)
    b_out_p = np.zeros((1, VOCAB_PAD), np.float32)
    b_out_p[:, :VOCAB] = np.asarray(params["b_out"], np.float32).reshape(1, VOCAB)
    put("w_out", w_out_p)
    put("b_out", b_out_p)
    return jnp.asarray(buf)


# ----------------------------- forward ---------------------------------------------
def transformer_forward(token_ids, packed_params):
    B, S = token_ids.shape
    ids = token_ids.reshape(B * S, 1).astype(jnp.int32)
    logits_pad = fused_transformer(ids, packed_params, batch=B, seq=S)   # (B*S, 128)
    return logits_pad[:, :VOCAB].reshape(B, S, VOCAB)


# ----------------------------- main -------------------------------------------------
if __name__ == "__main__":
    key = jax.random.PRNGKey(0)
    pkey, dkey = jax.random.split(key)
    params = init_params(pkey)
    packed = pack_params(params)                    # one-time host-side preprocessing
    token_ids = jax.random.randint(dkey, (BATCH, SEQ), 0, VOCAB, dtype=jnp.int32)

    fwd = jax.jit(transformer_forward)
    logits = jax.block_until_ready(fwd(token_ids, packed))

    assert logits.shape == (BATCH, SEQ, VOCAB)
    assert bool(jnp.all(jnp.isfinite(logits)))
    print("KERNEL_OK")
</pallas_src>

<mosaic_0001>
module attributes {stable_mosaic.version = 11 : i64} {
  func.func @_fused_transformer_kernel(%arg0: memref<32x1xi32, #tpu.memory_space<vmem>>, %arg1: memref<584x128xf32, #tpu.memory_space<vmem>>, %arg2: memref<32x128xf32, #tpu.memory_space<vmem>>) attributes {dimension_semantics = [], scalar_prefetch = 0 : i64, scratch_operands = 0 : i64, tpu.core_type = #tpu.core_type<tc>} {
    %c0 = arith.constant 0 : index
    %c0_0 = arith.constant 0 : index
    %0 = vector.load %arg0[%c0, %c0_0] : memref<32x1xi32, #tpu.memory_space<vmem>>, vector<32x1xi32>
    %1 = tpu.iota {dimensions = array<i32: 1>} : vector<32x64xi32>
    %2 = vector.broadcast %0 : vector<32x1xi32> to vector<32x64xi32>
    %3 = arith.cmpi eq, %1, %2 : vector<32x64xi32>
    %4 = arith.extui %3 : vector<32x64xi1> to vector<32x64xi32>
    %5 = arith.sitofp %4 : vector<32x64xi32> to vector<32x64xf32>
    %c0_1 = arith.constant 0 : index
    %c0_2 = arith.constant 0 : index
    %6 = vector.load %arg1[%c0_1, %c0_2] : memref<584x128xf32, #tpu.memory_space<vmem>>, vector<64x32xf32>
    %c64 = arith.constant 64 : index
    %c0_3 = arith.constant 0 : index
    %7 = vector.load %arg1[%c64, %c0_3] : memref<584x128xf32, #tpu.memory_space<vmem>>, vector<16x32xf32>
    %cst = arith.constant dense<0.000000e+00> : vector<32x32xf32>
    %8 = tpu.matmul %5, %6, %cst {dimension_numbers = #tpu.dot_dimension_numbers<[1], [0], [0], [1], [0, 0, 1, 1], [], []>} : vector<32x64xf32>, vector<64x32xf32>, vector<32x32xf32> -> vector<32x32xf32>
    %9 = tpu.concatenate %7, %7 in 0 : vector<16x32xf32>, vector<16x32xf32> -> vector<32x32xf32>
    %10 = arith.addf %8, %9 : vector<32x32xf32>
    %c80 = arith.constant 80 : index
    %c0_4 = arith.constant 0 : index
    %11 = vector.load %arg1[%c80, %c0_4] : memref<584x128xf32, #tpu.memory_space<vmem>>, vector<32x96xf32>
    %c112 = arith.constant 112 : index
    %c0_5 = arith.constant 0 : index
    %12 = vector.load %arg1[%c112, %c0_5] : memref<584x128xf32, #tpu.memory_space<vmem>>, vector<1x96xf32>
    %cst_6 = arith.constant dense<0.000000e+00> : vector<32x96xf32>
    %13 = tpu.matmul %10, %11, %cst_6 {dimension_numbers = #tpu.dot_dimension_numbers<[1], [0], [0], [1], [0, 0, 1, 1], [], []>} : vector<32x32xf32>, vector<32x96xf32>, vector<32x96xf32> -> vector<32x96xf32>
    %14 = vector.broadcast %12 : vector<1x96xf32> to vector<32x96xf32>
    %15 = arith.addf %13, %14 : vector<32x96xf32>
    %16 = vector.extract_strided_slice %15 {offsets = [0, 0], sizes = [32, 32], strides = [1, 1]} : vector<32x96xf32> to vector<32x32xf32>
    %17 = vector.extract_strided_slice %15 {offsets = [0, 32], sizes = [32, 32], strides = [1, 1]} : vector<32x96xf32> to vector<32x32xf32>
    %18 = vector.extract_strided_slice %15 {offsets = [0, 64], sizes = [32, 32], strides = [1, 1]} : vector<32x96xf32> to vector<32x32xf32>
    %19 = vector.extract_strided_slice %16 {offsets = [0, 0], sizes = [32, 8], strides = [1, 1]} : vector<32x32xf32> to vector<32x8xf32>
    %20 = vector.extract_strided_slice %16 {offsets = [0, 8], sizes = [32, 8], strides = [1, 1]} : vector<32x32xf32> to vector<32x8xf32>
    %21 = vector.extract_strided_slice %16 {offsets = [0, 16], sizes = [32, 8], strides = [1, 1]} : vector<32x32xf32> to vector<32x8xf32>
    %22 = vector.extract_strided_slice %16 {offsets = [0, 24], sizes = [32, 8], strides = [1, 1]} : vector<32x32xf32> to vector<32x8xf32>
    %23 = tpu.concatenate %19, %20, %21, %22 in 0 : vector<32x8xf32>, vector<32x8xf32>, vector<32x8xf32>, vector<32x8xf32> -> vector<128x8xf32>
    %24 = vector.shape_cast %23 : vector<128x8xf32> to vector<8x16x8xf32>
    %25 = vector.extract_strided_slice %17 {offsets = [0, 0], sizes = [32, 8], strides = [1, 1]} : vector<32x32xf32> to vector<32x8xf32>
    %26 = vector.extract_strided_slice %17 {offsets = [0, 8], sizes = [32, 8], strides = [1, 1]} : vector<32x32xf32> to vector<32x8xf32>
    %27 = vector.extract_strided_slice %17 {offsets = [0, 16], sizes = [32, 8], strides = [1, 1]} : vector<32x32xf32> to vector<32x8xf32>
    %28 = vector.extract_strided_slice %17 {offsets = [0, 24], sizes = [32, 8], strides = [1, 1]} : vector<32x32xf32> to vector<32x8xf32>
    %29 = tpu.concatenate %25, %26, %27, %28 in 0 : vector<32x8xf32>, vector<32x8xf32>, vector<32x8xf32>, vector<32x8xf32> -> vector<128x8xf32>
    %30 = vector.shape_cast %29 : vector<128x8xf32> to vector<8x16x8xf32>
    %31 = vector.extract_strided_slice %18 {offsets = [0, 0], sizes = [32, 8], strides = [1, 1]} : vector<32x32xf32> to vector<32x8xf32>
    %32 = vector.extract_strided_slice %18 {offsets = [0, 8], sizes = [32, 8], strides = [1, 1]} : vector<32x32xf32> to vector<32x8xf32>
    %33 = vector.extract_strided_slice %18 {offsets = [0, 16], sizes = [32, 8], strides = [1, 1]} : vector<32x32xf32> to vector<32x8xf32>
    %34 = vector.extract_strided_slice %18 {offsets = [0, 24], sizes = [32, 8], strides = [1, 1]} : vector<32x32xf32> to vector<32x8xf32>
    %35 = tpu.concatenate %31, %32, %33, %34 in 0 : vector<32x8xf32>, vector<32x8xf32>, vector<32x8xf32>, vector<32x8xf32> -> vector<128x8xf32>
    %36 = vector.shape_cast %35 : vector<128x8xf32> to vector<8x16x8xf32>
    "tpu.trace_start"() <{level = 10 : i32, message = "bqd,bkd->bqk"}> : () -> ()
    %cst_7 = arith.constant dense<0.000000e+00> : vector<8x16x16xf32>
    %37 = tpu.matmul %24, %30, %cst_7 {dimension_numbers = #tpu.dot_dimension_numbers<[2], [2], [1], [1], [0, 0, 0, 1, 1, 1], [0], [0]>} : vector<8x16x8xf32>, vector<8x16x8xf32>, vector<8x16x16xf32> -> vector<8x16x16xf32>
    "tpu.trace_stop"() : () -> ()
    %cst_8 = arith.constant dense<0xFF800000> : vector<8x16xf32>
    %38 = vector.multi_reduction <maximumf>, %37, %cst_8 [2] : vector<8x16x16xf32> to vector<8x16xf32>
    %39 = vector.shape_cast %38 : vector<8x16xf32> to vector<8x16x1xf32>
    %40 = vector.broadcast %39 : vector<8x16x1xf32> to vector<8x16x16xf32>
    %41 = arith.subf %37, %40 : vector<8x16x16xf32>
    %42 = math.exp %41 : vector<8x16x16xf32>
    %cst_9 = arith.constant dense<0.000000e+00> : vector<8x16xf32>
    %43 = vector.multi_reduction <add>, %42, %cst_9 [2] : vector<8x16x16xf32> to vector<8x16xf32>
    %44 = vector.shape_cast %43 : vector<8x16xf32> to vector<8x16x1xf32>
    %45 = vector.broadcast %44 : vector<8x16x1xf32> to vector<8x16x16xf32>
    %46 = arith.divf %42, %45 : vector<8x16x16xf32>
    "tpu.trace_start"() <{level = 10 : i32, message = "bqk,bkd->bqd"}> : () -> ()
    %cst_10 = arith.constant dense<0.000000e+00> : vector<8x16x8xf32>
    %47 = tpu.matmul %46, %36, %cst_10 {dimension_numbers = #tpu.dot_dimension_numbers<[2], [1], [1], [2], [0, 0, 0, 1, 1, 2], [0], [0]>} : vector<8x16x16xf32>, vector<8x16x8xf32>, vector<8x16x8xf32> -> vector<8x16x8xf32>
    "tpu.trace_stop"() : () -> ()
    %48 = vector.shape_cast %47 : vector<8x16x8xf32> to vector<4x32x8xf32>
    %c152 = arith.constant 152 : index
    %c0_11 = arith.constant 0 : index
    %49 = vector.load %arg1[%c152, %c0_11] : memref<584x128xf32, #tpu.memory_space<vmem>>, vector<1x32xf32>
    %c120 = arith.constant 120 : index
    %c0_12 = arith.constant 0 : index
    %50 = vector.load %arg1[%c120, %c0_12] : memref<584x128xf32, #tpu.memory_space<vmem>>, vector<8x32xf32>
    %51 = vector.extract_strided_slice %48 {offsets = [0, 0, 0], sizes = [1, 32, 8], strides = [1, 1, 1]} : vector<4x32x8xf32> to vector<1x32x8xf32>
    %52 = vector.shape_cast %51 : vector<1x32x8xf32> to vector<32x8xf32>
    %cst_13 = arith.constant dense<0.000000e+00> : vector<32x32xf32>
    %53 = tpu.matmul %52, %50, %cst_13 {dimension_numbers = #tpu.dot_dimension_numbers<[1], [0], [0], [1], [0, 0, 1, 1], [], []>} : vector<32x8xf32>, vector<8x32xf32>, vector<32x32xf32> -> vector<32x32xf32>
    %54 = vector.broadcast %49 : vector<1x32xf32> to vector<32x32xf32>
    %55 = arith.addf %54, %53 : vector<32x32xf32>
    %c128 = arith.constant 128 : index
    %c0_14 = arith.constant 0 : index
    %56 = vector.load %arg1[%c128, %c0_14] : memref<584x128xf32, #tpu.memory_space<vmem>>, vector<8x32xf32>
    %57 = vector.extract_strided_slice %48 {offsets = [1, 0, 0], sizes = [1, 32, 8], strides = [1, 1, 1]} : vector<4x32x8xf32> to vector<1x32x8xf32>
    %58 = vector.shape_cast %57 : vector<1x32x8xf32> to vector<32x8xf32>
    %cst_15 = arith.constant dense<0.000000e+00> : vector<32x32xf32>
    %59 = tpu.matmul %58, %56, %cst_15 {dimension_numbers = #tpu.dot_dimension_numbers<[1], [0], [0], [1], [0, 0, 1, 1], [], []>} : vector<32x8xf32>, vector<8x32xf32>, vector<32x32xf32> -> vector<32x32xf32>
    %60 = arith.addf %55, %59 : vector<32x32xf32>
    %c136 = arith.constant 136 : index
    %c0_16 = arith.constant 0 : index
    %61 = vector.load %arg1[%c136, %c0_16] : memref<584x128xf32, #tpu.memory_space<vmem>>, vector<8x32xf32>
    %62 = vector.extract_strided_slice %48 {offsets = [2, 0, 0], sizes = [1, 32, 8], strides = [1, 1, 1]} : vector<4x32x8xf32> to vector<1x32x8xf32>
    %63 = vector.shape_cast %62 : vector<1x32x8xf32> to vector<32x8xf32>
    %cst_17 = arith.constant dense<0.000000e+00> : vector<32x32xf32>
    %64 = tpu.matmul %63, %61, %cst_17 {dimension_numbers = #tpu.dot_dimension_numbers<[1], [0], [0], [1], [0, 0, 1, 1], [], []>} : vector<32x8xf32>, vector<8x32xf32>, vector<32x32xf32> -> vector<32x32xf32>
    %65 = arith.addf %60, %64 : vector<32x32xf32>
    %c144 = arith.constant 144 : index
    %c0_18 = arith.constant 0 : index
    %66 = vector.load %arg1[%c144, %c0_18] : memref<584x128xf32, #tpu.memory_space<vmem>>, vector<8x32xf32>
    %67 = vector.extract_strided_slice %48 {offsets = [3, 0, 0], sizes = [1, 32, 8], strides = [1, 1, 1]} : vector<4x32x8xf32> to vector<1x32x8xf32>
    %68 = vector.shape_cast %67 : vector<1x32x8xf32> to vector<32x8xf32>
    %cst_19 = arith.constant dense<0.000000e+00> : vector<32x32xf32>
    %69 = tpu.matmul %68, %66, %cst_19 {dimension_numbers = #tpu.dot_dimension_numbers<[1], [0], [0], [1], [0, 0, 1, 1], [], []>} : vector<32x8xf32>, vector<8x32xf32>, vector<32x32xf32> -> vector<32x32xf32>
    %70 = arith.addf %65, %69 : vector<32x32xf32>
    %71 = arith.addf %10, %70 : vector<32x32xf32>
    %c160 = arith.constant 160 : index
    %c0_20 = arith.constant 0 : index
    %72 = vector.load %arg1[%c160, %c0_20] : memref<584x128xf32, #tpu.memory_space<vmem>>, vector<1x32xf32>
    %c168 = arith.constant 168 : index
    %c0_21 = arith.constant 0 : index
    %73 = vector.load %arg1[%c168, %c0_21] : memref<584x128xf32, #tpu.memory_space<vmem>>, vector<1x32xf32>
    %cst_22 = arith.constant dense<0.000000e+00> : vector<32xf32>
    %74 = vector.multi_reduction <add>, %71, %cst_22 [1] : vector<32x32xf32> to vector<32xf32>
    %75 = vector.shape_cast %74 : vector<32xf32> to vector<32x1xf32>
    %cst_23 = arith.constant 3.200000e+01 : f32
    %76 = vector.broadcast %cst_23 : f32 to vector<32x1xf32>
    %77 = arith.divf %75, %76 : vector<32x1xf32>
    %78 = vector.broadcast %77 : vector<32x1xf32> to vector<32x32xf32>
    %79 = arith.subf %71, %78 : vector<32x32xf32>
    %80 = arith.mulf %79, %79 : vector<32x32xf32>
    %cst_24 = arith.constant dense<0.000000e+00> : vector<32xf32>
    %81 = vector.multi_reduction <add>, %80, %cst_24 [1] : vector<32x32xf32> to vector<32xf32>
    %82 = vector.shape_cast %81 : vector<32xf32> to vector<32x1xf32>
    %cst_25 = arith.constant 3.200000e+01 : f32
    %83 = vector.broadcast %cst_25 : f32 to vector<32x1xf32>
    %84 = arith.divf %82, %83 : vector<32x1xf32>
    %85 = vector.broadcast %77 : vector<32x1xf32> to vector<32x32xf32>
    %86 = arith.subf %71, %85 : vector<32x32xf32>
    %cst_26 = arith.constant 9.99999974E-6 : f32
    %87 = vector.broadcast %cst_26 : f32 to vector<32x1xf32>
    %88 = arith.addf %84, %87 : vector<32x1xf32>
    %89 = math.rsqrt %88 : vector<32x1xf32>
    %90 = vector.broadcast %89 : vector<32x1xf32> to vector<32x32xf32>
    %91 = arith.mulf %86, %90 : vector<32x32xf32>
    %92 = vector.broadcast %72 : vector<1x32xf32> to vector<32x32xf32>
    %93 = arith.mulf %91, %92 : vector<32x32xf32>
    %94 = vector.broadcast %73 : vector<1x32xf32> to vector<32x32xf32>
    %95 = arith.addf %93, %94 : vector<32x32xf32>
    %c176 = arith.constant 176 : index
    %c0_27 = arith.constant 0 : index
    %96 = vector.load %arg1[%c176, %c0_27] : memref<584x128xf32, #tpu.memory_space<vmem>>, vector<32x64xf32>
    %cst_28 = arith.constant dense<0.000000e+00> : vector<32x64xf32>
    %97 = tpu.matmul %95, %96, %cst_28 {dimension_numbers = #tpu.dot_dimension_numbers<[1], [0], [0], [1], [0, 0, 1, 1], [], []>} : vector<32x32xf32>, vector<32x64xf32>, vector<32x64xf32> -> vector<32x64xf32>
    %c208 = arith.constant 208 : index
    %c0_29 = arith.constant 0 : index
    %98 = vector.load %arg1[%c208, %c0_29] : memref<584x128xf32, #tpu.memory_space<vmem>>, vector<1x64xf32>
    %99 = vector.broadcast %98 : vector<1x64xf32> to vector<32x64xf32>
    %100 = arith.addf %97, %99 : vector<32x64xf32>
    %cst_30 = arith.constant 0.000000e+00 : f32
    %101 = vector.broadcast %cst_30 : f32 to vector<32x64xf32>
    %102 = arith.maximumf %100, %101 : vector<32x64xf32>
    %c216 = arith.constant 216 : index
    %c0_31 = arith.constant 0 : index
    %103 = vector.load %arg1[%c216, %c0_31] : memref<584x128xf32, #tpu.memory_space<vmem>>, vector<64x32xf32>
    %cst_32 = arith.constant dense<0.000000e+00> : vector<32x32xf32>
    %104 = tpu.matmul %102, %103, %cst_32 {dimension_numbers = #tpu.dot_dimension_numbers<[1], [0], [0], [1], [0, 0, 1, 1], [], []>} : vector<32x64xf32>, vector<64x32xf32>, vector<32x32xf32> -> vector<32x32xf32>
    %c280 = arith.constant 280 : index
    %c0_33 = arith.constant 0 : index
    %105 = vector.load %arg1[%c280, %c0_33] : memref<584x128xf32, #tpu.memory_space<vmem>>, vector<1x32xf32>
    %106 = vector.broadcast %105 : vector<1x32xf32> to vector<32x32xf32>
    %107 = arith.addf %104, %106 : vector<32x32xf32>
    %108 = arith.addf %95, %107 : vector<32x32xf32>
    %c288 = arith.constant 288 : index
    %c0_34 = arith.constant 0 : index
    %109 = vector.load %arg1[%c288, %c0_34] : memref<584x128xf32, #tpu.memory_space<vmem>>, vector<1x32xf32>
    %c296 = arith.constant 296 : index
    %c0_35 = arith.constant 0 : index
    %110 = vector.load %arg1[%c296, %c0_35] : memref<584x128xf32, #tpu.memory_space<vmem>>, vector<1x32xf32>
    %cst_36 = arith.constant dense<0.000000e+00> : vector<32xf32>
    %111 = vector.multi_reduction <add>, %108, %cst_36 [1] : vector<32x32xf32> to vector<32xf32>
    %112 = vector.shape_cast %111 : vector<32xf32> to vector<32x1xf32>
    %cst_37 = arith.constant 3.200000e+01 : f32
    %113 = vector.broadcast %cst_37 : f32 to vector<32x1xf32>
    %114 = arith.divf %112, %113 : vector<32x1xf32>
    %115 = vector.broadcast %114 : vector<32x1xf32> to vector<32x32xf32>
    %116 = arith.subf %108, %115 : vector<32x32xf32>
    %117 = arith.mulf %116, %116 : vector<32x32xf32>
    %cst_38 = arith.constant dense<0.000000e+00> : vector<32xf32>
    %118 = vector.multi_reduction <add>, %117, %cst_38 [1] : vector<32x32xf32> to vector<32xf32>
    %119 = vector.shape_cast %118 : vector<32xf32> to vector<32x1xf32>
    %cst_39 = arith.constant 3.200000e+01 : f32
    %120 = vector.broadcast %cst_39 : f32 to vector<32x1xf32>
    %121 = arith.divf %119, %120 : vector<32x1xf32>
    %122 = vector.broadcast %114 : vector<32x1xf32> to vector<32x32xf32>
    %123 = arith.subf %108, %122 : vector<32x32xf32>
    %cst_40 = arith.constant 9.99999974E-6 : f32
    %124 = vector.broadcast %cst_40 : f32 to vector<32x1xf32>
    %125 = arith.addf %121, %124 : vector<32x1xf32>
    %126 = math.rsqrt %125 : vector<32x1xf32>
    %127 = vector.broadcast %126 : vector<32x1xf32> to vector<32x32xf32>
    %128 = arith.mulf %123, %127 : vector<32x32xf32>
    %129 = vector.broadcast %109 : vector<1x32xf32> to vector<32x32xf32>
    %130 = arith.mulf %128, %129 : vector<32x32xf32>
    %131 = vector.broadcast %110 : vector<1x32xf32> to vector<32x32xf32>
    %132 = arith.addf %130, %131 : vector<32x32xf32>
    %c304 = arith.constant 304 : index
    %c0_41 = arith.constant 0 : index
    %133 = vector.load %arg1[%c304, %c0_41] : memref<584x128xf32, #tpu.memory_space<vmem>>, vector<32x96xf32>
    %c336 = arith.constant 336 : index
    %c0_42 = arith.constant 0 : index
    %134 = vector.load %arg1[%c336, %c0_42] : memref<584x128xf32, #tpu.memory_space<vmem>>, vector<1x96xf32>
    %cst_43 = arith.constant dense<0.000000e+00> : vector<32x96xf32>
    %135 = tpu.matmul %132, %133, %cst_43 {dimension_numbers = #tpu.dot_dimension_numbers<[1], [0], [0], [1], [0, 0, 1, 1], [], []>} : vector<32x32xf32>, vector<32x96xf32>, vector<32x96xf32> -> vector<32x96xf32>
    %136 = vector.broadcast %134 : vector<1x96xf32> to vector<32x96xf32>
    %137 = arith.addf %135, %136 : vector<32x96xf32>
    %138 = vector.extract_strided_slice %137 {offsets = [0, 0], sizes = [32, 32], strides = [1, 1]} : vector<32x96xf32> to vector<32x32xf32>
    %139 = vector.extract_strided_slice %137 {offsets = [0, 32], sizes = [32, 32], strides = [1, 1]} : vector<32x96xf32> to vector<32x32xf32>
    %140 = vector.extract_strided_slice %137 {offsets = [0, 64], sizes = [32, 32], strides = [1, 1]} : vector<32x96xf32> to vector<32x32xf32>
    %141 = vector.extract_strided_slice %138 {offsets = [0, 0], sizes = [32, 8], strides = [1, 1]} : vector<32x32xf32> to vector<32x8xf32>
    %142 = vector.extract_strided_slice %138 {offsets = [0, 8], sizes = [32, 8], strides = [1, 1]} : vector<32x32xf32> to vector<32x8xf32>
    %143 = vector.extract_strided_slice %138 {offsets = [0, 16], sizes = [32, 8], strides = [1, 1]} : vector<32x32xf32> to vector<32x8xf32>
    %144 = vector.extract_strided_slice %138 {offsets = [0, 24], sizes = [32, 8], strides = [1, 1]} : vector<32x32xf32> to vector<32x8xf32>
    %145 = tpu.concatenate %141, %142, %143, %144 in 0 : vector<32x8xf32>, vector<32x8xf32>, vector<32x8xf32>, vector<32x8xf32> -> vector<128x8xf32>
    %146 = vector.shape_cast %145 : vector<128x8xf32> to vector<8x16x8xf32>
    %147 = vector.extract_strided_slice %139 {offsets = [0, 0], sizes = [32, 8], strides = [1, 1]} : vector<32x32xf32> to vector<32x8xf32>
    %148 = vector.extract_strided_slice %139 {offsets = [0, 8], sizes = [32, 8], strides = [1, 1]} : vector<32x32xf32> to vector<32x8xf32>
    %149 = vector.extract_strided_slice %139 {offsets = [0, 16], sizes = [32, 8], strides = [1, 1]} : vector<32x32xf32> to vector<32x8xf32>
    %150 = vector.extract_strided_slice %139 {offsets = [0, 24], sizes = [32, 8], strides = [1, 1]} : vector<32x32xf32> to vector<32x8xf32>
    %151 = tpu.concatenate %147, %148, %149, %150 in 0 : vector<32x8xf32>, vector<32x8xf32>, vector<32x8xf32>, vector<32x8xf32> -> vector<128x8xf32>
    %152 = vector.shape_cast %151 : vector<128x8xf32> to vector<8x16x8xf32>
    %153 = vector.extract_strided_slice %140 {offsets = [0, 0], sizes = [32, 8], strides = [1, 1]} : vector<32x32xf32> to vector<32x8xf32>
    %154 = vector.extract_strided_slice %140 {offsets = [0, 8], sizes = [32, 8], strides = [1, 1]} : vector<32x32xf32> to vector<32x8xf32>
    %155 = vector.extract_strided_slice %140 {offsets = [0, 16], sizes = [32, 8], strides = [1, 1]} : vector<32x32xf32> to vector<32x8xf32>
    %156 = vector.extract_strided_slice %140 {offsets = [0, 24], sizes = [32, 8], strides = [1, 1]} : vector<32x32xf32> to vector<32x8xf32>
    %157 = tpu.concatenate %153, %154, %155, %156 in 0 : vector<32x8xf32>, vector<32x8xf32>, vector<32x8xf32>, vector<32x8xf32> -> vector<128x8xf32>
    %158 = vector.shape_cast %157 : vector<128x8xf32> to vector<8x16x8xf32>
    "tpu.trace_start"() <{level = 10 : i32, message = "bqd,bkd->bqk"}> : () -> ()
    %cst_44 = arith.constant dense<0.000000e+00> : vector<8x16x16xf32>
    %159 = tpu.matmul %146, %152, %cst_44 {dimension_numbers = #tpu.dot_dimension_numbers<[2], [2], [1], [1], [0, 0, 0, 1, 1, 1], [0], [0]>} : vector<8x16x8xf32>, vector<8x16x8xf32>, vector<8x16x16xf32> -> vector<8x16x16xf32>
    "tpu.trace_stop"() : () -> ()
    %cst_45 = arith.constant dense<0xFF800000> : vector<8x16xf32>
    %160 = vector.multi_reduction <maximumf>, %159, %cst_45 [2] : vector<8x16x16xf32> to vector<8x16xf32>
    %161 = vector.shape_cast %160 : vector<8x16xf32> to vector<8x16x1xf32>
    %162 = vector.broadcast %161 : vector<8x16x1xf32> to vector<8x16x16xf32>
    %163 = arith.subf %159, %162 : vector<8x16x16xf32>
    %164 = math.exp %163 : vector<8x16x16xf32>
    %cst_46 = arith.constant dense<0.000000e+00> : vector<8x16xf32>
    %165 = vector.multi_reduction <add>, %164, %cst_46 [2] : vector<8x16x16xf32> to vector<8x16xf32>
    %166 = vector.shape_cast %165 : vector<8x16xf32> to vector<8x16x1xf32>
    %167 = vector.broadcast %166 : vector<8x16x1xf32> to vector<8x16x16xf32>
    %168 = arith.divf %164, %167 : vector<8x16x16xf32>
    "tpu.trace_start"() <{level = 10 : i32, message = "bqk,bkd->bqd"}> : () -> ()
    %cst_47 = arith.constant dense<0.000000e+00> : vector<8x16x8xf32>
    %169 = tpu.matmul %168, %158, %cst_47 {dimension_numbers = #tpu.dot_dimension_numbers<[2], [1], [1], [2], [0, 0, 0, 1, 1, 2], [0], [0]>} : vector<8x16x16xf32>, vector<8x16x8xf32>, vector<8x16x8xf32> -> vector<8x16x8xf32>
    "tpu.trace_stop"() : () -> ()
    %170 = vector.shape_cast %169 : vector<8x16x8xf32> to vector<4x32x8xf32>
    %c376 = arith.constant 376 : index
    %c0_48 = arith.constant 0 : index
    %171 = vector.load %arg1[%c376, %c0_48] : memref<584x128xf32, #tpu.memory_space<vmem>>, vector<1x32xf32>
    %c344 = arith.constant 344 : index
    %c0_49 = arith.constant 0 : index
    %172 = vector.load %arg1[%c344, %c0_49] : memref<584x128xf32, #tpu.memory_space<vmem>>, vector<8x32xf32>
    %173 = vector.extract_strided_slice %170 {offsets = [0, 0, 0], sizes = [1, 32, 8], strides = [1, 1, 1]} : vector<4x32x8xf32> to vector<1x32x8xf32>
    %174 = vector.shape_cast %173 : vector<1x32x8xf32> to vector<32x8xf32>
    %cst_50 = arith.constant dense<0.000000e+00> : vector<32x32xf32>
    %175 = tpu.matmul %174, %172, %cst_50 {dimension_numbers = #tpu.dot_dimension_numbers<[1], [0], [0], [1], [0, 0, 1, 1], [], []>} : vector<32x8xf32>, vector<8x32xf32>, vector<32x32xf32> -> vector<32x32xf32>
    %176 = vector.broadcast %171 : vector<1x32xf32> to vector<32x32xf32>
    %177 = arith.addf %176, %175 : vector<32x32xf32>
    %c352 = arith.constant 352 : index
    %c0_51 = arith.constant 0 : index
    %178 = vector.load %arg1[%c352, %c0_51] : memref<584x128xf32, #tpu.memory_space<vmem>>, vector<8x32xf32>
    %179 = vector.extract_strided_slice %170 {offsets = [1, 0, 0], sizes = [1, 32, 8], strides = [1, 1, 1]} : vector<4x32x8xf32> to vector<1x32x8xf32>
    %180 = vector.shape_cast %179 : vector<1x32x8xf32> to vector<32x8xf32>
    %cst_52 = arith.constant dense<0.000000e+00> : vector<32x32xf32>
    %181 = tpu.matmul %180, %178, %cst_52 {dimension_numbers = #tpu.dot_dimension_numbers<[1], [0], [0], [1], [0, 0, 1, 1], [], []>} : vector<32x8xf32>, vector<8x32xf32>, vector<32x32xf32> -> vector<32x32xf32>
    %182 = arith.addf %177, %181 : vector<32x32xf32>
    %c360 = arith.constant 360 : index
    %c0_53 = arith.constant 0 : index
    %183 = vector.load %arg1[%c360, %c0_53] : memref<584x128xf32, #tpu.memory_space<vmem>>, vector<8x32xf32>
    %184 = vector.extract_strided_slice %170 {offsets = [2, 0, 0], sizes = [1, 32, 8], strides = [1, 1, 1]} : vector<4x32x8xf32> to vector<1x32x8xf32>
    %185 = vector.shape_cast %184 : vector<1x32x8xf32> to vector<32x8xf32>
    %cst_54 = arith.constant dense<0.000000e+00> : vector<32x32xf32>
    %186 = tpu.matmul %185, %183, %cst_54 {dimension_numbers = #tpu.dot_dimension_numbers<[1], [0], [0], [1], [0, 0, 1, 1], [], []>} : vector<32x8xf32>, vector<8x32xf32>, vector<32x32xf32> -> vector<32x32xf32>
    %187 = arith.addf %182, %186 : vector<32x32xf32>
    %c368 = arith.constant 368 : index
    %c0_55 = arith.constant 0 : index
    %188 = vector.load %arg1[%c368, %c0_55] : memref<584x128xf32, #tpu.memory_space<vmem>>, vector<8x32xf32>
    %189 = vector.extract_strided_slice %170 {offsets = [3, 0, 0], sizes = [1, 32, 8], strides = [1, 1, 1]} : vector<4x32x8xf32> to vector<1x32x8xf32>
    %190 = vector.shape_cast %189 : vector<1x32x8xf32> to vector<32x8xf32>
    %cst_56 = arith.constant dense<0.000000e+00> : vector<32x32xf32>
    %191 = tpu.matmul %190, %188, %cst_56 {dimension_numbers = #tpu.dot_dimension_numbers<[1], [0], [0], [1], [0, 0, 1, 1], [], []>} : vector<32x8xf32>, vector<8x32xf32>, vector<32x32xf32> -> vector<32x32xf32>
    %192 = arith.addf %187, %191 : vector<32x32xf32>
    %193 = arith.addf %132, %192 : vector<32x32xf32>
    %c384 = arith.constant 384 : index
    %c0_57 = arith.constant 0 : index
    %194 = vector.load %arg1[%c384, %c0_57] : memref<584x128xf32, #tpu.memory_space<vmem>>, vector<1x32xf32>
    %c392 = arith.constant 392 : index
    %c0_58 = arith.constant 0 : index
    %195 = vector.load %arg1[%c392, %c0_58] : memref<584x128xf32, #tpu.memory_space<vmem>>, vector<1x32xf32>
    %cst_59 = arith.constant dense<0.000000e+00> : vector<32xf32>
    %196 = vector.multi_reduction <add>, %193, %cst_59 [1] : vector<32x32xf32> to vector<32xf32>
    %197 = vector.shape_cast %196 : vector<32xf32> to vector<32x1xf32>
    %cst_60 = arith.constant 3.200000e+01 : f32
    %198 = vector.broadcast %cst_60 : f32 to vector<32x1xf32>
    %199 = arith.divf %197, %198 : vector<32x1xf32>
    %200 = vector.broadcast %199 : vector<32x1xf32> to vector<32x32xf32>
    %201 = arith.subf %193, %200 : vector<32x32xf32>
    %202 = arith.mulf %201, %201 : vector<32x32xf32>
    %cst_61 = arith.constant dense<0.000000e+00> : vector<32xf32>
    %203 = vector.multi_reduction <add>, %202, %cst_61 [1] : vector<32x32xf32> to vector<32xf32>
    %204 = vector.shape_cast %203 : vector<32xf32> to vector<32x1xf32>
    %cst_62 = arith.constant 3.200000e+01 : f32
    %205 = vector.broadcast %cst_62 : f32 to vector<32x1xf32>
    %206 = arith.divf %204, %205 : vector<32x1xf32>
    %207 = vector.broadcast %199 : vector<32x1xf32> to vector<32x32xf32>
    %208 = arith.subf %193, %207 : vector<32x32xf32>
    %cst_63 = arith.constant 9.99999974E-6 : f32
    %209 = vector.broadcast %cst_63 : f32 to vector<32x1xf32>
    %210 = arith.addf %206, %209 : vector<32x1xf32>
    %211 = math.rsqrt %210 : vector<32x1xf32>
    %212 = vector.broadcast %211 : vector<32x1xf32> to vector<32x32xf32>
    %213 = arith.mulf %208, %212 : vector<32x32xf32>
    %214 = vector.broadcast %194 : vector<1x32xf32> to vector<32x32xf32>
    %215 = arith.mulf %213, %214 : vector<32x32xf32>
    %216 = vector.broadcast %195 : vector<1x32xf32> to vector<32x32xf32>
    %217 = arith.addf %215, %216 : vector<32x32xf32>
    %c400 = arith.constant 400 : index
    %c0_64 = arith.constant 0 : index
    %218 = vector.load %arg1[%c400, %c0_64] : memref<584x128xf32, #tpu.memory_space<vmem>>, vector<32x64xf32>
    %cst_65 = arith.constant dense<0.000000e+00> : vector<32x64xf32>
    %219 = tpu.matmul %217, %218, %cst_65 {dimension_numbers = #tpu.dot_dimension_numbers<[1], [0], [0], [1], [0, 0, 1, 1], [], []>} : vector<32x32xf32>, vector<32x64xf32>, vector<32x64xf32> -> vector<32x64xf32>
    %c432 = arith.constant 432 : index
    %c0_66 = arith.constant 0 : index
    %220 = vector.load %arg1[%c432, %c0_66] : memref<584x128xf32, #tpu.memory_space<vmem>>, vector<1x64xf32>
    %221 = vector.broadcast %220 : vector<1x64xf32> to vector<32x64xf32>
    %222 = arith.addf %219, %221 : vector<32x64xf32>
    %cst_67 = arith.constant 0.000000e+00 : f32
    %223 = vector.broadcast %cst_67 : f32 to vector<32x64xf32>
    %224 = arith.maximumf %222, %223 : vector<32x64xf32>
    %c440 = arith.constant 440 : index
    %c0_68 = arith.constant 0 : index
    %225 = vector.load %arg1[%c440, %c0_68] : memref<584x128xf32, #tpu.memory_space<vmem>>, vector<64x32xf32>
    %cst_69 = arith.constant dense<0.000000e+00> : vector<32x32xf32>
    %226 = tpu.matmul %224, %225, %cst_69 {dimension_numbers = #tpu.dot_dimension_numbers<[1], [0], [0], [1], [0, 0, 1, 1], [], []>} : vector<32x64xf32>, vector<64x32xf32>, vector<32x32xf32> -> vector<32x32xf32>
    %c504 = arith.constant 504 : index
    %c0_70 = arith.constant 0 : index
    %227 = vector.load %arg1[%c504, %c0_70] : memref<584x128xf32, #tpu.memory_space<vmem>>, vector<1x32xf32>
    %228 = vector.broadcast %227 : vector<1x32xf32> to vector<32x32xf32>
    %229 = arith.addf %226, %228 : vector<32x32xf32>
    %230 = arith.addf %217, %229 : vector<32x32xf32>
    %c512 = arith.constant 512 : index
    %c0_71 = arith.constant 0 : index
    %231 = vector.load %arg1[%c512, %c0_71] : memref<584x128xf32, #tpu.memory_space<vmem>>, vector<1x32xf32>
    %c520 = arith.constant 520 : index
    %c0_72 = arith.constant 0 : index
    %232 = vector.load %arg1[%c520, %c0_72] : memref<584x128xf32, #tpu.memory_space<vmem>>, vector<1x32xf32>
    %cst_73 = arith.constant dense<0.000000e+00> : vector<32xf32>
    %233 = vector.multi_reduction <add>, %230, %cst_73 [1] : vector<32x32xf32> to vector<32xf32>
    %234 = vector.shape_cast %233 : vector<32xf32> to vector<32x1xf32>
    %cst_74 = arith.constant 3.200000e+01 : f32
    %235 = vector.broadcast %cst_74 : f32 to vector<32x1xf32>
    %236 = arith.divf %234, %235 : vector<32x1xf32>
    %237 = vector.broadcast %236 : vector<32x1xf32> to vector<32x32xf32>
    %238 = arith.subf %230, %237 : vector<32x32xf32>
    %239 = arith.mulf %238, %238 : vector<32x32xf32>
    %cst_75 = arith.constant dense<0.000000e+00> : vector<32xf32>
    %240 = vector.multi_reduction <add>, %239, %cst_75 [1] : vector<32x32xf32> to vector<32xf32>
    %241 = vector.shape_cast %240 : vector<32xf32> to vector<32x1xf32>
    %cst_76 = arith.constant 3.200000e+01 : f32
    %242 = vector.broadcast %cst_76 : f32 to vector<32x1xf32>
    %243 = arith.divf %241, %242 : vector<32x1xf32>
    %244 = vector.broadcast %236 : vector<32x1xf32> to vector<32x32xf32>
    %245 = arith.subf %230, %244 : vector<32x32xf32>
    %cst_77 = arith.constant 9.99999974E-6 : f32
    %246 = vector.broadcast %cst_77 : f32 to vector<32x1xf32>
    %247 = arith.addf %243, %246 : vector<32x1xf32>
    %248 = math.rsqrt %247 : vector<32x1xf32>
    %249 = vector.broadcast %248 : vector<32x1xf32> to vector<32x32xf32>
    %250 = arith.mulf %245, %249 : vector<32x32xf32>
    %251 = vector.broadcast %231 : vector<1x32xf32> to vector<32x32xf32>
    %252 = arith.mulf %250, %251 : vector<32x32xf32>
    %253 = vector.broadcast %232 : vector<1x32xf32> to vector<32x32xf32>
    %254 = arith.addf %252, %253 : vector<32x32xf32>
    %c528 = arith.constant 528 : index
    %c0_78 = arith.constant 0 : index
    %255 = vector.load %arg1[%c528, %c0_78] : memref<584x128xf32, #tpu.memory_space<vmem>>, vector<1x32xf32>
    %c536 = arith.constant 536 : index
    %c0_79 = arith.constant 0 : index
    %256 = vector.load %arg1[%c536, %c0_79] : memref<584x128xf32, #tpu.memory_space<vmem>>, vector<1x32xf32>
    %cst_80 = arith.constant dense<0.000000e+00> : vector<32xf32>
    %257 = vector.multi_reduction <add>, %254, %cst_80 [1] : vector<32x32xf32> to vector<32xf32>
    %258 = vector.shape_cast %257 : vector<32xf32> to vector<32x1xf32>
    %cst_81 = arith.constant 3.200000e+01 : f32
    %259 = vector.broadcast %cst_81 : f32 to vector<32x1xf32>
    %260 = arith.divf %258, %259 : vector<32x1xf32>
    %261 = vector.broadcast %260 : vector<32x1xf32> to vector<32x32xf32>
    %262 = arith.subf %254, %261 : vector<32x32xf32>
    %263 = arith.mulf %262, %262 : vector<32x32xf32>
    %cst_82 = arith.constant dense<0.000000e+00> : vector<32xf32>
    %264 = vector.multi_reduction <add>, %263, %cst_82 [1] : vector<32x32xf32> to vector<32xf32>
    %265 = vector.shape_cast %264 : vector<32xf32> to vector<32x1xf32>
    %cst_83 = arith.constant 3.200000e+01 : f32
    %266 = vector.broadcast %cst_83 : f32 to vector<32x1xf32>
    %267 = arith.divf %265, %266 : vector<32x1xf32>
    %268 = vector.broadcast %260 : vector<32x1xf32> to vector<32x32xf32>
    %269 = arith.subf %254, %268 : vector<32x32xf32>
    %cst_84 = arith.constant 9.99999974E-6 : f32
    %270 = vector.broadcast %cst_84 : f32 to vector<32x1xf32>
    %271 = arith.addf %267, %270 : vector<32x1xf32>
    %272 = math.rsqrt %271 : vector<32x1xf32>
    %273 = vector.broadcast %272 : vector<32x1xf32> to vector<32x32xf32>
    %274 = arith.mulf %269, %273 : vector<32x32xf32>
    %275 = vector.broadcast %255 : vector<1x32xf32> to vector<32x32xf32>
    %276 = arith.mulf %274, %275 : vector<32x32xf32>
    %277 = vector.broadcast %256 : vector<1x32xf32> to vector<32x32xf32>
    %278 = arith.addf %276, %277 : vector<32x32xf32>
    %c544 = arith.constant 544 : index
    %c0_85 = arith.constant 0 : index
    %279 = vector.load %arg1[%c544, %c0_85] : memref<584x128xf32, #tpu.memory_space<vmem>>, vector<32x128xf32>
    %cst_86 = arith.constant dense<0.000000e+00> : vector<32x128xf32>
    %280 = tpu.matmul %278, %279, %cst_86 {dimension_numbers = #tpu.dot_dimension_numbers<[1], [0], [0], [1], [0, 0, 1, 1], [], []>} : vector<32x32xf32>, vector<32x128xf32>, vector<32x128xf32> -> vector<32x128xf32>
    %c576 = arith.constant 576 : index
    %c0_87 = arith.constant 0 : index
    %281 = vector.load %arg1[%c576, %c0_87] : memref<584x128xf32, #tpu.memory_space<vmem>>, vector<1x128xf32>
    %282 = vector.broadcast %281 : vector<1x128xf32> to vector<32x128xf32>
    %283 = arith.addf %280, %282 : vector<32x128xf32>
    %c0_88 = arith.constant 0 : index
    %c0_89 = arith.constant 0 : index
    %284 = vector.load %arg2[%c0_88, %c0_89] : memref<32x128xf32, #tpu.memory_space<vmem>>, vector<32x128xf32>
    tpu.vector_store %arg2[%c0_88, %c0_89], %283 {strides = array<i32>} : memref<32x128xf32, #tpu.memory_space<vmem>>, vector<32x128xf32>,
    return
  }
}

</mosaic_0001>

<bundles_post_ra>
// kernel: transformer_forward.1
= control target key start
LH: loop header
LB: loop body
LE: loop exit
PB: predicated region body
PF: predicated region fallthrough
CT: control target
= control target key end

     0   :  { %7 = vsyncpa [#allocation3], 0  ;;  %s4952_s0 = inlined_call_operand.vmem [shape: s32[32,1], index: 0, kind: input, shape index: {}]   ;;  %s4953_s1 = inlined_call_operand.hbm [shape: f32[584,128], index: 1, kind: input, shape index: {}]   ;;  %s4954_s2 = inlined_call_operand.hbm [shape: f32[32,128], index: 2, kind: output, shape index: {}]  }
   0x1   :  { %8 = vsyncpa [#allocation4], 0  ;;  %s15_s11 = sshll.u32 %s4953_s1, 4  ;;  %s3819_s12 = smov [#allocation2]   ;;  %s16_s11 = int_to_ptr.hbm [resolvable:$true] %s15_s11 }
   0x2   :  { %s17_s13 = sshll.u32 %s3819_s12, 4  ;;  %s3820_s14 = smov 128   ;;  %s18_s13 = int_to_ptr.vmem [resolvable:$true] %s17_s13 }
   0x3   :  { %s3821_s15 = smov 8  }
   0x4   :  { %23 = dma.hbm_to_vmem [thread:$0]  %s16_s11, 9344, %s18_s13, [#allocation3], %s3820_s14, %s3820_s14, %s3821_s15  }
   0x5   :  { %3815 = dma.done.wait [#allocation3], 9344  }
   0x6   :  { %3816 = vsyncadd [#allocation3], 4294957952  ;;  %v3822_v0 = vmov 0   ;;  %v28_v1 = vld [vmem:[%s4952_s0] sm:$0xff]  ;;  %v30_v2 = vld [vmem:[%s4952_s0 + $0x10] sm:$0xff]  ;;  %v32_v13 = vlaneseq  ;;  %vm68_vm0 = vcmask 523264  }
   0x7   :  { %3496 = vset.pattern.permute.xlu0 %v3822_v0  ;;  %3497 = vset.pattern.permute.xlu1 %v3822_v0  ;;  %v65_v3 = vld [vmem:[#allocation2 + $0x38] sm:$0xff]  ;;  %v64_v4 = vld [vmem:[#allocation2 + $0x30] sm:$0xff]  ;;  %v63_v5 = vld [vmem:[#allocation2 + $0x28] sm:$0xff]  ;;  %v3823_v18 = vmov 0.0   ;;  %vm116_vm5 = vcmask 261120   ;;  %s3825_s23 = smov 96  }
   0x8   :  { %35 = vperm.xlu0 %3496, %v28_v1   ;;  %41 = vperm.xlu1 %3497, %v30_v2   ;;  %v62_v6 = vld [vmem:[#allocation2 + $0x20] sm:$0xff]  ;;  %v29_v7 = vld [vmem:[%s4952_s0 + $0x8] sm:$0xff]  ;;  %v31_v8 = vld [vmem:[%s4952_s0 + $0x18] sm:$0xff]  ;;  %v33_v16 = vand.u32 127, %v32_v13  ;;  %s3824_s0 = smov 120   ;;  %s3826_s24 = smov 112  }
   0x9   :  { %89 = vmatpush.msra.mxu0 %v65_v3  ;;  %v61_v9 = vld [vmem:[#allocation2 + $0x18] sm:$0xff]  ;;  %v60_v10 = vld [vmem:[#allocation2 + $0x10] sm:$0xff]  ;;  %v59_v11 = vld [vmem:[#allocation2 + $0x8] sm:$0xff]  ;;  %s3827_s25 = smov 104   ;;  %vm190_vm6 = vcmask 64512   ;;  %vm467_vm7 = vcmask 130048  }
   0xa   :  { %v58_v12 = vld [vmem:[#allocation2] sm:$0xff]  ;;  %v113_v14 = vld [vmem:[#allocation2 + $0x68] sm:$0xff]  ;;  %v111_v26 = vld [vmem:[#allocation2 + $0x58] sm:$0xff]  ;;  %s3828_s26 = smov 64   ;;  %s3830_s27 = smov [#allocation5]  }
   0xb   :  { %90 = vmatpush.msra.mxu0 %v64_v4  ;;  %v112_v15 = vld [vmem:[#allocation2 + $0x60] sm:$0xff]  ;;  %141 = vmatpush.msra.mxu1 %v113_v14  ;;  %v110_v27 = vld [vmem:[#allocation2 + $0x50] sm:$0xff]  ;;  %v67_v31 = vld [vmem:[#allocation2 + $0x48] sm:$0xff]  ;;  %s3305_s28 = sshll.u32 %s3830_s27, 4  ;;  %s3307_s3 = sshll.u32 %s4954_s2, 4  ;;  %s3306_s28 = int_to_ptr.vmem [resolvable:$true] %s3305_s28  ;;  %s3308_s3 = int_to_ptr.hbm [resolvable:$true] %s3307_s3 }
   0xc   :  { %v66_v28 = vld [vmem:[#allocation2 + $0x40] sm:$0xff]  ;;  %v3578_v39 = vld [vmem:[#allocation2 + $0x70] ss:$0 sm:$0xff] }
   0xd   :  { %91 = vmatpush.msra.mxu0 %v63_v5  ;;  %142 = vmatpush.msra.mxu1 %v112_v15 }
   0xf   :  { %92 = vmatpush.msra.mxu0 %v62_v6  ;;  %143 = vmatpush.msra.mxu1 %v111_v26 }
  0x10   :  { %38 = vperm.xlu0 %3496, %v29_v7   ;;  %44 = vperm.xlu1 %3497, %v31_v8  }
  0x11   :  { %93 = vmatpush.msra.mxu0 %v61_v9  ;;  %144 = vmatpush.msra.mxu1 %v110_v27 }
  0x13   :  { %94 = vmatpush.msra.mxu0 %v60_v10 }
  0x15   :  { %95 = vmatpush.msra.mxu0 %v59_v11 }
  0x17   :  { %96 = vmatpush.msra.mxu0 %v58_v12 }
  0x7a   :  { %v36_v17 = vpop.permute.xlu0 %35  ;;  %v42_v21 = vpop.permute.xlu1 %41 }
  0x7b   :  { %vm46_vm1 = vcmp.eq.s32.totalorder %v33_v16, %v36_v17  ;;  %vm48_vm3 = vcmp.eq.s32.totalorder %v33_v16, %v42_v21 }
  0x7c   :  { %v3320_v19 = vsel %vm46_vm1, 1.0, %v3823_v18  ;;  %v3322_v23 = vsel %vm48_vm3, 1.0, %v3823_v18 }
  0x7d   :  { %3324 = vmatmul.msk.f32.vlgmr.msra.gmra.mxu0 %vm68_vm0, %v3320_v19 }
  0x82   :  { %v39_v20 = vpop.permute.xlu0 %38  ;;  %v45_v24 = vpop.permute.xlu1 %44 }
  0x83   :  { %vm47_vm2 = vcmp.eq.s32.totalorder %v33_v16, %v39_v20  ;;  %vm49_vm4 = vcmp.eq.s32.totalorder %v33_v16, %v45_v24 }
  0x84   :  { %v3321_v22 = vsel %vm47_vm2, 1.0, %v3823_v18  ;;  %v3323_v25 = vsel %vm49_vm4, 1.0, %v3823_v18 }
  0x85   :  { %3325 = vmatmul.msk.f32.gmra.mxu0 %vm68_vm0, %v3321_v22 }
  0x8d   :  { %3326 = vmatmul.msk.f32.gmra.mxu0 %vm68_vm0, %v3322_v23 }
  0x95   :  { %3327 = vmatmul.msk.f32.gmra.mxu0 %vm68_vm0, %v3323_v25 }
  0xfa   :  { %v98_v29 = vpop.f32.mrf.mxu0 }
  0xfb   :  { %v3868_v30 = vadd.f32 %v98_v29, %v66_v28 }
  0xfd   :  { %3328 = vmatmul.msk.f32.vlgmr.msra.gmra.mxu1 %vm116_vm5, %v3868_v30 }
 0x102   :  { %v101_v32 = vpop.f32.mrf.mxu0 }
 0x103   :  { %v3872_v33 = vadd.f32 %v101_v32, %v67_v31 }
 0x105   :  { %3329 = vmatmul.msk.f32.gmra.mxu1 %vm116_vm5, %v3872_v33 }
 0x10a   :  { %v104_v34 = vpop.f32.mrf.mxu0 }
 0x10b   :  { %v3876_v35 = vadd.f32 %v104_v34, %v66_v28 }
 0x10d   :  { %3330 = vmatmul.msk.f32.gmra.mxu1 %vm116_vm5, %v3876_v35 }
 0x112   :  { %v107_v36 = vpop.f32.mrf.mxu0 }
 0x113   :  { %v3880_v37 = vadd.f32 %v107_v36, %v67_v31 }
 0x115   :  { %3331 = vmatmul.msk.f32.gmra.mxu1 %vm116_vm5, %v3880_v37 }
 0x17a   :  { %v146_v38 = vpop.f32.mrf.mxu1 }
 0x17b   :  { %v3888_v43 = vadd.f32 %v3578_v39, %v146_v38 }
 0x182   :  { %v149_v40 = vpop.f32.mrf.mxu1 }
 0x183   :  { %v3884_v41 = vadd.f32 %v3578_v39, %v149_v40 }
 0x185   :  { %164 = vrot.lane.b32.xlu2 %v3884_v41, %s3824_s0 }
 0x18a   :  { %v152_v42 = vpop.f32.mrf.mxu1 }
 0x18b   :  { %v3890_v44 = vadd.f32 %v3578_v39, %v152_v42 }
 0x18d   :  { %166 = vrot.lane.b32.xlu1 %v3890_v44, %s3824_s0  ;;  %162 = vrot.lane.b32.xlu2 %v3888_v43, %s3824_s0 }
 0x192   :  { %v155_v45 = vpop.f32.mrf.mxu1 }
 0x193   :  { %v3896_v46 = vadd.f32 %v3578_v39, %v155_v45 }
 0x195   :  { %168 = vrot.lane.b32.xlu0 %v3896_v46, %s3824_s0  ;;  %188 = vrot.lane.b32.xlu1 %v3884_v41, %s3825_s23 }
 0x196   :  { %172 = vrot.lane.b32.xlu2 %v3884_v41, %s3826_s24 }
 0x19d   :  { %170 = vrot.lane.b32.xlu0 %v3888_v43, %s3826_s24  ;;  %178 = vrot.lane.b32.xlu1 %v3888_v43, %s3827_s25 }
 0x19e   :  { %180 = vrot.lane.b32.xlu2 %v3884_v41, %s3827_s25 }
 0x1a5   :  { %186 = vrot.lane.b32.xlu0 %v3888_v43, %s3825_s23  ;;  %222 = vrot.lane.b32.xlu1 %v3890_v44, %s3825_s23 }
 0x1a6   :  { %224 = vrot.lane.b32.xlu2 %v3896_v46, %s3825_s23 }
 0x1ad   :  { %176 = vrot.lane.b32.xlu0 %v3896_v46, %s3826_s24 }
 0x1ae   :  { %174 = vrot.lane.b32.xlu2 %v3890_v44, %s3826_s24 }
 0x1df   :  { %v3920_v47 = vpop.permute.xlu2 %164 }
 0x1e0   :  { %259 = vrot.lane.b32.xlu0 %v3920_v47, %s3825_s23 }
 0x1e7   :  { %v3924_v48 = vpop.permute.xlu2 %162 }
 0x1e8   :  { %257 = vrot.lane.b32.xlu1 %v3924_v48, %s3825_s23 }
 0x1f0   :  { %v3928_v49 = vpop.permute.xlu2 %172  ;;  %184 = vrot.lane.b32.xlu1 %v3896_v46, %s3827_s25 }
 0x1f8   :  { %v3932_v50 = vpop.permute.xlu2 %180 }
 0x1ff   :  { %v3934_v51 = vpop.permute.xlu1 %166 }
 0x200   :  { %v225_v52 = vpop.permute.xlu2 %224  ;;  %292 = vrot.lane.b32.xlu0 %v3934_v51, %s3825_s23 }
 0x201   :  { %3336 = vmatpush.xpose.msk.msra.mxu3 %vm190_vm6, %v225_v52 }
 0x207   :  { %v3939_v53 = vpop.permute.xlu0 %168  ;;  %v189_v54 = vpop.permute.xlu1 %188 }
 0x208   :  { %3332 = vmatpush.xpose.msk.msra.mxu2 %vm190_vm6, %v189_v54  ;;  %294 = vrot.lane.b32.xlu2 %v3939_v53, %s3825_s23  ;;  %v3964_v59 = vpop.permute.xlu2 %174 }
 0x209   :  { %182 = vrot.lane.b32.xlu0 %v3890_v44, %s3827_s25 }
 0x20f   :  { %v3946_v55 = vpop.permute.xlu0 %170  ;;  %v3948_v56 = vpop.permute.xlu1 %178 }
 0x210   :  { %327 = vrot.lane.b32.xlu1 %v3946_v55, %s3825_s23  ;;  %329 = vrot.lane.b32.xlu2 %v3928_v49, %s3825_s23 }
 0x211   :  { %397 = vrot.lane.b32.xlu0 %v3948_v56, %s3825_s23 }
 0x217   :  { %v187_v57 = vpop.permute.xlu0 %186  ;;  %v223_v58 = vpop.permute.xlu1 %222 }
 0x218   :  { %3333 = vmatpush.xpose.msk.msra.mxu2 %vm190_vm6, %v187_v57  ;;  %399 = vrot.lane.b32.xlu2 %v3932_v50, %s3825_s23 }
 0x219   :  { %3337 = vmatpush.xpose.msk.msra.mxu3 %vm190_vm6, %v223_v58 }
 0x21b   :  { %3334 = vmatmul.msk.f32.vlgmr.msra.gmra.mxu2 %vm190_vm6, %v3888_v43 }
 0x21c   :  { %3338 = vmatmul.msk.f32.vlgmr.msra.gmra.mxu3 %vm190_vm6, %v3890_v44 }
 0x21f   :  { %v3966_v60 = vpop.permute.xlu0 %176 }
 0x220   :  { %364 = vrot.lane.b32.xlu1 %v3966_v60, %s3825_s23  ;;  %362 = vrot.lane.b32.xlu2 %v3964_v59, %s3825_s23 }
 0x223   :  { %3335 = vmatmul.msk.f32.gmra.mxu2 %vm190_vm6, %v3884_v41 }
 0x224   :  { %3339 = vmatmul.msk.f32.gmra.mxu3 %vm190_vm6, %v3896_v46 }
 0x252   :  { %v260_v61 = vpop.permute.xlu0 %259 }
 0x253   :  { %3340 = vmatpush.xpose.msk.msrb.mxu2 %vm190_vm6, %v260_v61  ;;  %v3498_v61 = vpack.i.bf16 %v3888_v43, %v3884_v41 }
 0x25a   :  { %v258_v62 = vpop.permute.xlu1 %257 }
 0x25b   :  { %3341 = vmatpush.xpose.msk.msrb.mxu2 %vm190_vm6, %v258_v62 }
 0x25e   :  { %3342 = vmatmul.msk.f32.vlgmr.msrb.gmra.mxu2 %vm190_vm6, %v3924_v48 }
 0x262   :  { %v3980_v63 = vpop.permute.xlu1 %184  ;;  %v295_v0 = vpop.permute.xlu2 %294 }
 0x263   :  { %434 = vrot.lane.b32.xlu0 %v3980_v63, %s3825_s23  ;;  %3344 = vmatpush.xpose.msk.msrb.mxu3 %vm190_vm6, %v295_v0 }
 0x266   :  { %3343 = vmatmul.msk.f32.gmra.mxu2 %vm190_vm6, %v3920_v47 }
 0x26a   :  { %v330_v1 = vpop.permute.xlu2 %329 }
 0x26b   :  { %3348 = vmatpush.xpose.msk.msra.mxu2 %vm190_vm6, %v330_v1 }
 0x272   :  { %v293_v2 = vpop.permute.xlu0 %292  ;;  %v400_v3 = vpop.permute.xlu2 %399 }
 0x273   :  { %3345 = vmatpush.xpose.msk.msrb.mxu3 %vm190_vm6, %v293_v2 }
 0x276   :  { %3346 = vmatmul.msk.f32.vlgmr.msrb.gmra.mxu3 %vm190_vm6, %v3934_v51 }
 0x277   :  { %3356 = vmatpush.xpose.msk.msra.mxu3 %vm190_vm6, %v400_v3 }
 0x27a   :  { %v363_v8 = vpop.permute.xlu2 %362 }
 0x27b   :  { %v3992_v4 = vpop.permute.xlu0 %182 }
 0x27c   :  { %432 = vrot.lane.b32.xlu1 %v3992_v4, %s3825_s23 }
 0x27e   :  { %3347 = vmatmul.msk.f32.gmra.mxu3 %vm190_vm6, %v3939_v53 }
 0x282   :  { %v328_v5 = vpop.permute.xlu1 %327 }
 0x283   :  { %v398_v6 = vpop.permute.xlu0 %397  ;;  %3349 = vmatpush.xpose.msk.msra.mxu2 %vm190_vm6, %v328_v5 }
 0x284   :  { %3357 = vmatpush.xpose.msk.msra.mxu3 %vm190_vm6, %v398_v6 }
 0x286   :  { %3350 = vmatmul.msk.f32.vlgmr.msra.gmra.mxu2 %vm190_vm6, %v3946_v55 }
 0x287   :  { %3358 = vmatmul.msk.f32.vlgmr.msra.gmra.mxu3 %vm190_vm6, %v3948_v56 }
 0x28e   :  { %3351 = vmatmul.msk.f32.gmra.mxu2 %vm190_vm6, %v3928_v49 }
 0x28f   :  { %3359 = vmatmul.msk.f32.gmra.mxu3 %vm190_vm6, %v3932_v50 }
 0x292   :  { %v365_v7 = vpop.permute.xlu1 %364 }
 0x293   :  { %3352 = vmatpush.xpose.msk.msrb.mxu2 %vm190_vm6, %v365_v7 }
 0x297   :  { %3353 = vmatpush.xpose.msk.msrb.mxu2 %vm190_vm6, %v363_v8 }
 0x29a   :  { %3354 = vmatmul.msk.f32.vlgmr.msrb.gmra.mxu2 %vm190_vm6, %v3964_v59 }
 0x29e   :  { %v216_v9 = vpop.f32.mrf.mxu2 }
 0x29f   :  { %v468_v10 = vsel %vm467_vm7, %v216_v9, -inf  ;;  %v251_v11 = vpop.f32.mrf.mxu3 }
 0x2a0   :  { %469 = vmax.xlane.f32.xlu2 %v468_v10  ;;  %v474_v14 = vsel %vm467_vm7, %v251_v11, -inf }
 0x2a2   :  { %3355 = vmatmul.msk.f32.gmra.mxu2 %vm190_vm6, %v3966_v60 }
 0x2a6   :  { %v219_v12 = vpop.f32.mrf.mxu2 }
 0x2a7   :  { %v471_v13 = vsel %vm467_vm7, %v219_v12, -inf  ;;  %v4017_v15 = vpop.f32.mrf.mxu3 }
 0x2a8   :  { %472 = vmax.xlane.f32.xlu1 %v471_v13  ;;  %475 = vmax.xlane.f32.xlu2 %v474_v14  ;;  %v477_v16 = vsel %vm467_vm7, %v4017_v15, -inf }
 0x2b0   :  { %478 = vmax.xlane.f32.xlu1 %v477_v16 }
 0x2d5   :  { %v435_v17 = vpop.permute.xlu0 %434 }
 0x2d6   :  { %3360 = vmatpush.xpose.msk.msrb.mxu0 %vm190_vm6, %v435_v17 }
 0x2e1   :  { %v4022_v18 = vpop.f32.mrf.mxu2 }
 0x2e2   :  { %v480_v19 = vsel %vm467_vm7, %v4022_v18, -inf }
 0x2e3   :  { %481 = vmax.xlane.f32.xlu0 %v480_v19 }
 0x2e9   :  { %v4026_v20 = vpop.f32.mrf.mxu2 }
 0x2ea   :  { %v483_v21 = vsel %vm467_vm7, %v4026_v20, -inf }
 0x2eb   :  { %484 = vmax.xlane.f32.xlu2 %v483_v21 }
 0x2ee   :  { %v433_v22 = vpop.permute.xlu1 %432 }
 0x2ef   :  { %3361 = vmatpush.xpose.msk.msrb.mxu0 %vm190_vm6, %v433_v22 }
 0x2f2   :  { %3362 = vmatmul.msk.f32.vlgmr.msrb.gmra.mxu0 %vm190_vm6, %v3992_v4 }
 0x2f9   :  { %v4035_v26 = vpop.f32.mrf.mxu3 }
 0x2fa   :  { %3363 = vmatmul.msk.f32.gmra.mxu0 %vm190_vm6, %v3980_v63  ;;  %v486_v10 = vsel %vm467_vm7, %v4035_v26, -inf }
 0x301   :  { %v4043_v36 = vpop.f32.mrf.mxu3 }
 0x302   :  { %v489_v17 = vsel %vm467_vm7, %v4043_v36, -inf }
 0x309   :  { %v4041_v34 = vpop.f32.mrf.mxu2 }
 0x30a   :  { %v4051_v42 = vpop.f32.mrf.mxu3  ;;  %v492_v41 = vsel %vm467_vm7, %v4041_v34, -inf }
 0x30b   :  { %v504_v45 = vsel %vm467_vm7, %v4051_v42, -inf }
 0x311   :  { %v4049_v40 = vpop.f32.mrf.mxu2 }
 0x312   :  { %v495_v13 = vsel %vm467_vm7, %v4049_v40, -inf }
 0x313   :  { %v470_v23 = vpop.xlane.xlu2 %469 }
 0x314   :  { %v516_v24 = vsub.f32 %v216_v9, %v470_v23  ;;  %v3503_v23 = vpack.i.bf16 %v3924_v48, %v3920_v47  ;;  %v3513_v47 = vpack.i.bf16 %v3946_v55, %v3928_v49  ;;  %v3518_v49 = vpack.i.bf16 %v3948_v56, %v3932_v50 }
 0x316   :  { %v532_v25 = vmul.f32 1.442695, %v516_v24 }
 0x318   :  { %3597 = vpow2.f32 %v532_v25 }
 0x31b   :  { %v476_v27 = vpop.xlane.xlu2 %475  ;;  %v473_v62 = vpop.xlane.xlu1 %472 }
 0x31c   :  { %v518_v28 = vsub.f32 %v251_v11, %v476_v27  ;;  %v517_v0 = vsub.f32 %v219_v12, %v473_v62  ;;  %v4080_v12 = vpop.f32.mrf.mxu3 }
 0x31d   :  { %v391_v52 = vpop.f32.mrf.mxu2  ;;  %v507_v14 = vsel %vm467_vm7, %v4080_v12, -inf }
 0x31e   :  { %v4037_v29 = vpop.eup %3597  ;;  %v536_v31 = vmul.f32 1.442695, %v518_v28  ;;  %v498_v54 = vsel %vm467_vm7, %v391_v52, -inf  ;;  %v534_v3 = vmul.f32 1.442695, %v517_v0  ;;  %v3508_v28 = vpack.i.bf16 %v3890_v44, %v3896_v46 }
 0x31f   :  { %v564_v32 = vsel %vm467_vm7, %v4037_v29, 0.0 }
 0x320   :  { %565 = vadd.xlane.f32.xlu2 %v564_v32  ;;  %3599 = vpow2.f32 %v536_v31 }
 0x321   :  { %3601 = vpow2.f32 %v534_v3 }
 0x323   :  { %v479_v43 = vpop.xlane.xlu1 %478 }
 0x324   :  { %v519_v8 = vsub.f32 %v4017_v15, %v479_v43  ;;  %v3533_v43 = vpack.i.bf16 %v3992_v4, %v3980_v63 }
 0x325   :  { %v4056_v57 = vpop.f32.mrf.mxu2 }
 0x326   :  { %v4045_v38 = vpop.eup %3599  ;;  %v501_v58 = vsel %vm467_vm7, %v4056_v57, -inf  ;;  %v538_v11 = vmul.f32 1.442695, %v519_v8 }
 0x327   :  { %v570_v39 = vsel %vm467_vm7, %v4045_v38, 0.0  ;;  %v4073_v7 = vpop.eup %3601 }
 0x328   :  { %571 = vadd.xlane.f32.xlu2 %v570_v39  ;;  %v567_v9 = vsel %vm467_vm7, %v4073_v7, 0.0  ;;  %3603 = vpow2.f32 %v538_v11 }
 0x32e   :  { %v4086_v16 = vpop.eup %3603 }
 0x32f   :  { %v573_v19 = vsel %vm467_vm7, %v4086_v16, 0.0 }
 0x330   :  { %505 = vmax.xlane.f32.xlu2 %v504_v45 }
 0x338   :  { %499 = vmax.xlane.f32.xlu2 %v498_v54 }
 0x340   :  { %502 = vmax.xlane.f32.xlu2 %v501_v58 }
 0x356   :  { %v482_v8 = vpop.xlane.xlu0 %481 }
 0x357   :  { %v520_v50 = vsub.f32 %v4022_v18, %v482_v8 }
 0x358   :  { %3499 = vrot.lane.b32.xlu2 %v3498_v61, %s3828_s26 }
 0x359   :  { %v540_v56 = vmul.f32 1.442695, %v520_v50 }
 0x35e   :  { %v485_v15 = vpop.xlane.xlu2 %484 }
 0x36f   :  { %v4063_v1 = vpop.f32.mrf.mxu0 }
 0x370   :  { %v510_v2 = vsel %vm467_vm7, %v4063_v1, -inf }
 0x371   :  { %511 = vmax.xlane.f32.xlu0 %v510_v2 }
 0x377   :  { %v4067_v5 = vpop.f32.mrf.mxu0 }
 0x378   :  { %v513_v6 = vsel %vm467_vm7, %v4067_v5, -inf }
 0x379   :  { %514 = vmax.xlane.f32.xlu1 %v513_v6  ;;  %493 = vmax.xlane.f32.xlu0 %v492_v41 }
 0x381   :  { %568 = vadd.xlane.f32.xlu1 %v567_v9  ;;  %487 = vmax.xlane.f32.xlu0 %v486_v10  ;;  %v521_v9 = vsub.f32 %v4026_v20, %v485_v15 }
 0x383   :  { %v542_v10 = vmul.f32 1.442695, %v521_v9 }
 0x389   :  { %496 = vmax.xlane.f32.xlu1 %v495_v13  ;;  %508 = vmax.xlane.f32.xlu0 %v507_v14 }
 0x391   :  { %490 = vmax.xlane.f32.xlu1 %v489_v17  ;;  %574 = vadd.xlane.f32.xlu0 %v573_v19 }
 0x393   :  { %v566_v21 = vpop.xlane.xlu2 %565 }
 0x394   :  { %3605 = vrcp.f32 %v566_v21  ;;  %v623_v44 = vand.u32 2147483648, %v566_v21  ;;  %vm617_vm9 = vweird.f32 %v566_v21  ;;  %v621_v46 = vand.u32 2147483647, %v566_v21 }
 0x396   :  { %v624_v0 = vor.u32 1.1754944e-38, %v623_v44  ;;  %vm622_vm11 = vcmp.eq.f32.partialorder %v621_v46, 8.507059e+37 }
 0x39a   :  { %v3606_v25 = vpop.eup %3605 }
 0x39b   :  { %v4092_v22 = vpop.xlane.xlu2 %571  ;;  %v613_v27 = vmul.f32 %v3606_v25, %v566_v21  ;;  %vm618_vm8 = vweird.f32 %v3606_v25 }
 0x39c   :  { %vm619_vm10 = vmor %vm617_vm9, %vm618_vm8  ;;  %vm647_vm2 = vweird.f32 %v4092_v22 }
 0x39d   :  { %v614_v39 = vsub.f32 1.0, %v613_v27 }
 0x39f   :  { %v615_v54 = vmul.f32 %v3606_v25, %v614_v39 }
 0x3a1   :  { %v616_v58 = vadd.f32 %v3606_v25, %v615_v54 }
 0x3a3   :  { %v4096_v24 = vpop.xlane.xlu2 %505  ;;  %v620_v62 = vsel %vm619_vm10, %v3606_v25, %v616_v58 }
 0x3a4   :  { %v625_v3 = vsel %vm622_vm11, %v624_v0, %v620_v62  ;;  %v3523_v0 = vpack.i.bf16 %v3934_v51, %v3939_v53  ;;  %v528_v53 = vsub.f32 %v4051_v42, %v4096_v24 }
 0x3a5   :  { %3504 = vrot.lane.b32.xlu0 %v3503_v23, %s3828_s26  ;;  %v626_v41 = vmul.f32 %v4037_v29, %v625_v3 }
 0x3ab   :  { %v500_v31 = vpop.xlane.xlu2 %499 }
 0x3ac   :  { %v526_v32 = vsub.f32 %v391_v52, %v500_v31 }
 0x3ad   :  { %3509 = vrot.lane.b32.xlu0 %v3508_v28, %s3828_s26 }
 0x3ae   :  { %v552_v45 = vmul.f32 1.442695, %v526_v32 }
 0x3b0   :  { %3607 = vpow2.f32 %v552_v45 }
 0x3b1   :  { %3609 = vpow2.f32 %v540_v56 }
 0x3b2   :  { %3611 = vpow2.f32 %v542_v10 }
 0x3b3   :  { %v4104_v48 = vpop.xlane.xlu2 %502 }
 0x3b5   :  { %3514 = vrot.lane.b32.xlu0 %v3513_v47, %s3828_s26 }
 0x3b6   :  { %v4107_v61 = vpop.eup %3607 }
 0x3b7   :  { %v594_v52 = vsel %vm467_vm7, %v4107_v61, 0.0  ;;  %v4121_v11 = vpop.eup %3609 }
 0x3b8   :  { %595 = vadd.xlane.f32.xlu2 %v594_v52  ;;  %v576_v14 = vsel %vm467_vm7, %v4121_v11, 0.0  ;;  %v4126_v4 = vpop.eup %3611 }
 0x3b9   :  { %v579_v15 = vsel %vm467_vm7, %v4126_v4, 0.0 }
 0x3bb   :  { %v3500_v55 = vpop.permute.xlu2 %3499 }
 0x3bc   :  { %v3501_v2 = vunpack.i.l.bf16 %v3500_v55  ;;  %v3502_v6 = vunpack.i.h.bf16 %v3500_v55 }
 0x3bd   :  { %3519 = vrot.lane.b32.xlu0 %v3518_v49, %s3828_s26 }
 0x3be   :  { %878 = vmatpush.msrb.mxu1 %v3501_v2 }
 0x3c0   :  { %879 = vmatpush.msrb.mxu1 %v3502_v6 }
 0x3c1   :  { %3364 = vmatmul.msk.f32.vlgmr.msrb.gmra.mxu1 %vm467_vm7, %v626_v41 }
 0x3d0   :  { %3534 = vrot.lane.b32.xlu2 %v3533_v43, %s3828_s26 }
 0x3e4   :  { %v512_v13 = vpop.xlane.xlu0 %511 }
 0x3e5   :  { %v530_v29 = vsub.f32 %v4063_v1, %v512_v13 }
 0x3e7   :  { %v560_v63 = vmul.f32 1.442695, %v530_v29  ;;  %577 = vadd.xlane.f32.xlu0 %v576_v14 }
 0x3e9   :  { %3613 = vpow2.f32 %v560_v63 }
 0x3ec   :  { %v4128_v18 = vpop.xlane.xlu1 %514  ;;  %v494_v17 = vpop.xlane.xlu0 %493 }
 0x3ed   :  { %v524_v20 = vsub.f32 %v4041_v34, %v494_v17 }
 0x3ef   :  { %v4133_v19 = vpop.eup %3613  ;;  %v548_v21 = vmul.f32 1.442695, %v524_v20  ;;  %580 = vadd.xlane.f32.xlu0 %v579_v15 }
 0x3f0   :  { %v606_v1 = vsel %vm467_vm7, %v4133_v19, 0.0 }
 0x3f1   :  { %607 = vadd.xlane.f32.xlu1 %v606_v1  ;;  %3615 = vpow2.f32 %v548_v21  ;;  %v527_v21 = vsub.f32 %v4056_v57, %v4104_v48  ;;  %v531_v57 = vsub.f32 %v4067_v5, %v4128_v18 }
 0x3f3   :  { %v554_v48 = vmul.f32 1.442695, %v527_v21 }
 0x3f4   :  { %v569_v23 = vpop.xlane.xlu1 %568  ;;  %v488_v25 = vpop.xlane.xlu0 %487 }
 0x3f5   :  { %3617 = vrcp.f32 %v569_v23  ;;  %v522_v27 = vsub.f32 %v4035_v26, %v488_v25  ;;  %v638_v26 = vand.u32 2147483648, %v569_v23  ;;  %v636_v49 = vand.u32 2147483647, %v569_v23 }
 0x3f6   :  { %vm632_vm13 = vweird.f32 %v569_v23 }
 0x3f7   :  { %v544_v28 = vmul.f32 1.442695, %v522_v27  ;;  %v4138_v31 = vpop.eup %3615  ;;  %vm637_vm15 = vcmp.eq.f32.partialorder %v636_v49, 8.507059e+37  ;;  %v653_v27 = vand.u32 2147483648, %v4092_v22 }
 0x3f8   :  { %v588_v34 = vsel %vm467_vm7, %v4138_v31, 0.0 }
 0x3f9   :  { %3619 = vpow2.f32 %v544_v28  ;;  %589 = vadd.xlane.f32.xlu1 %v588_v34  ;;  %v651_v34 = vand.u32 2147483647, %v4092_v22 }
 0x3fb   :  { %v3618_v32 = vpop.eup %3617  ;;  %vm652_vm4 = vcmp.eq.f32.partialorder %v651_v34, 8.507059e+37 }
 0x3fc   :  { %v628_v39 = vmul.f32 %v3618_v32, %v569_v23  ;;  %v497_v45 = vpop.xlane.xlu1 %496  ;;  %v509_v46 = vpop.xlane.xlu0 %508  ;;  %vm633_vm12 = vweird.f32 %v3618_v32 }
 0x3fd   :  { %v525_v54 = vsub.f32 %v4049_v40, %v497_v45  ;;  %vm634_vm14 = vmor %vm632_vm13, %vm633_vm12  ;;  %v639_v40 = vor.u32 1.1754944e-38, %v638_v26  ;;  %v529_v42 = vsub.f32 %v4080_v12, %v509_v46 }
 0x3fe   :  { %v629_v47 = vsub.f32 1.0, %v628_v39 }
 0x3ff   :  { %v4143_v58 = vpop.eup %3619  ;;  %v550_v44 = vmul.f32 1.442695, %v525_v54  ;;  %v558_v14 = vmul.f32 1.442695, %v529_v42  ;;  %v654_v54 = vor.u32 1.1754944e-38, %v653_v27 }
 0x400   :  { %v630_v52 = vmul.f32 %v3618_v32, %v629_v47  ;;  %v582_v62 = vsel %vm467_vm7, %v4143_v58, 0.0  ;;  %v562_v47 = vmul.f32 1.442695, %v531_v57 }
 0x401   :  { %3621 = vpow2.f32 %v550_v44  ;;  %583 = vadd.xlane.f32.xlu1 %v582_v62 }
 0x402   :  { %v631_v55 = vadd.f32 %v3618_v32, %v630_v52  ;;  %3623 = vrcp.f32 %v4092_v22 }
 0x403   :  { %3524 = vrot.lane.b32.xlu0 %v3523_v0, %s3828_s26 }
 0x404   :  { %v491_v2 = vpop.xlane.xlu1 %490  ;;  %v635_v3 = vsel %vm634_vm14, %v3618_v32, %v631_v55  ;;  %v4159_v56 = vpop.xlane.xlu0 %574 }
 0x405   :  { %v523_v6 = vsub.f32 %v4043_v36, %v491_v2  ;;  %v640_v41 = vsel %vm637_vm15, %v639_v40, %v635_v3  ;;  %v556_v36 = vmul.f32 1.442695, %v528_v53  ;;  %v668_v5 = vand.u32 2147483648, %v4159_v56 }
 0x406   :  { %v641_v51 = vmul.f32 %v4073_v7, %v640_v41  ;;  %vm662_vm9 = vweird.f32 %v4159_v56  ;;  %v666_v0 = vand.u32 2147483647, %v4159_v56 }
 0x407   :  { %v4152_v43 = vpop.eup %3621  ;;  %v546_v8 = vmul.f32 1.442695, %v523_v6  ;;  %v669_v40 = vor.u32 1.1754944e-38, %v668_v5 }
 0x408   :  { %v591_v50 = vsel %vm467_vm7, %v4152_v43, 0.0  ;;  %3365 = vmatmul.msk.f32.gmra.mxu1 %vm467_vm7, %v641_v51  ;;  %v3624_v9 = vpop.eup %3623  ;;  %vm667_vm11 = vcmp.eq.f32.partialorder %v666_v0, 8.507059e+37  ;;  %v1133_v0 = vld [vmem:[#allocation2 + $0x78] sm:$0xff] }
 0x409   :  { %3625 = vpow2.f32 %v546_v8  ;;  %592 = vadd.xlane.f32.xlu1 %v591_v50  ;;  %v643_v10 = vmul.f32 %v3624_v9, %v4092_v22  ;;  %vm648_vm1 = vweird.f32 %v3624_v9 }
 0x40a   :  { %3627 = vrcp.f32 %v4159_v56  ;;  %vm649_vm3 = vmor %vm647_vm2, %vm648_vm1 }
 0x40b   :  { %3629 = vpow2.f32 %v556_v36  ;;  %v644_v24 = vsub.f32 1.0, %v643_v10  ;;  %v3528_v36 = vpack.i.bf16 %v3964_v59, %v3966_v60 }
 0x40c   :  { %3631 = vpow2.f32 %v558_v14 }
 0x40d   :  { %v645_v63 = vmul.f32 %v3624_v9, %v644_v24  ;;  %3633 = vpow2.f32 %v554_v48 }
 0x40e   :  { %3635 = vpow2.f32 %v562_v47 }
 0x40f   :  { %v4164_v13 = vpop.eup %3625  ;;  %v646_v23 = vadd.f32 %v3624_v9, %v645_v63 }
 0x410   :  { %v585_v7 = vsel %vm467_vm7, %v4164_v13, 0.0  ;;  %v3628_v29 = vpop.eup %3627 }
 0x411   :  { %586 = vadd.xlane.f32.xlu1 %v585_v7  ;;  %v658_v17 = vmul.f32 %v3628_v29, %v4159_v56  ;;  %v4170_v20 = vpop.eup %3629  ;;  %v650_v32 = vsel %vm649_vm3, %v3624_v9, %v646_v23  ;;  %vm663_vm8 = vweird.f32 %v3628_v29 }
 0x412   :  { %v600_v25 = vsel %vm467_vm7, %v4170_v20, 0.0  ;;  %v4181_v45 = vpop.eup %3631  ;;  %v655_v46 = vsel %vm652_vm4, %v654_v54, %v650_v32  ;;  %vm664_vm10 = vmor %vm662_vm9, %vm663_vm8 }
 0x413   :  { %v659_v12 = vsub.f32 1.0, %v658_v17  ;;  %v603_v22 = vsel %vm467_vm7, %v4181_v45, 0.0  ;;  %v656_v62 = vmul.f32 %v4045_v38, %v655_v46  ;;  %v4190_v55 = vpop.eup %3633 }
 0x414   :  { %v4192_v41 = vpop.eup %3635  ;;  %v597_v8 = vsel %vm467_vm7, %v4190_v55, 0.0 }
 0x415   :  { %v660_v39 = vmul.f32 %v3628_v29, %v659_v12  ;;  %v609_v53 = vsel %vm467_vm7, %v4192_v41, 0.0 }
 0x417   :  { %v3505_v15 = vpop.permute.xlu0 %3504  ;;  %v661_v26 = vadd.f32 %v3628_v29, %v660_v39 }
 0x418   :  { %v3506_v1 = vunpack.i.l.bf16 %v3505_v15  ;;  %v3507_v28 = vunpack.i.h.bf16 %v3505_v15 }
 0x419   :  { %601 = vadd.xlane.f32.xlu1 %v600_v25  ;;  %v665_v49 = vsel %vm664_vm10, %v3628_v29, %v661_v26 }
 0x41a   :  { %948 = vmatpush.msrb.mxu3 %v3506_v1  ;;  %v670_v6 = vsel %vm667_vm11, %v669_v40, %v665_v49 }
 0x41b   :  { %v671_v51 = vmul.f32 %v4086_v16, %v670_v6 }
 0x41c   :  { %949 = vmatpush.msrb.mxu3 %v3507_v28 }
 0x41f   :  { %v3510_v44 = vpop.permute.xlu0 %3509 }
 0x420   :  { %v3511_v52 = vunpack.i.l.bf16 %v3510_v44  ;;  %v3512_v18 = vunpack.i.h.bf16 %v3510_v44 }
 0x421   :  { %604 = vadd.xlane.f32.xlu1 %v603_v22 }
 0x422   :  { %913 = vmatpush.msra.mxu2 %v3511_v52 }
 0x424   :  { %914 = vmatpush.msra.mxu2 %v3512_v18 }
 0x425   :  { %3366 = vmatmul.msk.f32.vlgmr.msra.gmra.mxu2 %vm467_vm7, %v656_v62 }
 0x427   :  { %v3515_v2 = vpop.permute.xlu0 %3514 }
 0x428   :  { %v3516_v3 = vunpack.i.l.bf16 %v3515_v2  ;;  %v3517_v38 = vunpack.i.h.bf16 %v3515_v2 }
 0x429   :  { %598 = vadd.xlane.f32.xlu1 %v597_v8 }
 0x42a   :  { %1018 = vmatpush.msra.mxu1 %v3516_v3 }
 0x42b   :  { %v4206_v27 = vpop.xlane.xlu2 %595 }
 0x42c   :  { %1019 = vmatpush.msra.mxu1 %v3517_v38 }
 0x42d   :  { %610 = vadd.xlane.f32.xlu0 %v609_v53  ;;  %3367 = vmatmul.msk.f32.gmra.mxu2 %vm467_vm7, %v671_v51 }
 0x42e   :  { %1161 = vmatpush.msrb.mxu1 %v1133_v0 }
 0x42f   :  { %v3520_v50 = vpop.permute.xlu0 %3519 }
 0x430   :  { %v3521_v56 = vunpack.i.l.bf16 %v3520_v50  ;;  %v3522_v9 = vunpack.i.h.bf16 %v3520_v50 }
 0x432   :  { %1088 = vmatpush.msra.mxu3 %v3521_v56 }
 0x433   :  { %v3535_v26 = vpop.permute.xlu2 %3534 }
 0x434   :  { %1089 = vmatpush.msra.mxu3 %v3522_v9  ;;  %v3536_v3 = vunpack.i.l.bf16 %v3535_v26  ;;  %v3537_v8 = vunpack.i.h.bf16 %v3535_v26 }
 0x442   :  { %3529 = vrot.lane.b32.xlu1 %v3528_v36, %s3828_s26 }
 0x45a   :  { %v578_v10 = vpop.xlane.xlu0 %577 }
 0x45b   :  { %3637 = vrcp.f32 %v578_v10  ;;  %v683_v14 = vand.u32 2147483648, %v578_v10  ;;  %v681_v17 = vand.u32 2147483647, %v578_v10  ;;  %vm677_vm13 = vweird.f32 %v578_v10 }
 0x45d   :  { %v684_v59 = vor.u32 1.1754944e-38, %v683_v14  ;;  %vm682_vm15 = vcmp.eq.f32.partialorder %v681_v17, 8.507059e+37 }
 0x461   :  { %v3638_v16 = vpop.eup %3637 }
 0x462   :  { %v673_v42 = vmul.f32 %v3638_v16, %v578_v10  ;;  %v581_v7 = vpop.xlane.xlu0 %580  ;;  %vm678_vm12 = vweird.f32 %v3638_v16 }
 0x463   :  { %3639 = vrcp.f32 %v581_v7  ;;  %vm679_vm14 = vmor %vm677_vm13, %vm678_vm12  ;;  %v698_v28 = vand.u32 2147483648, %v581_v7  ;;  %v696_v48 = vand.u32 2147483647, %v581_v7  ;;  %vm692_vm2 = vweird.f32 %v581_v7 }
 0x464   :  { %v674_v24 = vsub.f32 1.0, %v673_v42  ;;  %v4203_v29 = vpop.xlane.xlu1 %607 }
 0x465   :  { %v699_v39 = vor.u32 1.1754944e-38, %v698_v28  ;;  %vm697_vm4 = vcmp.eq.f32.partialorder %v696_v48, 8.507059e+37 }
 0x466   :  { %v675_v63 = vmul.f32 %v3638_v16, %v674_v24 }
 0x468   :  { %v676_v15 = vadd.f32 %v3638_v16, %v675_v63 }
 0x469   :  { %v3640_v21 = vpop.eup %3639 }
 0x46a   :  { %v680_v60 = vsel %vm679_vm14, %v3638_v16, %v676_v15  ;;  %v688_v1 = vmul.f32 %v3640_v21, %v581_v7  ;;  %vm693_vm1 = vweird.f32 %v3640_v21 }
 0x46b   :  { %v685_v23 = vsel %vm682_vm15, %v684_v59, %v680_v60  ;;  %vm694_vm3 = vmor %vm692_vm2, %vm693_vm1 }
 0x46c   :  { %v689_v12 = vsub.f32 1.0, %v688_v1  ;;  %v686_v25 = vmul.f32 %v4121_v11, %v685_v23  ;;  %v590_v34 = vpop.xlane.xlu1 %589 }
 0x46d   :  { %3641 = vrcp.f32 %v590_v34  ;;  %v743_v62 = vand.u32 2147483648, %v590_v34  ;;  %v741_v40 = vand.u32 2147483647, %v590_v34  ;;  %vm737_vm9 = vweird.f32 %v590_v34 }
 0x46e   :  { %v690_v57 = vmul.f32 %v3640_v21, %v689_v12  ;;  %3368 = vmatmul.msk.f32.vlgmr.msrb.gmra.mxu3 %vm467_vm7, %v686_v25 }
 0x46f   :  { %v744_v38 = vor.u32 1.1754944e-38, %v743_v62  ;;  %vm742_vm11 = vcmp.eq.f32.partialorder %v741_v40, 8.507059e+37 }
 0x470   :  { %v691_v32 = vadd.f32 %v3640_v21, %v690_v57 }
 0x472   :  { %v695_v54 = vsel %vm694_vm3, %v3640_v21, %v691_v32 }
 0x473   :  { %v700_v47 = vsel %vm697_vm4, %v699_v39, %v695_v54  ;;  %v3642_v44 = vpop.eup %3641 }
 0x474   :  { %v701_v11 = vmul.f32 %v4126_v4, %v700_v47  ;;  %v733_v46 = vmul.f32 %v3642_v44, %v590_v34  ;;  %v584_v52 = vpop.xlane.xlu1 %583  ;;  %vm738_vm8 = vweird.f32 %v3642_v44 }
 0x475   :  { %v3525_v22 = vpop.permute.xlu0 %3524  ;;  %3643 = vrcp.f32 %v584_v52  ;;  %vm739_vm10 = vmor %vm737_vm9, %vm738_vm8  ;;  %v713_v10 = vand.u32 2147483648, %v584_v52  ;;  %v711_v42 = vand.u32 2147483647, %v584_v52  ;;  %vm707_vm13 = vweird.f32 %v584_v52 }
 0x476   :  { %3369 = vmatmul.msk.f32.gmra.mxu3 %vm467_vm7, %v701_v11  ;;  %v734_v5 = vsub.f32 1.0, %v733_v46  ;;  %v3526_v18 = vunpack.i.l.bf16 %v3525_v22  ;;  %v3527_v2 = vunpack.i.h.bf16 %v3525_v22 }
 0x477   :  { %v714_v14 = vor.u32 1.1754944e-38, %v713_v10  ;;  %vm712_vm15 = vcmp.eq.f32.partialorder %v711_v42, 8.507059e+37 }
 0x478   :  { %v735_v49 = vmul.f32 %v3642_v44, %v734_v5  ;;  %983 = vmatpush.msra.mxu0 %v3526_v18 }
 0x47a   :  { %v736_v6 = vadd.f32 %v3642_v44, %v735_v49  ;;  %984 = vmatpush.msra.mxu0 %v3527_v2 }
 0x47b   :  { %v3644_v4 = vpop.eup %3643 }
 0x47c   :  { %1123 = vmatpush.msrb.mxu0 %v3536_v3  ;;  %v740_v51 = vsel %vm739_vm10, %v3642_v44, %v736_v6  ;;  %v703_v53 = vmul.f32 %v3644_v4, %v584_v52  ;;  %v593_v50 = vpop.xlane.xlu1 %592  ;;  %vm708_vm12 = vweird.f32 %v3644_v4  ;;  %v831_v3 = vand.u32 2147483647, %v4203_v29 }
 0x47d   :  { %v745_v56 = vsel %vm742_vm11, %v744_v38, %v740_v51  ;;  %3645 = vrcp.f32 %v593_v50  ;;  %vm709_vm14 = vmor %vm707_vm13, %vm708_vm12  ;;  %v758_v12 = vand.u32 2147483648, %v593_v50  ;;  %v756_v25 = vand.u32 2147483647, %v593_v50  ;;  %v881_v51 = vpop.f32.mrf.mxu1 }
 0x47e   :  { %1124 = vmatpush.msrb.mxu0 %v3537_v8  ;;  %v704_v9 = vsub.f32 1.0, %v703_v53  ;;  %v746_v36 = vmul.f32 %v4138_v31, %v745_v56  ;;  %3647 = vrcp.f32 %v4203_v29  ;;  %vm752_vm2 = vweird.f32 %v593_v50 }
 0x47f   :  { %v759_v48 = vor.u32 1.1754944e-38, %v758_v12  ;;  %vm757_vm4 = vcmp.eq.f32.partialorder %v756_v25, 8.507059e+37  ;;  %vm827_vm13 = vweird.f32 %v4203_v29 }
 0x480   :  { %v705_v16 = vmul.f32 %v3644_v4, %v704_v9  ;;  %3372 = vmatmul.msk.f32.vlgmr.msra.gmra.mxu1 %vm467_vm7, %v746_v36 }
 0x482   :  { %v706_v7 = vadd.f32 %v3644_v4, %v705_v16 }
 0x483   :  { %v3646_v24 = vpop.eup %3645 }
 0x484   :  { %v710_v63 = vsel %vm709_vm14, %v3644_v4, %v706_v7  ;;  %v748_v17 = vmul.f32 %v3646_v24, %v593_v50  ;;  %v587_v15 = vpop.xlane.xlu1 %586  ;;  %v4214_v21 = vpop.eup %3647  ;;  %vm753_vm1 = vweird.f32 %v3646_v24 }
 0x485   :  { %v715_v31 = vsel %vm712_vm15, %v714_v14, %v710_v63  ;;  %3649 = vrcp.f32 %v587_v15  ;;  %v823_v1 = vmul.f32 %v4214_v21, %v4203_v29  ;;  %vm754_vm3 = vmor %vm752_vm2, %vm753_vm1  ;;  %v728_v44 = vand.u32 2147483648, %v587_v15 }
 0x486   :  { %v749_v59 = vsub.f32 1.0, %v748_v17  ;;  %v716_v60 = vmul.f32 %v4143_v58, %v715_v31  ;;  %v726_v22 = vand.u32 2147483647, %v587_v15  ;;  %vm722_vm9 = vweird.f32 %v587_v15 }
 0x487   :  { %v824_v57 = vsub.f32 1.0, %v823_v1  ;;  %vm828_vm10 = vweird.f32 %v4214_v21  ;;  %v729_v18 = vor.u32 1.1754944e-38, %v728_v44  ;;  %vm832_vm1 = vcmp.eq.f32.partialorder %v831_v3, 8.507059e+37 }
 0x488   :  { %v750_v23 = vmul.f32 %v3646_v24, %v749_v59  ;;  %3370 = vmatmul.msk.f32.vlgmr.msra.gmra.mxu0 %vm467_vm7, %v716_v60  ;;  %vm727_vm12 = vcmp.eq.f32.partialorder %v726_v22, 8.507059e+37  ;;  %vm4231_vm14 = vmor %vm827_vm13, %vm828_vm10  ;;  %v884_v59 = vpop.f32.mrf.mxu1 }
 0x489   :  { %v825_v46 = vmul.f32 %v4214_v21, %v824_v57 }
 0x48a   :  { %v751_v28 = vadd.f32 %v3646_v24, %v750_v23 }
 0x48b   :  { %v3650_v34 = vpop.eup %3649  ;;  %v826_v62 = vadd.f32 %v4214_v21, %v825_v46 }
 0x48c   :  { %v718_v32 = vmul.f32 %v3650_v34, %v587_v15  ;;  %v602_v39 = vpop.xlane.xlu1 %601  ;;  %v755_v54 = vsel %vm754_vm3, %v3646_v24, %v751_v28  ;;  %vm723_vm8 = vweird.f32 %v3650_v34 }
 0x48d   :  { %3651 = vrcp.f32 %v602_v39  ;;  %v760_v47 = vsel %vm757_vm4, %v759_v48, %v755_v54  ;;  %vm724_vm11 = vmor %vm722_vm9, %vm723_vm8  ;;  %v803_v38 = vand.u32 2147483648, %v602_v39  ;;  %v830_v53 = vsel %vm4231_vm14, %v4214_v21, %v826_v62 }
 0x48e   :  { %v719_v58 = vsub.f32 1.0, %v718_v32  ;;  %v761_v11 = vmul.f32 %v4152_v43, %v760_v47  ;;  %v833_v43 = vand.u32 2147483648, %v4203_v29  ;;  %v801_v56 = vand.u32 2147483647, %v602_v39 }
 0x48f   :  { %vm797_vm2 = vweird.f32 %v602_v39  ;;  %v804_v10 = vor.u32 1.1754944e-38, %v803_v38 }
 0x490   :  { %v720_v52 = vmul.f32 %v3650_v34, %v719_v58  ;;  %3373 = vmatmul.msk.f32.gmra.mxu1 %vm467_vm7, %v761_v11  ;;  %vm802_vm4 = vcmp.eq.f32.partialorder %v801_v56, 8.507059e+37 }
 0x492   :  { %v721_v26 = vadd.f32 %v3650_v34, %v720_v52 }
 0x493   :  { %v3652_v5 = vpop.eup %3651 }
 0x494   :  { %v793_v0 = vmul.f32 %v3652_v5, %v602_v39  ;;  %v605_v49 = vpop.xlane.xlu1 %604  ;;  %v725_v40 = vsel %vm724_vm11, %v3650_v34, %v721_v26  ;;  %vm798_vm15 = vweird.f32 %v3652_v5 }
 0x495   :  { %3653 = vrcp.f32 %v605_v49  ;;  %v730_v2 = vsel %vm727_vm12, %v729_v18, %v725_v40  ;;  %vm799_vm3 = vmor %vm797_vm2, %vm798_vm15  ;;  %v818_v21 = vand.u32 2147483648, %v605_v49  ;;  %v816_v1 = vand.u32 2147483647, %v605_v49 }
 0x496   :  { %v794_v6 = vsub.f32 1.0, %v793_v0  ;;  %v731_v4 = vmul.f32 %v4164_v13, %v730_v2  ;;  %3655 = vrcp.f32 %v4206_v27  ;;  %v834_v13 = vor.u32 1.1754944e-38, %v833_v43 }
 0x497   :  { %vm812_vm9 = vweird.f32 %v605_v49  ;;  %v819_v23 = vor.u32 1.1754944e-38, %v818_v21  ;;  %vm817_vm11 = vcmp.eq.f32.partialorder %v816_v1, 8.507059e+37  ;;  %vm767_vm2 = vweird.f32 %v4206_v27 }
 0x498   :  { %v795_v50 = vmul.f32 %v3652_v5, %v794_v6  ;;  %3371 = vmatmul.msk.f32.gmra.mxu0 %vm467_vm7, %v731_v4  ;;  %3380 = vmatmul.msk.f32.vlgmr.msrb.gmra.mxu1 %vm190_vm6, %v881_v51  ;;  %v835_v36 = vsel %vm832_vm1, %v834_v13, %v830_v53  ;;  %v771_v0 = vand.u32 2147483647, %v4206_v27 }
 0x499   :  { %v836_v17 = vmul.f32 %v4133_v19, %v835_v36  ;;  %v1226_v36 = vld [vmem:[#allocation2 + $0x88] sm:$0xff] }
 0x49a   :  { %v796_v29 = vadd.f32 %v3652_v5, %v795_v50  ;;  %1254 = vmatpush.msrb.mxu3 %v1226_v36 }
 0x49b   :  { %v3654_v9 = vpop.eup %3653 }
 0x49c   :  { %v800_v16 = vsel %vm799_vm3, %v3652_v5, %v796_v29  ;;  %v808_v42 = vmul.f32 %v3654_v9, %v605_v49  ;;  %v4241_v14 = vpop.xlane.xlu1 %598  ;;  %v3656_v15 = vpop.eup %3655  ;;  %vm813_vm8 = vweird.f32 %v3654_v9  ;;  %v773_v5 = vand.u32 2147483648, %v4206_v27 }
 0x49d   :  { %v805_v7 = vsel %vm802_vm4, %v804_v10, %v800_v16  ;;  %vm814_vm10 = vmor %vm812_vm9, %vm813_vm8  ;;  %vm768_vm14 = vweird.f32 %v3656_v15  ;;  %vm772_vm4 = vcmp.eq.f32.partialorder %v771_v0, 8.507059e+37  ;;  %v788_v51 = vand.u32 2147483648, %v4241_v14 }
 0x49e   :  { %v809_v24 = vsub.f32 1.0, %v808_v42  ;;  %v806_v63 = vmul.f32 %v4170_v20, %v805_v7  ;;  %v763_v20 = vmul.f32 %v3656_v15, %v4206_v27  ;;  %vm769_vm3 = vmor %vm767_vm2, %vm768_vm14  ;;  %v774_v3 = vor.u32 1.1754944e-38, %v773_v5  ;;  %v1272_v42 = vld [vmem:[#allocation2 + $0x90] sm:$0xff] }
 0x49f   :  { %vm782_vm9 = vweird.f32 %v4241_v14  ;;  %v789_v56 = vor.u32 1.1754944e-38, %v788_v51  ;;  %1300 = vmatpush.msra.mxu0 %v1272_v42 }
 0x4a0   :  { %v611_v31 = vpop.xlane.xlu0 %610  ;;  %v810_v60 = vmul.f32 %v3654_v9, %v809_v24  ;;  %3376 = vmatmul.msk.f32.vlgmr.msra.gmra.mxu3 %vm467_vm7, %v806_v63  ;;  %3378 = vmatmul.msk.f32.vlgmr.msrb.gmra.mxu0 %vm467_vm7, %v836_v17  ;;  %v764_v34 = vsub.f32 1.0, %v763_v20 }
 0x4a1   :  { %3657 = vrcp.f32 %v611_v31  ;;  %3381 = vmatmul.msk.f32.gmra.mxu1 %vm190_vm6, %v884_v59  ;;  %v848_v44 = vand.u32 2147483648, %v611_v31  ;;  %v846_v46 = vand.u32 2147483647, %v611_v31  ;;  %vm842_vm13 = vweird.f32 %v611_v31 }
 0x4a2   :  { %3659 = vrcp.f32 %v4241_v14  ;;  %v811_v19 = vadd.f32 %v3654_v9, %v810_v60  ;;  %v765_v58 = vmul.f32 %v3656_v15, %v764_v34  ;;  %v3579_v60 = vld [vmem:[#allocation2 + $0x98] ss:$0 sm:$0xff] }
 0x4a3   :  { %v849_v26 = vor.u32 1.1754944e-38, %v848_v44  ;;  %vm847_vm1 = vcmp.eq.f32.partialorder %v846_v46, 8.507059e+37 }
 0x4a4   :  { %v815_v12 = vsel %vm814_vm10, %v3654_v9, %v811_v19  ;;  %v766_v22 = vadd.f32 %v3656_v15, %v765_v58  ;;  %v1180_v9 = vld [vmem:[#allocation2 + $0x80] sm:$0xff] }
 0x4a5   :  { %v820_v25 = vsel %vm817_vm11, %v819_v23, %v815_v12 }
 0x4a6   :  { %v821_v57 = vmul.f32 %v4181_v45, %v820_v25  ;;  %v770_v43 = vsel %vm769_vm3, %v3656_v15, %v766_v22 }
 0x4a7   :  { %v3658_v28 = vpop.eup %3657  ;;  %v775_v4 = vsel %vm772_vm4, %v774_v3, %v770_v43 }
 0x4a8   :  { %v3660_v48 = vpop.eup %3659  ;;  %v838_v32 = vmul.f32 %v3658_v28, %v611_v31  ;;  %v916_v39 = vpop.f32.mrf.mxu2  ;;  %3377 = vmatmul.msk.f32.gmra.mxu3 %vm467_vm7, %v821_v57  ;;  %vm843_vm12 = vweird.f32 %v3658_v28  ;;  %v776_v53 = vmul.f32 %v4107_v61, %v775_v4 }
 0x4a9   :  { %3382 = vmatmul.msk.f32.gmra.mxu1 %vm190_vm6, %v916_v39  ;;  %v778_v47 = vmul.f32 %v3660_v48, %v4241_v14  ;;  %vm844_vm15 = vmor %vm842_vm13, %vm843_vm12  ;;  %vm783_vm8 = vweird.f32 %v3660_v48 }
 0x4aa   :  { %v839_v54 = vsub.f32 1.0, %v838_v32  ;;  %vm784_vm10 = vmor %vm782_vm9, %vm783_vm8 }
 0x4ab   :  { %v779_v45 = vsub.f32 1.0, %v778_v47 }
 0x4ac   :  { %v840_v11 = vmul.f32 %v3658_v28, %v839_v54 }
 0x4ad   :  { %v780_v2 = vmul.f32 %v3660_v48, %v779_v45 }
 0x4ae   :  { %v841_v52 = vadd.f32 %v3658_v28, %v840_v11 }
 0x4af   :  { %v781_v38 = vadd.f32 %v3660_v48, %v780_v2 }
 0x4b0   :  { %v919_v18 = vpop.f32.mrf.mxu2  ;;  %v845_v62 = vsel %vm844_vm15, %v3658_v28, %v841_v52 }
 0x4b1   :  { %v850_v49 = vsel %vm847_vm1, %v849_v26, %v845_v62  ;;  %3383 = vmatmul.msk.f32.gmra.mxu1 %vm190_vm6, %v919_v18  ;;  %v785_v50 = vsel %vm784_vm10, %v3660_v48, %v781_v38 }
 0x4b2   :  { %v851_v40 = vmul.f32 %v4192_v41, %v850_v49  ;;  %v786_v41 = vand.u32 2147483647, %v4241_v14 }
 0x4b4   :  { %3379 = vmatmul.msk.f32.gmra.mxu0 %vm467_vm7, %v851_v40  ;;  %v3530_v6 = vpop.permute.xlu1 %3529  ;;  %vm787_vm11 = vcmp.eq.f32.partialorder %v786_v41, 8.507059e+37 }
 0x4b5   :  { %v3531_v8 = vunpack.i.l.bf16 %v3530_v6  ;;  %v3532_v27 = vunpack.i.h.bf16 %v3530_v6  ;;  %v790_v13 = vsel %vm787_vm11, %v789_v56, %v785_v50 }
 0x4b6   :  { %v791_v29 = vmul.f32 %v4190_v55, %v790_v13 }
 0x4b7   :  { %1053 = vmatpush.msrb.mxu2 %v3531_v8 }
 0x4b9   :  { %1054 = vmatpush.msrb.mxu2 %v3532_v27 }
 0x4ba   :  { %3374 = vmatmul.msk.f32.vlgmr.msrb.gmra.mxu2 %vm467_vm7, %v776_v53  ;;  %v3829_v53 = vmov 32.0  }
 0x4bb   :  { %1208 = vmatpush.msra.mxu2 %v1180_v9  ;;  %3661 = vrcp.f32 %v3829_v53  ;;  %v1485_v53 = vld [vmem:[#allocation2 + $0x100] sm:$0xff] }
 0x4c1   :  { %v3662_v41 = vpop.eup %3661 }
 0x4c2   :  { %3375 = vmatmul.msk.f32.gmra.mxu2 %vm467_vm7, %v791_v29  ;;  %v1337_v50 = vmul.f32 32.0, %v3662_v41  ;;  %vm1341_vm12 = vweird.f32 %v3662_v41 }
 0x4c4   :  { %v1338_v56 = vsub.f32 1.0, %v1337_v50 }
 0x4c6   :  { %v1339_v13 = vmul.f32 %v3662_v41, %v1338_v56  ;;  %v1484_v56 = vld [vmem:[#allocation2 + $0xf8] sm:$0xff] }
 0x4f1   :  { %v951_v10 = vpop.f32.mrf.mxu3 }
 0x4f2   :  { %3384 = vmatmul.msk.f32.vlgmr.msra.gmra.mxu2 %vm190_vm6, %v951_v10 }
 0x4f9   :  { %v954_v61 = vpop.f32.mrf.mxu3 }
 0x4fa   :  { %3385 = vmatmul.msk.f32.gmra.mxu2 %vm190_vm6, %v954_v61 }
 0x4fd   :  { %v1021_v16 = vpop.f32.mrf.mxu1 }
 0x4fe   :  { %3388 = vmatmul.msk.f32.vlgmr.msrb.gmra.mxu3 %vm190_vm6, %v1021_v16 }
 0x505   :  { %v986_v7 = vpop.f32.mrf.mxu0 }
 0x506   :  { %3386 = vmatmul.msk.f32.gmra.mxu2 %vm190_vm6, %v986_v7 }
 0x50d   :  { %v1024_v55 = vpop.f32.mrf.mxu1 }
 0x50e   :  { %3389 = vmatmul.msk.f32.gmra.mxu3 %vm190_vm6, %v1024_v55 }
 0x515   :  { %v989_v24 = vpop.f32.mrf.mxu0  ;;  %v1163_v59 = vpop.f32.mrf.mxu1 }
 0x516   :  { %3387 = vmatmul.msk.f32.gmra.mxu2 %vm190_vm6, %v989_v24  ;;  %v1176_v20 = vadd.f32 %v3579_v60, %v1163_v59 }
 0x51d   :  { %v1126_v17 = vpop.f32.mrf.mxu0 }
 0x51e   :  { %v1166_v25 = vpop.f32.mrf.mxu1 }
 0x51f   :  { %v1177_v48 = vadd.f32 %v3579_v60, %v1166_v25  ;;  %v1429_v25 = vld [vmem:[#allocation2 + $0xb0] sm:$0xff] }
 0x523   :  { %v1091_v14 = vpop.f32.mrf.mxu3 }
 0x524   :  { %3392 = vmatmul.msk.f32.vlgmr.msra.gmra.mxu0 %vm190_vm6, %v1091_v14 }
 0x526   :  { %v1169_v22 = vpop.f32.mrf.mxu1 }
 0x527   :  { %v1178_v26 = vadd.f32 %v3579_v60, %v1169_v22 }
 0x52b   :  { %v1094_v63 = vpop.f32.mrf.mxu3 }
 0x52c   :  { %3393 = vmatmul.msk.f32.gmra.mxu0 %vm190_vm6, %v1094_v63 }
 0x52e   :  { %v1172_v0 = vpop.f32.mrf.mxu1 }
 0x52f   :  { %v1179_v43 = vadd.f32 %v3579_v60, %v1172_v0 }
 0x531   :  { %v1129_v15 = vpop.f32.mrf.mxu0 }
 0x534   :  { %3394 = vmatmul.msk.f32.gmra.mxu0 %vm190_vm6, %v1126_v17 }
 0x53c   :  { %3395 = vmatmul.msk.f32.gmra.mxu0 %vm190_vm6, %v1129_v15 }
 0x53d   :  { %v1056_v21 = vpop.f32.mrf.mxu2 }
 0x53e   :  { %3390 = vmatmul.msk.f32.gmra.mxu3 %vm190_vm6, %v1056_v21 }
 0x545   :  { %v1059_v31 = vpop.f32.mrf.mxu2 }
 0x546   :  { %3391 = vmatmul.msk.f32.gmra.mxu3 %vm190_vm6, %v1059_v31 }
 0x575   :  { %v1210_v1 = vpop.f32.mrf.mxu2 }
 0x576   :  { %v1222_v23 = vadd.f32 %v1210_v1, %v1176_v20 }
 0x57d   :  { %v1213_v57 = vpop.f32.mrf.mxu2 }
 0x57e   :  { %v1223_v54 = vadd.f32 %v1213_v57, %v1177_v48 }
 0x581   :  { %v1256_v19 = vpop.f32.mrf.mxu3 }
 0x582   :  { %v1268_v12 = vadd.f32 %v1256_v19, %v1222_v23  ;;  %v1432_v19 = vld [vmem:[#allocation2 + $0xc8] sm:$0xff]  ;;  %v1431_v23 = vld [vmem:[#allocation2 + $0xc0] sm:$0xff] }
 0x583   :  { %1459 = vmatpush.msra.mxu1 %v1432_v19 }
 0x585   :  { %1460 = vmatpush.msra.mxu1 %v1431_v23 }
 0x589   :  { %v1216_v45 = vpop.f32.mrf.mxu2 }
 0x58a   :  { %v1224_v5 = vadd.f32 %v1216_v45, %v1178_v26  ;;  %v4307_v45 = vld [vmem:[#allocation2 + $0xa0] ss:$0 sm:$0xff] }
 0x591   :  { %v1259_v39 = vpop.f32.mrf.mxu3 }
 0x592   :  { %v1269_v47 = vadd.f32 %v1259_v39, %v1223_v54 }
 0x599   :  { %v1219_v40 = vpop.f32.mrf.mxu2 }
 0x59a   :  { %v1225_v3 = vadd.f32 %v1219_v40, %v1179_v43 }
 0x5a1   :  { %v1302_v28 = vpop.f32.mrf.mxu0 }
 0x5a2   :  { %v1314_v34 = vadd.f32 %v1302_v28, %v1268_v12  ;;  %v1430_v12 = vld [vmem:[#allocation2 + $0xb8] sm:$0xff] }
 0x5a3   :  { %1461 = vmatpush.msra.mxu1 %v1430_v12  ;;  %v1481_v12 = vld [vmem:[#allocation2 + $0xe0] sm:$0xff] }
 0x5a4   :  { %v1318_v32 = vadd.f32 %v1314_v34, %v3868_v30 }
 0x5a5   :  { %1462 = vmatpush.msra.mxu1 %v1429_v25  ;;  %v1480_v25 = vld [vmem:[#allocation2 + $0xd8] sm:$0xff] }
 0x5a6   :  { %v1324_v58 = vsel %vm116_vm5, %v1318_v32, 0.0 }
 0x5a7   :  { %1325 = vadd.xlane.f32.xlu1 %v1324_v58 }
 0x5a9   :  { %v1305_v44 = vpop.f32.mrf.mxu0 }
 0x5aa   :  { %v1315_v11 = vadd.f32 %v1305_v44, %v1269_v47 }
 0x5ac   :  { %v1319_v46 = vadd.f32 %v1315_v11, %v3872_v33 }
 0x5ae   :  { %v1327_v52 = vsel %vm116_vm5, %v1319_v46, 0.0 }
 0x5af   :  { %1328 = vadd.xlane.f32.xlu2 %v1327_v52 }
 0x5b1   :  { %v1308_v18 = vpop.f32.mrf.mxu0 }
 0x5b9   :  { %v1311_v8 = vpop.f32.mrf.mxu0 }
 0x5c1   :  { %v1262_v62 = vpop.f32.mrf.mxu3 }
 0x5c2   :  { %v1270_v30 = vadd.f32 %v1262_v62, %v1224_v5  ;;  %v3581_v62 = vld [vmem:[#allocation2 + $0xa8] ss:$0 sm:$0xff] }
 0x5c4   :  { %v1316_v49 = vadd.f32 %v1308_v18, %v1270_v30 }
 0x5c6   :  { %v1320_v2 = vadd.f32 %v1316_v49, %v3876_v35  ;;  %v1340_v35 = vadd.f32 %v3662_v41, %v1339_v13 }
 0x5c8   :  { %v1330_v6 = vsel %vm116_vm5, %v1320_v2, 0.0  ;;  %v4287_v29 = vsel %vm1341_vm12, %v3662_v41, %v1340_v35 }
 0x5c9   :  { %v1265_v33 = vpop.f32.mrf.mxu3  ;;  %1331 = vadd.xlane.f32.xlu0 %v1330_v6 }
 0x5ca   :  { %v1271_v4 = vadd.f32 %v1265_v33, %v1225_v3 }
 0x5cc   :  { %v1317_v38 = vadd.f32 %v1311_v8, %v1271_v4 }
 0x5ce   :  { %v1321_v51 = vadd.f32 %v1317_v38, %v3880_v37 }
 0x5d0   :  { %v1333_v27 = vsel %vm116_vm5, %v1321_v51, 0.0 }
 0x5d1   :  { %1334 = vadd.xlane.f32.xlu0 %v1333_v27  ;;  %v1486_v27 = vld [vmem:[#allocation2 + $0x108] sm:$0xff] }
 0x61a   :  { %v1326_v9 = vpop.xlane.xlu1 %1325 }
 0x61b   :  { %v1343_v36 = vmul.f32 %v4287_v29, %v1326_v9  ;;  %v1483_v9 = vld [vmem:[#allocation2 + $0xf0] sm:$0xff] }
 0x61d   :  { %v1347_v10 = vsub.f32 %v1318_v32, %v1343_v36 }
 0x61f   :  { %v1351_v61 = vmul.f32 %v1347_v10, %v1347_v10 }
 0x621   :  { %v1355_v37 = vsel %vm116_vm5, %v1351_v61, 0.0 }
 0x622   :  { %v1329_v16 = vpop.xlane.xlu2 %1328  ;;  %1356 = vadd.xlane.f32.xlu0 %v1355_v37 }
 0x623   :  { %v1344_v42 = vmul.f32 %v4287_v29, %v1329_v16 }
 0x625   :  { %v1348_v7 = vsub.f32 %v1319_v46, %v1344_v42 }
 0x627   :  { %v1352_v55 = vmul.f32 %v1348_v7, %v1348_v7 }
 0x629   :  { %v1358_v24 = vsel %vm116_vm5, %v1352_v55, 0.0 }
 0x62a   :  { %1359 = vadd.xlane.f32.xlu1 %v1358_v24 }
 0x63c   :  { %v1332_v14 = vpop.xlane.xlu0 %1331 }
 0x63d   :  { %v1345_v63 = vmul.f32 %v4287_v29, %v1332_v14 }
 0x63f   :  { %v4294_v17 = vsub.f32 %v1320_v2, %v1345_v63 }
 0x641   :  { %v1353_v15 = vmul.f32 %v4294_v17, %v4294_v17 }
 0x643   :  { %v1361_v21 = vsel %vm116_vm5, %v1353_v15, 0.0 }
 0x644   :  { %1362 = vadd.xlane.f32.xlu0 %v1361_v21  ;;  %v1335_v31 = vpop.xlane.xlu0 %1334 }
 0x645   :  { %v1346_v59 = vmul.f32 %v4287_v29, %v1335_v31 }
 0x647   :  { %v4300_v60 = vsub.f32 %v1321_v51, %v1346_v59  ;;  %v1487_v51 = vld [vmem:[#allocation2 + $0x110] sm:$0xff] }
 0x648   :  { %1510 = vmatpush.msrb.mxu2 %v1487_v51 }
 0x649   :  { %v1354_v1 = vmul.f32 %v4300_v60, %v4300_v60 }
 0x64a   :  { %1511 = vmatpush.msrb.mxu2 %v1486_v27 }
 0x64b   :  { %v1364_v20 = vsel %vm116_vm5, %v1354_v1, 0.0 }
 0x64c   :  { %1365 = vadd.xlane.f32.xlu2 %v1364_v20  ;;  %1512 = vmatpush.msrb.mxu2 %v1485_v53 }
 0x64e   :  { %1513 = vmatpush.msrb.mxu2 %v1484_v56 }
 0x650   :  { %1514 = vmatpush.msrb.mxu2 %v1483_v9 }
 0x695   :  { %v1357_v28 = vpop.xlane.xlu0 %1356 }
 0x696   :  { %v1367_v34 = vmul.f32 %v1357_v28, %v4287_v29  ;;  %v3582_v28 = vld [vmem:[#allocation2 + $0xd0] ss:$0 sm:$0xff] }
 0x698   :  { %v1371_v57 = vadd.f32 1e-05, %v1367_v34 }
 0x69a   :  { %3663 = vrsqrt.f32 %v1371_v57  ;;  %vm1381_vm14 = vweird.f32 %v1371_v57 }
 0x69d   :  { %v1360_v48 = vpop.xlane.xlu1 %1359 }
 0x69e   :  { %v1368_v32 = vmul.f32 %v1360_v48, %v4287_v29 }
 0x6a0   :  { %v3664_v39 = vpop.eup %3663  ;;  %v1372_v54 = vadd.f32 1e-05, %v1368_v32 }
 0x6a1   :  { %v1376_v58 = vmul.f32 %v3664_v39, %v1371_v57  ;;  %vm1382_vm13 = vweird.f32 %v3664_v39 }
 0x6a2   :  { %3665 = vrsqrt.f32 %v1372_v54  ;;  %vm1383_vm15 = vmor %vm1381_vm14, %vm1382_vm13  ;;  %vm1391_vm2 = vweird.f32 %v1372_v54 }
 0x6a3   :  { %v1377_v47 = vmul.f32 %v3664_v39, %v1376_v58 }
 0x6a5   :  { %v1378_v44 = vmul.f32 0.5, %v1377_v47 }
 0x6a7   :  { %v1379_v11 = vsub.f32 1.5, %v1378_v44 }
 0x6a8   :  { %v3666_v46 = vpop.eup %3665 }
 0x6a9   :  { %v1380_v52 = vmul.f32 %v3664_v39, %v1379_v11  ;;  %v1386_v22 = vmul.f32 %v3666_v46, %v1372_v54  ;;  %vm1392_vm1 = vweird.f32 %v3666_v46 }
 0x6aa   :  { %vm1393_vm3 = vmor %vm1391_vm2, %vm1392_vm1 }
 0x6ab   :  { %v1384_v26 = vsel %vm1383_vm15, %v3664_v39, %v1380_v52  ;;  %v1387_v5 = vmul.f32 %v3666_v46, %v1386_v22  ;;  %v3583_v52 = vld [vmem:[#allocation2 + $0x118] ss:$0 sm:$0xff] }
 0x6ac   :  { %v1415_v18 = vmul.f32 %v1384_v26, %v1347_v10 }
 0x6ad   :  { %v1388_v30 = vmul.f32 0.5, %v1387_v5 }
 0x6ae   :  { %v1420_v0 = vmul.f32 %v4307_v45, %v1415_v18 }
 0x6af   :  { %v1389_v49 = vsub.f32 1.5, %v1388_v30 }
 0x6b0   :  { %v4310_v40 = vadd.f32 %v3581_v62, %v1420_v0 }
 0x6b1   :  { %v1390_v43 = vmul.f32 %v3666_v46, %v1389_v49 }
 0x6b2   :  { %3396 = vmatmul.msk.f32.vlgmr.msra.gmra.mxu1 %vm116_vm5, %v4310_v40 }
 0x6b3   :  { %v1394_v2 = vsel %vm1393_vm3, %v3666_v46, %v1390_v43 }
 0x6b4   :  { %v1416_v3 = vmul.f32 %v1394_v2, %v1348_v7 }
 0x6b6   :  { %v1421_v6 = vmul.f32 %v4307_v45, %v1416_v3 }
 0x6b7   :  { %v1363_v33 = vpop.xlane.xlu0 %1362 }
 0x6b8   :  { %v1369_v4 = vmul.f32 %v1363_v33, %v4287_v29  ;;  %v4316_v8 = vadd.f32 %v3581_v62, %v1421_v6 }
 0x6ba   :  { %v1373_v38 = vadd.f32 1e-05, %v1369_v4  ;;  %3397 = vmatmul.msk.f32.gmra.mxu1 %vm116_vm5, %v4316_v8 }
 0x6bc   :  { %3667 = vrsqrt.f32 %v1373_v38  ;;  %vm1401_vm8 = vweird.f32 %v1373_v38 }
 0x6bf   :  { %v1366_v41 = vpop.xlane.xlu2 %1365 }
 0x6c0   :  { %v1370_v50 = vmul.f32 %v1366_v41, %v4287_v29 }
 0x6c2   :  { %v3668_v13 = vpop.eup %3667  ;;  %v1374_v35 = vadd.f32 1e-05, %v1370_v50 }
 0x6c3   :  { %v1396_v36 = vmul.f32 %v3668_v13, %v1373_v38  ;;  %vm1402_vm4 = vweird.f32 %v3668_v13 }
 0x6c4   :  { %3669 = vrsqrt.f32 %v1374_v35  ;;  %vm1403_vm9 = vmor %vm1401_vm8, %vm1402_vm4  ;;  %vm1411_vm11 = vweird.f32 %v1374_v35 }
 0x6c5   :  { %v1397_v10 = vmul.f32 %v3668_v13, %v1396_v36 }
 0x6c7   :  { %v1398_v61 = vmul.f32 0.5, %v1397_v10 }
 0x6c9   :  { %v1399_v37 = vsub.f32 1.5, %v1398_v61 }
 0x6ca   :  { %v3670_v16 = vpop.eup %3669 }
 0x6cb   :  { %v1400_v42 = vmul.f32 %v3668_v13, %v1399_v37  ;;  %v1406_v7 = vmul.f32 %v3670_v16, %v1374_v35  ;;  %vm1412_vm10 = vweird.f32 %v3670_v16 }
 0x6cc   :  { %vm1413_vm12 = vmor %vm1411_vm11, %vm1412_vm10 }
 0x6cd   :  { %v1404_v55 = vsel %vm1403_vm9, %v3668_v13, %v1400_v42  ;;  %v1407_v24 = vmul.f32 %v3670_v16, %v1406_v7 }
 0x6ce   :  { %v1417_v14 = vmul.f32 %v1404_v55, %v4294_v17  ;;  %v1482_v17 = vld [vmem:[#allocation2 + $0xe8] sm:$0xff] }
 0x6cf   :  { %v1408_v63 = vmul.f32 0.5, %v1407_v24  ;;  %1515 = vmatpush.msrb.mxu2 %v1482_v17 }
 0x6d0   :  { %v1422_v15 = vmul.f32 %v4307_v45, %v1417_v14  ;;  %v1638_v14 = vld [vmem:[#allocation2 + $0x148] sm:$0xff] }
 0x6d1   :  { %v1409_v21 = vsub.f32 1.5, %v1408_v63  ;;  %1516 = vmatpush.msrb.mxu2 %v1481_v12  ;;  %1665 = vmatpush.msra.mxu3 %v1638_v14  ;;  %v1637_v63 = vld [vmem:[#allocation2 + $0x140] sm:$0xff] }
 0x6d2   :  { %v1427_v31 = vadd.f32 %v3581_v62, %v1422_v15  ;;  %v1636_v15 = vld [vmem:[#allocation2 + $0x138] sm:$0xff] }
 0x6d3   :  { %v1410_v59 = vmul.f32 %v3670_v16, %v1409_v21  ;;  %1517 = vmatpush.msrb.mxu2 %v1480_v25  ;;  %1666 = vmatpush.msra.mxu3 %v1637_v63  ;;  %v1635_v21 = vld [vmem:[#allocation2 + $0x130] sm:$0xff] }
 0x6d4   :  { %3398 = vmatmul.msk.f32.gmra.mxu1 %vm116_vm5, %v1427_v31 }
 0x6d5   :  { %v1414_v1 = vsel %vm1413_vm12, %v3670_v16, %v1410_v59  ;;  %1667 = vmatpush.msra.mxu3 %v1636_v15 }
 0x6d6   :  { %v1418_v20 = vmul.f32 %v1414_v1, %v4300_v60 }
 0x6d7   :  { %1668 = vmatpush.msra.mxu3 %v1635_v21 }
 0x6d8   :  { %v1423_v19 = vmul.f32 %v4307_v45, %v1418_v20 }
 0x6da   :  { %v1428_v23 = vadd.f32 %v3581_v62, %v1423_v19 }
 0x6dc   :  { %3399 = vmatmul.msk.f32.gmra.mxu1 %vm116_vm5, %v1428_v23 }
 0x72f   :  { %v1464_v34 = vpop.f32.mrf.mxu1 }
 0x730   :  { %v1465_v57 = vadd.f32 %v3582_v28, %v1464_v34 }
 0x732   :  { %v1476_v48 = vmax.f32 %v1465_v57, 0.0 }
 0x734   :  { %3400 = vmatmul.msk.f32.vlgmr.msrb.gmra.mxu2 %vm68_vm0, %v1476_v48 }
 0x737   :  { %v1467_v32 = vpop.f32.mrf.mxu1 }
 0x738   :  { %v1468_v39 = vadd.f32 %v3582_v28, %v1467_v32 }
 0x73a   :  { %v1477_v60 = vmax.f32 %v1468_v39, 0.0  ;;  %v3584_v39 = vld [vmem:[#allocation2 + $0x120] ss:$0 sm:$0xff] }
 0x73c   :  { %3401 = vmatmul.msk.f32.gmra.mxu2 %vm68_vm0, %v1477_v60 }
 0x751   :  { %v1470_v54 = vpop.f32.mrf.mxu1 }
 0x752   :  { %v1471_v58 = vadd.f32 %v3582_v28, %v1470_v54 }
 0x754   :  { %v1478_v47 = vmax.f32 %v1471_v58, 0.0 }
 0x756   :  { %3402 = vmatmul.msk.f32.gmra.mxu2 %vm68_vm0, %v1478_v47  ;;  %v3585_v47 = vld [vmem:[#allocation2 + $0x128] ss:$0 sm:$0xff] }
 0x759   :  { %v1473_v44 = vpop.f32.mrf.mxu1 }
 0x75a   :  { %v1474_v11 = vadd.f32 %v3582_v28, %v1473_v44 }
 0x75c   :  { %v1479_v46 = vmax.f32 %v1474_v11, 0.0 }
 0x75e   :  { %3403 = vmatmul.msk.f32.gmra.mxu2 %vm68_vm0, %v1479_v46 }
 0x7b7   :  { %v1519_v22 = vpop.f32.mrf.mxu2 }
 0x7b8   :  { %v1520_v45 = vadd.f32 %v3583_v52, %v1519_v22 }
 0x7ba   :  { %v1531_v26 = vadd.f32 %v1520_v45, %v4310_v40 }
 0x7bc   :  { %v1537_v5 = vsel %vm116_vm5, %v1531_v26, 0.0 }
 0x7bd   :  { %1538 = vadd.xlane.f32.xlu1 %v1537_v5 }
 0x7bf   :  { %v1522_v18 = vpop.f32.mrf.mxu2 }
 0x7c0   :  { %v1523_v62 = vadd.f32 %v3583_v52, %v1522_v18 }
 0x7c2   :  { %v1532_v30 = vadd.f32 %v1523_v62, %v4316_v8 }
 0x7c4   :  { %v1540_v0 = vsel %vm116_vm5, %v1532_v30, 0.0 }
 0x7c5   :  { %1541 = vadd.xlane.f32.xlu0 %v1540_v0 }
 0x7d9   :  { %v1525_v49 = vpop.f32.mrf.mxu2 }
 0x7da   :  { %v1526_v43 = vadd.f32 %v3583_v52, %v1525_v49 }
 0x7dc   :  { %v1533_v2 = vadd.f32 %v1526_v43, %v1427_v31 }
 0x7de   :  { %v1543_v3 = vsel %vm116_vm5, %v1533_v2, 0.0 }
 0x7df   :  { %1544 = vadd.xlane.f32.xlu2 %v1543_v3 }
 0x7e1   :  { %v1528_v6 = vpop.f32.mrf.mxu2 }
 0x7e2   :  { %v1529_v33 = vadd.f32 %v3583_v52, %v1528_v6 }
 0x7e4   :  { %v1534_v4 = vadd.f32 %v1529_v33, %v1428_v23 }
 0x7e6   :  { %v1546_v40 = vsel %vm116_vm5, %v1534_v4, 0.0 }
 0x7e7   :  { %1547 = vadd.xlane.f32.xlu1 %v1546_v40 }
 0x830   :  { %v1539_v38 = vpop.xlane.xlu1 %1538 }
 0x831   :  { %v1549_v51 = vmul.f32 %v1539_v38, %v4287_v29 }
 0x833   :  { %v1553_v27 = vsub.f32 %v1531_v26, %v1549_v51 }
 0x835   :  { %v1557_v8 = vmul.f32 %v1553_v27, %v1553_v27 }
 0x837   :  { %v1561_v53 = vsel %vm116_vm5, %v1557_v8, 0.0 }
 0x838   :  { %1562 = vadd.xlane.f32.xlu0 %v1561_v53  ;;  %v1542_v41 = vpop.xlane.xlu0 %1541 }
 0x839   :  { %v1550_v50 = vmul.f32 %v1542_v41, %v4287_v29 }
 0x83b   :  { %v1554_v56 = vsub.f32 %v1532_v30, %v1550_v50 }
 0x83d   :  { %v1558_v13 = vmul.f32 %v1554_v56, %v1554_v56 }
 0x83f   :  { %v1564_v35 = vsel %vm116_vm5, %v1558_v13, 0.0 }
 0x840   :  { %1565 = vadd.xlane.f32.xlu2 %v1564_v35 }
 0x852   :  { %v1545_v9 = vpop.xlane.xlu2 %1544 }
 0x853   :  { %v1551_v36 = vmul.f32 %v1545_v9, %v4287_v29 }
 0x855   :  { %v4342_v10 = vsub.f32 %v1533_v2, %v1551_v36 }
 0x857   :  { %v1559_v61 = vmul.f32 %v4342_v10, %v4342_v10 }
 0x859   :  { %v1567_v37 = vsel %vm116_vm5, %v1559_v61, 0.0 }
 0x85a   :  { %v1548_v16 = vpop.xlane.xlu1 %1547  ;;  %1568 = vadd.xlane.f32.xlu1 %v1567_v37 }
 0x85b   :  { %v1552_v42 = vmul.f32 %v1548_v16, %v4287_v29 }
 0x85d   :  { %v4348_v7 = vsub.f32 %v1534_v4, %v1552_v42 }
 0x85f   :  { %v1560_v55 = vmul.f32 %v4348_v7, %v4348_v7 }
 0x861   :  { %v1570_v24 = vsel %vm116_vm5, %v1560_v55, 0.0 }
 0x862   :  { %1571 = vadd.xlane.f32.xlu0 %v1570_v24 }
 0x8ab   :  { %v1563_v31 = vpop.xlane.xlu0 %1562 }
 0x8ac   :  { %v1573_v59 = vmul.f32 %v1563_v31, %v4287_v29 }
 0x8ae   :  { %v1577_v1 = vadd.f32 1e-05, %v1573_v59 }
 0x8b0   :  { %3671 = vrsqrt.f32 %v1577_v1  ;;  %vm1587_vm14 = vweird.f32 %v1577_v1 }
 0x8b3   :  { %v1566_v20 = vpop.xlane.xlu2 %1565 }
 0x8b4   :  { %v1574_v19 = vmul.f32 %v1566_v20, %v4287_v29 }
 0x8b6   :  { %v3672_v23 = vpop.eup %3671  ;;  %v1578_v17 = vadd.f32 1e-05, %v1574_v19 }
 0x8b7   :  { %v1582_v12 = vmul.f32 %v3672_v23, %v1577_v1  ;;  %vm1588_vm13 = vweird.f32 %v3672_v23 }
 0x8b8   :  { %3673 = vrsqrt.f32 %v1578_v17  ;;  %vm1589_vm15 = vmor %vm1587_vm14, %vm1588_vm13  ;;  %vm1597_vm2 = vweird.f32 %v1578_v17 }
 0x8b9   :  { %v1583_v25 = vmul.f32 %v3672_v23, %v1582_v12 }
 0x8bb   :  { %v1584_v28 = vmul.f32 0.5, %v1583_v25 }
 0x8bd   :  { %v1585_v34 = vsub.f32 1.5, %v1584_v28 }
 0x8be   :  { %v3674_v57 = vpop.eup %3673 }
 0x8bf   :  { %v1586_v48 = vmul.f32 %v3672_v23, %v1585_v34  ;;  %v1592_v32 = vmul.f32 %v3674_v57, %v1578_v17  ;;  %vm1598_vm1 = vweird.f32 %v3674_v57 }
 0x8c0   :  { %vm1599_vm3 = vmor %vm1597_vm2, %vm1598_vm1 }
 0x8c1   :  { %v1590_v60 = vsel %vm1589_vm15, %v3672_v23, %v1586_v48  ;;  %v1593_v54 = vmul.f32 %v3674_v57, %v1592_v32 }
 0x8c2   :  { %v1621_v58 = vmul.f32 %v1590_v60, %v1553_v27 }
 0x8c3   :  { %v1594_v44 = vmul.f32 0.5, %v1593_v54 }
 0x8c4   :  { %v1626_v11 = vmul.f32 %v3584_v39, %v1621_v58 }
 0x8c5   :  { %v1595_v46 = vsub.f32 1.5, %v1594_v44 }
 0x8c6   :  { %v4355_v52 = vadd.f32 %v3585_v47, %v1626_v11 }
 0x8c7   :  { %v1596_v22 = vmul.f32 %v3674_v57, %v1595_v46 }
 0x8c8   :  { %3404 = vmatmul.msk.f32.vlgmr.msra.gmra.mxu3 %vm116_vm5, %v4355_v52 }
 0x8c9   :  { %v1600_v45 = vsel %vm1599_vm3, %v3674_v57, %v1596_v22 }
 0x8ca   :  { %v1622_v26 = vmul.f32 %v1600_v45, %v1554_v56 }
 0x8cc   :  { %v1627_v5 = vmul.f32 %v3584_v39, %v1622_v26 }
 0x8cd   :  { %v1569_v18 = vpop.xlane.xlu1 %1568 }
 0x8ce   :  { %v1575_v62 = vmul.f32 %v1569_v18, %v4287_v29  ;;  %v4360_v30 = vadd.f32 %v3585_v47, %v1627_v5 }
 0x8d0   :  { %v1579_v0 = vadd.f32 1e-05, %v1575_v62  ;;  %3405 = vmatmul.msk.f32.gmra.mxu3 %vm116_vm5, %v4360_v30 }
 0x8d2   :  { %3675 = vrsqrt.f32 %v1579_v0  ;;  %vm1607_vm8 = vweird.f32 %v1579_v0 }
 0x8d5   :  { %v1572_v49 = vpop.xlane.xlu0 %1571 }
 0x8d6   :  { %v1576_v43 = vmul.f32 %v1572_v49, %v4287_v29 }
 0x8d8   :  { %v3676_v2 = vpop.eup %3675  ;;  %v1580_v3 = vadd.f32 1e-05, %v1576_v43 }
 0x8d9   :  { %v1602_v6 = vmul.f32 %v3676_v2, %v1579_v0  ;;  %vm1608_vm4 = vweird.f32 %v3676_v2 }
 0x8da   :  { %3677 = vrsqrt.f32 %v1580_v3  ;;  %vm1609_vm9 = vmor %vm1607_vm8, %vm1608_vm4  ;;  %vm1617_vm11 = vweird.f32 %v1580_v3 }
 0x8db   :  { %v1603_v33 = vmul.f32 %v3676_v2, %v1602_v6 }
 0x8dd   :  { %v1604_v4 = vmul.f32 0.5, %v1603_v33 }
 0x8df   :  { %v1605_v40 = vsub.f32 1.5, %v1604_v4 }
 0x8e0   :  { %v3678_v38 = vpop.eup %3677 }
 0x8e1   :  { %v1606_v51 = vmul.f32 %v3676_v2, %v1605_v40  ;;  %v1612_v27 = vmul.f32 %v3678_v38, %v1580_v3  ;;  %vm1618_vm10 = vweird.f32 %v3678_v38 }
 0x8e2   :  { %vm1619_vm12 = vmor %vm1617_vm11, %vm1618_vm10 }
 0x8e3   :  { %v1610_v8 = vsel %vm1609_vm9, %v3676_v2, %v1606_v51  ;;  %v1613_v53 = vmul.f32 %v3678_v38, %v1612_v27 }
 0x8e4   :  { %v1623_v41 = vmul.f32 %v1610_v8, %v4342_v10  ;;  %v3586_v10 = vld [vmem:[#allocation2 + $0x150] ss:$0 sm:$0xff] }
 0x8e5   :  { %v1614_v50 = vmul.f32 0.5, %v1613_v53 }
 0x8e6   :  { %v1628_v56 = vmul.f32 %v3584_v39, %v1623_v41 }
 0x8e7   :  { %v1615_v13 = vsub.f32 1.5, %v1614_v50 }
 0x8e8   :  { %v4366_v35 = vadd.f32 %v3585_v47, %v1628_v56 }
 0x8e9   :  { %v1616_v9 = vmul.f32 %v3678_v38, %v1615_v13 }
 0x8ea   :  { %3406 = vmatmul.msk.f32.gmra.mxu3 %vm116_vm5, %v4366_v35 }
 0x8eb   :  { %v1620_v36 = vsel %vm1619_vm12, %v3678_v38, %v1616_v9 }
 0x8ec   :  { %v1624_v61 = vmul.f32 %v1620_v36, %v4348_v7 }
 0x8ee   :  { %v1629_v37 = vmul.f32 %v3584_v39, %v1624_v61 }
 0x8f0   :  { %v4371_v16 = vadd.f32 %v3585_v47, %v1629_v37 }
 0x8f2   :  { %3407 = vmatmul.msk.f32.gmra.mxu3 %vm116_vm5, %v4371_v16 }
 0x94b   :  { %v1670_v42 = vpop.f32.mrf.mxu3 }
 0x94c   :  { %v1671_v55 = vadd.f32 %v3586_v10, %v1670_v42 }
 0x94e   :  { %1686 = vrot.lane.b32.xlu1 %v1671_v55, %s3824_s0 }
 0x953   :  { %v1673_v24 = vpop.f32.mrf.mxu3 }
 0x954   :  { %v1674_v14 = vadd.f32 %v3586_v10, %v1673_v24 }
 0x956   :  { %1688 = vrot.lane.b32.xlu2 %v1674_v14, %s3824_s0  ;;  %1694 = vrot.lane.b32.xlu1 %v1671_v55, %s3826_s24  ;;  %v3538_v54 = vpack.i.bf16 %v1671_v55, %v1674_v14 }
 0x96d   :  { %v1676_v63 = vpop.f32.mrf.mxu3 }
 0x96e   :  { %v4378_v15 = vadd.f32 %v3586_v10, %v1676_v63 }
 0x970   :  { %1690 = vrot.lane.b32.xlu2 %v4378_v15, %s3824_s0 }
 0x975   :  { %v1679_v7 = vpop.f32.mrf.mxu3 }
 0x976   :  { %v4382_v21 = vadd.f32 %v3586_v10, %v1679_v7 }
 0x978   :  { %1704 = vrot.lane.b32.xlu2 %v1674_v14, %s3827_s25  ;;  %1708 = vrot.lane.b32.xlu1 %v4382_v21, %s3827_s25 }
 0x979   :  { %1692 = vrot.lane.b32.xlu0 %v4382_v21, %s3824_s0 }
 0x980   :  { %1706 = vrot.lane.b32.xlu2 %v4378_v15, %s3827_s25  ;;  %1712 = vrot.lane.b32.xlu1 %v1674_v14, %s3825_s23 }
 0x981   :  { %1696 = vrot.lane.b32.xlu0 %v1674_v14, %s3826_s24 }
 0x988   :  { %1710 = vrot.lane.b32.xlu1 %v1671_v55, %s3825_s23 }
 0x989   :  { %1702 = vrot.lane.b32.xlu0 %v1671_v55, %s3827_s25 }
 0x991   :  { %1698 = vrot.lane.b32.xlu0 %v4378_v15, %s3826_s24 }
 0x999   :  { %1700 = vrot.lane.b32.xlu0 %v4382_v21, %s3826_s24 }
 0x9b0   :  { %v1689_v59 = vpop.permute.xlu2 %1688 }
 0x9c0   :  { %v1687_v31 = vpop.permute.xlu1 %1686 }
 0x9c1   :  { %1780 = vrot.lane.b32.xlu2 %v1687_v31, %s3825_s23  ;;  %v3543_v32 = vpack.i.bf16 %v1687_v31, %v1689_v59 }
 0x9c8   :  { %v4406_v19 = vpop.permute.xlu1 %1694 }
 0x9c9   :  { %1782 = vrot.lane.b32.xlu2 %v1689_v59, %s3825_s23 }
 0x9ca   :  { %v1691_v1 = vpop.permute.xlu2 %1690 }
 0x9cb   :  { %1815 = vrot.lane.b32.xlu1 %v1691_v1, %s3825_s23 }
 0x9d2   :  { %v4402_v20 = vpop.permute.xlu2 %1704 }
 0x9d3   :  { %1922 = vrot.lane.b32.xlu1 %v4402_v20, %s3825_s23 }
 0x9da   :  { %v4428_v57 = vpop.permute.xlu2 %1706 }
 0x9ea   :  { %v4408_v23 = vpop.permute.xlu1 %1708 }
 0x9eb   :  { %v1693_v17 = vpop.permute.xlu0 %1692  ;;  %1957 = vrot.lane.b32.xlu1 %v4408_v23, %s3825_s23 }
 0x9ec   :  { %1817 = vrot.lane.b32.xlu0 %v1693_v17, %s3825_s23  ;;  %v3548_v60 = vpack.i.bf16 %v1691_v1, %v1693_v17 }
 0x9f2   :  { %v1713_v12 = vpop.permute.xlu1 %1712 }
 0x9f3   :  { %v4413_v25 = vpop.permute.xlu0 %1696  ;;  %3408 = vmatpush.xpose.msk.msrb.mxu0 %vm190_vm6, %v1713_v12 }
 0x9f4   :  { %1850 = vrot.lane.b32.xlu0 %v4406_v19, %s3825_s23  ;;  %1852 = vrot.lane.b32.xlu2 %v4413_v25, %s3825_s23 }
 0x9fa   :  { %v1711_v28 = vpop.permute.xlu1 %1710 }
 0x9fb   :  { %v4420_v34 = vpop.permute.xlu0 %1702  ;;  %3409 = vmatpush.xpose.msk.msrb.mxu0 %vm190_vm6, %v1711_v28 }
 0x9fc   :  { %1747 = vrot.lane.b32.xlu2 %v4382_v21, %s3825_s23  ;;  %1920 = vrot.lane.b32.xlu0 %v4420_v34, %s3825_s23 }
 0x9fe   :  { %3410 = vmatmul.msk.f32.vlgmr.msrb.gmra.mxu0 %vm190_vm6, %v1671_v55 }
 0xa03   :  { %v4430_v48 = vpop.permute.xlu0 %1698 }
 0xa04   :  { %1745 = vrot.lane.b32.xlu2 %v4378_v15, %s3825_s23  ;;  %1955 = vrot.lane.b32.xlu0 %v4428_v57, %s3825_s23 }
 0xa06   :  { %3411 = vmatmul.msk.f32.gmra.mxu0 %vm190_vm6, %v1674_v14 }
 0xa0b   :  { %v4437_v39 = vpop.permute.xlu0 %1700 }
 0xa0c   :  { %3544 = vrot.lane.b32.xlu0 %v3543_v32, %s3828_s26  ;;  %1885 = vrot.lane.b32.xlu2 %v4430_v48, %s3825_s23 }
 0xa0d   :  { %1887 = vrot.lane.b32.xlu1 %v4437_v39, %s3825_s23 }
 0xa14   :  { %3549 = vrot.lane.b32.xlu2 %v3548_v60, %s3828_s26 }
 0xa15   :  { %3539 = vrot.lane.b32.xlu1 %v3538_v54, %s3828_s26 }
 0xa1b   :  { %v1781_v58 = vpop.permute.xlu2 %1780 }
 0xa23   :  { %v1783_v47 = vpop.permute.xlu2 %1782 }
 0xa24   :  { %3416 = vmatpush.xpose.msk.msrb.mxu1 %vm190_vm6, %v1783_v47 }
 0xa28   :  { %3417 = vmatpush.xpose.msk.msrb.mxu1 %vm190_vm6, %v1781_v58 }
 0xa2b   :  { %3418 = vmatmul.msk.f32.vlgmr.msrb.gmra.mxu1 %vm190_vm6, %v1687_v31 }
 0xa33   :  { %3419 = vmatmul.msk.f32.gmra.mxu1 %vm190_vm6, %v1689_v59 }
 0xa3d   :  { %v1816_v44 = vpop.permute.xlu1 %1815 }
 0xa45   :  { %v1923_v11 = vpop.permute.xlu1 %1922 }
 0xa46   :  { %3432 = vmatpush.xpose.msk.msra.mxu1 %vm190_vm6, %v1923_v11 }
 0xa4e   :  { %v1853_v46 = vpop.permute.xlu2 %1852 }
 0xa4f   :  { %3424 = vmatpush.xpose.msk.msrb.mxu3 %vm190_vm6, %v1853_v46 }
 0xa56   :  { %v1748_v22 = vpop.permute.xlu2 %1747 }
 0xa57   :  { %3412 = vmatpush.xpose.msk.msra.mxu0 %vm190_vm6, %v1748_v22 }
 0xa5d   :  { %v1958_v5 = vpop.permute.xlu1 %1957 }
 0xa5e   :  { %v1746_v45 = vpop.permute.xlu2 %1745  ;;  %v1818_v26 = vpop.permute.xlu0 %1817 }
 0xa5f   :  { %3413 = vmatpush.xpose.msk.msra.mxu0 %vm190_vm6, %v1746_v45  ;;  %3420 = vmatpush.xpose.msk.msra.mxu2 %vm190_vm6, %v1818_v26 }
 0xa62   :  { %3414 = vmatmul.msk.f32.vlgmr.msra.gmra.mxu0 %vm190_vm6, %v4378_v15 }
 0xa63   :  { %3421 = vmatpush.xpose.msk.msra.mxu2 %vm190_vm6, %v1816_v44 }
 0xa66   :  { %3422 = vmatmul.msk.f32.vlgmr.msra.gmra.mxu2 %vm190_vm6, %v1691_v1  ;;  %v1851_v18 = vpop.permute.xlu0 %1850  ;;  %v1886_v62 = vpop.permute.xlu2 %1885 }
 0xa67   :  { %3436 = vmatpush.xpose.msk.msrb.mxu2 %vm190_vm6, %v1958_v5  ;;  %3425 = vmatpush.xpose.msk.msrb.mxu3 %vm190_vm6, %v1851_v18 }
 0xa6a   :  { %3415 = vmatmul.msk.f32.gmra.mxu0 %vm190_vm6, %v4382_v21  ;;  %3426 = vmatmul.msk.f32.vlgmr.msrb.gmra.mxu3 %vm190_vm6, %v4406_v19 }
 0xa6e   :  { %3423 = vmatmul.msk.f32.gmra.mxu2 %vm190_vm6, %v1693_v17  ;;  %v1921_v0 = vpop.permute.xlu0 %1920  ;;  %v3550_v49 = vpop.permute.xlu2 %3549 }
 0xa6f   :  { %3433 = vmatpush.xpose.msk.msra.mxu1 %vm190_vm6, %v1921_v0  ;;  %v3551_v43 = vunpack.i.l.bf16 %v3550_v49  ;;  %v3552_v3 = vunpack.i.h.bf16 %v3550_v49 }
 0xa72   :  { %3427 = vmatmul.msk.f32.gmra.mxu3 %vm190_vm6, %v4413_v25  ;;  %3434 = vmatmul.msk.f32.vlgmr.msra.gmra.mxu1 %vm190_vm6, %v4420_v34 }
 0xa76   :  { %v1956_v2 = vpop.permute.xlu0 %1955 }
 0xa77   :  { %3437 = vmatpush.xpose.msk.msrb.mxu2 %vm190_vm6, %v1956_v2 }
 0xa7a   :  { %3435 = vmatmul.msk.f32.gmra.mxu1 %vm190_vm6, %v4402_v20  ;;  %3438 = vmatmul.msk.f32.vlgmr.msrb.gmra.mxu2 %vm190_vm6, %v4428_v57 }
 0xa7b   :  { %2505 = vmatpush.msra.mxu2 %v3551_v43  ;;  %v1739_v6 = vpop.f32.mrf.mxu0 }
 0xa7c   :  { %v1990_v33 = vsel %vm467_vm7, %v1739_v6, -inf }
 0xa7d   :  { %2506 = vmatpush.msra.mxu2 %v3552_v3  ;;  %1991 = vmax.xlane.f32.xlu0 %v1990_v33 }
 0xa7e   :  { %v3545_v4 = vpop.permute.xlu0 %3544 }
 0xa7f   :  { %v1888_v40 = vpop.permute.xlu1 %1887  ;;  %v3546_v38 = vunpack.i.l.bf16 %v3545_v4  ;;  %v3547_v51 = vunpack.i.h.bf16 %v3545_v4 }
 0xa80   :  { %3428 = vmatpush.xpose.msk.msrb.mxu0 %vm190_vm6, %v1888_v40 }
 0xa81   :  { %2470 = vmatpush.msrb.mxu1 %v3546_v38 }
 0xa82   :  { %3439 = vmatmul.msk.f32.gmra.mxu2 %vm190_vm6, %v4408_v23 }
 0xa83   :  { %2471 = vmatpush.msrb.mxu1 %v3547_v51  ;;  %v1742_v27 = vpop.f32.mrf.mxu0 }
 0xa84   :  { %3429 = vmatpush.xpose.msk.msrb.mxu0 %vm190_vm6, %v1886_v62  ;;  %v1993_v8 = vsel %vm467_vm7, %v1742_v27, -inf }
 0xa85   :  { %1994 = vmax.xlane.f32.xlu2 %v1993_v8 }
 0xa87   :  { %3430 = vmatmul.msk.f32.vlgmr.msrb.gmra.mxu0 %vm190_vm6, %v4430_v48  ;;  %v3540_v53 = vpop.permute.xlu1 %3539 }
 0xa88   :  { %v3541_v41 = vunpack.i.l.bf16 %v3540_v53  ;;  %v3542_v50 = vunpack.i.h.bf16 %v3540_v53 }
 0xa8a   :  { %2400 = vmatpush.msra.mxu3 %v3541_v41 }
 0xa8c   :  { %2401 = vmatpush.msra.mxu3 %v3542_v50 }
 0xa8f   :  { %3431 = vmatmul.msk.f32.gmra.mxu0 %vm190_vm6, %v4437_v39 }
 0xaa8   :  { %v4486_v56 = vpop.f32.mrf.mxu1 }
 0xaa9   :  { %v2002_v13 = vsel %vm467_vm7, %v4486_v56, -inf }
 0xaaa   :  { %2003 = vmax.xlane.f32.xlu1 %v2002_v13 }
 0xab0   :  { %v4492_v10 = vpop.f32.mrf.mxu1 }
 0xab1   :  { %v2005_v24 = vsel %vm467_vm7, %v4492_v10, -inf }
 0xadf   :  { %v1774_v9 = vpop.f32.mrf.mxu0 }
 0xae0   :  { %v1996_v36 = vsel %vm467_vm7, %v1774_v9, -inf }
 0xae1   :  { %1997 = vmax.xlane.f32.xlu2 %v1996_v36 }
 0xae7   :  { %v1777_v61 = vpop.f32.mrf.mxu0 }
 0xae8   :  { %v1999_v37 = vsel %vm467_vm7, %v1777_v61, -inf }
 0xae9   :  { %2000 = vmax.xlane.f32.xlu0 %v1999_v37  ;;  %v4505_v60 = vpop.f32.mrf.mxu2 }
 0xaea   :  { %v2008_v44 = vsel %vm467_vm7, %v4505_v60, -inf }
 0xaed   :  { %v1879_v42 = vpop.f32.mrf.mxu3 }
 0xaee   :  { %v2014_v55 = vsel %vm467_vm7, %v1879_v42, -inf }
 0xaef   :  { %2015 = vmax.xlane.f32.xlu2 %v2014_v55  ;;  %v4507_v54 = vpop.f32.mrf.mxu1 }
 0xaf0   :  { %v1992_v14 = vpop.xlane.xlu0 %1991  ;;  %v2026_v58 = vsel %vm467_vm7, %v4507_v54, -inf }
 0xaf1   :  { %2006 = vmax.xlane.f32.xlu0 %v2005_v24  ;;  %v2038_v63 = vsub.f32 %v1739_v6, %v1992_v14  ;;  %v4519_v22 = vpop.f32.mrf.mxu2 }
 0xaf2   :  { %v2011_v49 = vsel %vm467_vm7, %v4519_v22, -inf }
 0xaf3   :  { %v2054_v7 = vmul.f32 1.442695, %v2038_v63 }
 0xaf5   :  { %3679 = vpow2.f32 %v2054_v7  ;;  %v4497_v31 = vpop.f32.mrf.mxu3 }
 0xaf6   :  { %v2017_v1 = vsel %vm467_vm7, %v4497_v31, -inf }
 0xaf7   :  { %v4523_v26 = vpop.f32.mrf.mxu1 }
 0xaf8   :  { %v1995_v59 = vpop.xlane.xlu2 %1994  ;;  %v2029_v5 = vsel %vm467_vm7, %v4523_v26, -inf }
 0xaf9   :  { %v2039_v17 = vsub.f32 %v1742_v27, %v1995_v59  ;;  %2018 = vmax.xlane.f32.xlu0 %v2017_v1 }
 0xafb   :  { %v4501_v12 = vpop.eup %3679  ;;  %v2056_v28 = vmul.f32 1.442695, %v2039_v17 }
 0xafc   :  { %v2086_v32 = vsel %vm467_vm7, %v4501_v12, 0.0 }
 0xafd   :  { %2087 = vadd.xlane.f32.xlu1 %v2086_v32  ;;  %3681 = vpow2.f32 %v2056_v28  ;;  %v4529_v62 = vpop.f32.mrf.mxu2 }
 0xafe   :  { %v2032_v1 = vsel %vm467_vm7, %v4529_v62, -inf }
 0xb01   :  { %2027 = vmax.xlane.f32.xlu0 %v2026_v58 }
 0xb03   :  { %v4515_v11 = vpop.eup %3681 }
 0xb04   :  { %v4511_v47 = vpop.f32.mrf.mxu0  ;;  %v2089_v45 = vsel %vm467_vm7, %v4515_v11, 0.0 }
 0xb05   :  { %v2020_v46 = vsel %vm467_vm7, %v4511_v47, -inf  ;;  %2009 = vmax.xlane.f32.xlu1 %v2008_v44  ;;  %v4535_v43 = vpop.f32.mrf.mxu2 }
 0xb06   :  { %2021 = vmax.xlane.f32.xlu2 %v2020_v46  ;;  %v2035_v2 = vsel %vm467_vm7, %v4535_v43, -inf }
 0xb09   :  { %2090 = vadd.xlane.f32.xlu0 %v2089_v45 }
 0xb0c   :  { %v4527_v18 = vpop.f32.mrf.mxu0 }
 0xb0d   :  { %2030 = vmax.xlane.f32.xlu1 %v2029_v5  ;;  %v2023_v0 = vsel %vm467_vm7, %v4527_v18, -inf }
 0xb11   :  { %2024 = vmax.xlane.f32.xlu0 %v2023_v0 }
 0xb15   :  { %2012 = vmax.xlane.f32.xlu1 %v2011_v49 }
 0xb1d   :  { %2036 = vmax.xlane.f32.xlu1 %v2035_v2  ;;  %v2004_v41 = vpop.xlane.xlu1 %2003 }
 0xb1e   :  { %v2042_v37 = vsub.f32 %v4486_v56, %v2004_v41 }
 0xb20   :  { %v2062_v24 = vmul.f32 1.442695, %v2042_v37 }
 0xb54   :  { %v1998_v3 = vpop.xlane.xlu2 %1997 }
 0xb55   :  { %v2040_v6 = vsub.f32 %v1774_v9, %v1998_v3 }
 0xb57   :  { %v2058_v33 = vmul.f32 1.442695, %v2040_v6 }
 0xb59   :  { %3683 = vpow2.f32 %v2058_v33 }
 0xb5c   :  { %v2001_v4 = vpop.xlane.xlu0 %2000 }
 0xb5d   :  { %v2041_v40 = vsub.f32 %v1777_v61, %v2001_v4 }
 0xb5f   :  { %v4539_v38 = vpop.eup %3683  ;;  %v2060_v51 = vmul.f32 1.442695, %v2041_v40 }
 0xb60   :  { %v2092_v27 = vsel %vm467_vm7, %v4539_v38, 0.0 }
 0xb61   :  { %3685 = vpow2.f32 %v2060_v51  ;;  %2093 = vadd.xlane.f32.xlu2 %v2092_v27 }
 0xb62   :  { %v2016_v8 = vpop.xlane.xlu2 %2015 }
 0xb63   :  { %v2046_v53 = vsub.f32 %v1879_v42, %v2016_v8 }
 0xb64   :  { %v2007_v50 = vpop.xlane.xlu0 %2006 }
 0xb65   :  { %v2070_v13 = vmul.f32 1.442695, %v2046_v53  ;;  %v2043_v36 = vsub.f32 %v4492_v10, %v2007_v50 }
 0xb67   :  { %v4544_v9 = vpop.eup %3685  ;;  %3687 = vpow2.f32 %v2070_v13  ;;  %v2064_v61 = vmul.f32 1.442695, %v2043_v36 }
 0xb68   :  { %v2095_v55 = vsel %vm467_vm7, %v4544_v9, 0.0 }
 0xb69   :  { %3689 = vpow2.f32 %v2064_v61  ;;  %2096 = vadd.xlane.f32.xlu2 %v2095_v55 }
 0xb6a   :  { %3691 = vpow2.f32 %v2062_v24 }
 0xb6c   :  { %v2019_v14 = vpop.xlane.xlu0 %2018 }
 0xb6d   :  { %v4549_v63 = vpop.eup %3687  ;;  %v2047_v42 = vsub.f32 %v4497_v31, %v2019_v14 }
 0xb6e   :  { %v2110_v10 = vsel %vm467_vm7, %v4549_v63, 0.0 }
 0xb6f   :  { %v4554_v7 = vpop.eup %3689  ;;  %v2072_v56 = vmul.f32 1.442695, %v2047_v42  ;;  %2111 = vadd.xlane.f32.xlu0 %v2110_v10 }
 0xb70   :  { %v2088_v59 = vpop.xlane.xlu1 %2087  ;;  %v2101_v17 = vsel %vm467_vm7, %v4554_v7, 0.0  ;;  %v4560_v28 = vpop.eup %3691 }
 0xb71   :  { %3693 = vpow2.f32 %v2072_v56  ;;  %2033 = vmax.xlane.f32.xlu2 %v2032_v1  ;;  %2102 = vadd.xlane.f32.xlu1 %v2101_v17  ;;  %v2098_v5 = vsel %vm467_vm7, %v4560_v28, 0.0  ;;  %v2143_v40 = vand.u32 2147483647, %v2088_v59  ;;  %vm2139_vm14 = vweird.f32 %v2088_v59 }
 0xb72   :  { %3695 = vrcp.f32 %v2088_v59 }
 0xb73   :  { %vm2144_vm1 = vcmp.eq.f32.partialorder %v2143_v40, 8.507059e+37 }
 0xb74   :  { %v2028_v31 = vpop.xlane.xlu0 %2027 }
 0xb75   :  { %v2050_v32 = vsub.f32 %v4507_v54, %v2028_v31  ;;  %v2145_v54 = vand.u32 2147483648, %v2088_v59 }
 0xb77   :  { %v4563_v58 = vpop.eup %3693  ;;  %v2078_v44 = vmul.f32 1.442695, %v2050_v32  ;;  %v2146_v8 = vor.u32 1.1754944e-38, %v2145_v54 }
 0xb78   :  { %v3696_v46 = vpop.eup %3695  ;;  %v2010_v45 = vpop.xlane.xlu1 %2009  ;;  %v2113_v0 = vsel %vm467_vm7, %v4563_v58, 0.0 }
 0xb79   :  { %v2135_v49 = vmul.f32 %v3696_v46, %v2088_v59  ;;  %3697 = vpow2.f32 %v2078_v44  ;;  %v2044_v2 = vsub.f32 %v4505_v60, %v2010_v45  ;;  %2099 = vadd.xlane.f32.xlu2 %v2098_v5  ;;  %2114 = vadd.xlane.f32.xlu1 %v2113_v0  ;;  %vm2140_vm13 = vweird.f32 %v3696_v46 }
 0xb7a   :  { %vm2141_vm15 = vmor %vm2139_vm14, %vm2140_vm13 }
 0xb7b   :  { %v2136_v3 = vsub.f32 1.0, %v2135_v49  ;;  %v2066_v6 = vmul.f32 1.442695, %v2044_v2  ;;  %v3558_v2 = vpack.i.bf16 %v4420_v34, %v4402_v20 }
 0xb7c   :  { %v2091_v33 = vpop.xlane.xlu0 %2090 }
 0xb7d   :  { %v2137_v4 = vmul.f32 %v3696_v46, %v2136_v3  ;;  %3699 = vpow2.f32 %v2066_v6  ;;  %v2160_v56 = vand.u32 2147483648, %v2091_v33  ;;  %v2158_v1 = vand.u32 2147483647, %v2091_v33  ;;  %v2022_v3 = vpop.xlane.xlu2 %2021 }
 0xb7e   :  { %3701 = vrcp.f32 %v2091_v33  ;;  %vm2154_vm3 = vweird.f32 %v2091_v33 }
 0xb7f   :  { %v4570_v51 = vpop.eup %3697  ;;  %v2138_v27 = vadd.f32 %v3696_v46, %v2137_v4  ;;  %v2161_v44 = vor.u32 1.1754944e-38, %v2160_v56  ;;  %vm2159_vm8 = vcmp.eq.f32.partialorder %v2158_v1, 8.507059e+37 }
 0xb80   :  { %v2031_v53 = vpop.xlane.xlu1 %2030  ;;  %v2122_v60 = vsel %vm467_vm7, %v4570_v51, 0.0 }
 0xb81   :  { %v2142_v41 = vsel %vm2141_vm15, %v3696_v46, %v2138_v27  ;;  %v2051_v50 = vsub.f32 %v4523_v26, %v2031_v53  ;;  %2123 = vadd.xlane.f32.xlu2 %v2122_v60 }
 0xb82   :  { %v2147_v13 = vsel %vm2144_vm1, %v2146_v8, %v2142_v41 }
 0xb83   :  { %v2080_v36 = vmul.f32 1.442695, %v2051_v50  ;;  %v2148_v37 = vmul.f32 %v4501_v12, %v2147_v13  ;;  %v4576_v61 = vpop.eup %3699 }
 0xb84   :  { %v3702_v55 = vpop.eup %3701  ;;  %v2104_v10 = vsel %vm467_vm7, %v4576_v61, 0.0  ;;  %v2025_v40 = vpop.xlane.xlu0 %2024 }
 0xb85   :  { %3703 = vpow2.f32 %v2080_v36  ;;  %3440 = vmatmul.msk.f32.vlgmr.msra.gmra.mxu3 %vm467_vm7, %v2148_v37  ;;  %v2150_v24 = vmul.f32 %v3702_v55, %v2091_v33  ;;  %vm2155_vm2 = vweird.f32 %v3702_v55  ;;  %v2049_v20 = vsub.f32 %v4527_v18, %v2025_v40 }
 0xb86   :  { %vm2156_vm4 = vmor %vm2154_vm3, %vm2155_vm2 }
 0xb87   :  { %v2151_v14 = vsub.f32 1.0, %v2150_v24  ;;  %v2076_v34 = vmul.f32 1.442695, %v2049_v20 }
 0xb88   :  { %v2013_v42 = vpop.xlane.xlu1 %2012 }
 0xb89   :  { %v2045_v26 = vsub.f32 %v4519_v22, %v2013_v42  ;;  %2105 = vadd.xlane.f32.xlu2 %v2104_v10  ;;  %v2152_v59 = vmul.f32 %v3702_v55, %v2151_v14  ;;  %v3553_v22 = vpack.i.bf16 %v4406_v19, %v4413_v25  ;;  %v2048_v19 = vsub.f32 %v4511_v47, %v2022_v3 }
 0xb8b   :  { %v4582_v12 = vpop.eup %3703  ;;  %v2068_v17 = vmul.f32 1.442695, %v2045_v26  ;;  %v2153_v32 = vadd.f32 %v3702_v55, %v2152_v59  ;;  %v2074_v25 = vmul.f32 1.442695, %v2048_v19 }
 0xb8c   :  { %v2125_v31 = vsel %vm467_vm7, %v4582_v12, 0.0 }
 0xb8d   :  { %3705 = vpow2.f32 %v2068_v17  ;;  %2126 = vadd.xlane.f32.xlu0 %v2125_v31  ;;  %v2157_v46 = vsel %vm2156_vm4, %v3702_v55, %v2153_v32 }
 0xb8e   :  { %v2162_v45 = vsel %vm2159_vm8, %v2161_v44, %v2157_v46  ;;  %3707 = vpow2.f32 %v2074_v25 }
 0xb8f   :  { %v2163_v5 = vmul.f32 %v4515_v11, %v2162_v45 }
 0xb90   :  { %v2037_v11 = vpop.xlane.xlu1 %2036 }
 0xb91   :  { %3441 = vmatmul.msk.f32.gmra.mxu3 %vm467_vm7, %v2163_v5  ;;  %v2053_v54 = vsub.f32 %v4535_v43, %v2037_v11 }
 0xb92   :  { %3554 = vrot.lane.b32.xlu1 %v3553_v22, %s3828_s26 }
 0xb93   :  { %v4591_v0 = vpop.eup %3705  ;;  %v2084_v4 = vmul.f32 1.442695, %v2053_v54 }
 0xb94   :  { %v2107_v49 = vsel %vm467_vm7, %v4591_v0, 0.0  ;;  %v4599_v6 = vpop.eup %3707 }
 0xb95   :  { %2108 = vadd.xlane.f32.xlu2 %v2107_v49  ;;  %v2116_v33 = vsel %vm467_vm7, %v4599_v6, 0.0  ;;  %3709 = vpow2.f32 %v2084_v4 }
 0xb96   :  { %3711 = vpow2.f32 %v2076_v34 }
 0xb9b   :  { %v4605_v27 = vpop.eup %3709 }
 0xb9c   :  { %v2131_v47 = vsel %vm467_vm7, %v4605_v27, 0.0  ;;  %v4609_v8 = vpop.eup %3711 }
 0xb9d   :  { %v2119_v43 = vsel %vm467_vm7, %v4609_v8, 0.0 }
 0xba1   :  { %3559 = vrot.lane.b32.xlu0 %v3558_v2, %s3828_s26 }
 0xbbc   :  { %2117 = vadd.xlane.f32.xlu1 %v2116_v33 }
 0xbcb   :  { %2132 = vadd.xlane.f32.xlu0 %v2131_v47 }
 0xbd3   :  { %2120 = vadd.xlane.f32.xlu0 %v2119_v43 }
 0xbd4   :  { %v4613_v53 = vpop.xlane.xlu2 %2093 }
 0xbdc   :  { %v4615_v60 = vpop.xlane.xlu2 %2096 }
 0xbe2   :  { %v4619_v50 = vpop.xlane.xlu0 %2111 }
 0xbe3   :  { %v2265_v19 = vand.u32 2147483648, %v4619_v50  ;;  %vm2259_vm1 = vweird.f32 %v4619_v50 }
 0xbe4   :  { %v2034_v18 = vpop.xlane.xlu2 %2033  ;;  %v4617_v41 = vpop.xlane.xlu1 %2102 }
 0xbe5   :  { %v2052_v13 = vsub.f32 %v4529_v62, %v2034_v18  ;;  %3713 = vrcp.f32 %v4617_v41  ;;  %v2220_v25 = vand.u32 2147483648, %v4617_v41  ;;  %vm2214_vm15 = vweird.f32 %v4617_v41 }
 0xbe6   :  { %3715 = vrcp.f32 %v4619_v50  ;;  %v2218_v18 = vand.u32 2147483647, %v4617_v41 }
 0xbe7   :  { %v2082_v36 = vmul.f32 1.442695, %v2052_v13  ;;  %v2263_v13 = vand.u32 2147483647, %v4619_v50 }
 0xbe8   :  { %vm2219_vm4 = vcmp.eq.f32.partialorder %v2218_v18, 8.507059e+37 }
 0xbe9   :  { %3717 = vpow2.f32 %v2082_v36  ;;  %vm2264_vm8 = vcmp.eq.f32.partialorder %v2263_v13, 8.507059e+37 }
 0xbeb   :  { %v4624_v55 = vpop.eup %3713 }
 0xbec   :  { %v2100_v37 = vpop.xlane.xlu2 %2099  ;;  %v3716_v24 = vpop.eup %3715  ;;  %v2210_v10 = vmul.f32 %v4624_v55, %v4617_v41  ;;  %vm2215_vm13 = vweird.f32 %v4624_v55 }
 0xbed   :  { %3719 = vrcp.f32 %v2100_v37  ;;  %v4626_v14 = vpop.xlane.xlu1 %2114  ;;  %v2255_v56 = vmul.f32 %v3716_v24, %v4619_v50  ;;  %v2205_v46 = vand.u32 2147483648, %v2100_v37  ;;  %v2203_v5 = vand.u32 2147483647, %v2100_v37  ;;  %vm2216_vm2 = vmor %vm2214_vm15, %vm2215_vm13 }
 0xbee   :  { %3721 = vrcp.f32 %v4626_v14  ;;  %v2211_v59 = vsub.f32 1.0, %v2210_v10  ;;  %vm2199_vm10 = vweird.f32 %v2100_v37  ;;  %vm2260_vm14 = vweird.f32 %v3716_v24 }
 0xbef   :  { %v4628_v42 = vpop.eup %3717  ;;  %v2256_v31 = vsub.f32 1.0, %v2255_v56  ;;  %v2206_v11 = vor.u32 1.1754944e-38, %v2205_v46  ;;  %vm2204_vm12 = vcmp.eq.f32.partialorder %v2203_v5, 8.507059e+37  ;;  %vm2261_vm3 = vmor %vm2259_vm1, %vm2260_vm14  ;;  %v2221_v56 = vor.u32 1.1754944e-38, %v2220_v25 }
 0xbf0   :  { %v2128_v62 = vsel %vm467_vm7, %v4628_v42, 0.0  ;;  %v2212_v45 = vmul.f32 %v4624_v55, %v2211_v59  ;;  %v3563_v46 = vpack.i.bf16 %v4378_v15, %v4382_v21  ;;  %v2278_v25 = vand.u32 2147483647, %v4626_v14 }
 0xbf1   :  { %2129 = vadd.xlane.f32.xlu2 %v2128_v62  ;;  %v2257_v49 = vmul.f32 %v3716_v24, %v2256_v31 }
 0xbf2   :  { %v2213_v4 = vadd.f32 %v4624_v55, %v2212_v45  ;;  %vm2279_vm15 = vcmp.eq.f32.partialorder %v2278_v25, 8.507059e+37 }
 0xbf3   :  { %v3720_v26 = vpop.eup %3719  ;;  %v2258_v20 = vadd.f32 %v3716_v24, %v2257_v49 }
 0xbf4   :  { %v2195_v1 = vmul.f32 %v3720_v26, %v2100_v37  ;;  %v4636_v17 = vpop.xlane.xlu2 %2123  ;;  %v4638_v44 = vpop.eup %3721  ;;  %vm2200_vm9 = vweird.f32 %v3720_v26  ;;  %v2217_v10 = vsel %vm2216_vm2, %v4624_v55, %v2213_v4  ;;  %v2280_v55 = vand.u32 2147483648, %v4626_v14 }
 0xbf5   :  { %3723 = vrcp.f32 %v4636_v17  ;;  %v2270_v3 = vmul.f32 %v4638_v44, %v4626_v14  ;;  %vm2201_vm11 = vmor %vm2199_vm10, %vm2200_vm9  ;;  %v2262_v62 = vsel %vm2261_vm3, %v3716_v24, %v2258_v20  ;;  %vm2274_vm9 = vweird.f32 %v4626_v14 }
 0xbf6   :  { %v2196_v32 = vsub.f32 1.0, %v2195_v1  ;;  %vm2275_vm10 = vweird.f32 %v4638_v44  ;;  %vm2319_vm3 = vweird.f32 %v4636_v17 }
 0xbf7   :  { %v2271_v47 = vsub.f32 1.0, %v2270_v3 }
 0xbf8   :  { %v2197_v22 = vmul.f32 %v3720_v26, %v2196_v32 }
 0xbf9   :  { %v2272_v41 = vmul.f32 %v4638_v44, %v2271_v47  ;;  %v2281_v47 = vor.u32 1.1754944e-38, %v2280_v55  ;;  %v3573_v55 = vpack.i.bf16 %v4430_v48, %v4437_v39 }
 0xbfa   :  { %v2198_v2 = vadd.f32 %v3720_v26, %v2197_v22 }
 0xbfb   :  { %v4650_v40 = vpop.eup %3723  ;;  %v2273_v5 = vadd.f32 %v4638_v44, %v2272_v41 }
 0xbfc   :  { %v2202_v54 = vsel %vm2201_vm11, %v3720_v26, %v2198_v2  ;;  %v4646_v33 = vpop.xlane.xlu2 %2105  ;;  %v2315_v36 = vmul.f32 %v4650_v40, %v4636_v17  ;;  %v2222_v26 = vsel %vm2219_vm4, %v2221_v56, %v2217_v10  ;;  %vm2320_vm1 = vweird.f32 %v4650_v40 }
 0xbfd   :  { %v2207_v34 = vsel %vm2204_vm12, %v2206_v11, %v2202_v54  ;;  %3725 = vrcp.f32 %v4646_v33  ;;  %v2223_v22 = vmul.f32 %v4554_v7, %v2222_v26  ;;  %v2235_v2 = vand.u32 2147483648, %v4646_v33  ;;  %v2655_v54 = vld [vmem:[#allocation2 + $0x158] sm:$0xff]  ;;  %vm4689_vm12 = vmor %vm2274_vm9, %vm2275_vm10 }
 0xbfe   :  { %v2208_v43 = vmul.f32 %v4560_v28, %v2207_v34  ;;  %v2266_v28 = vor.u32 1.1754944e-38, %v2265_v19  ;;  %v2316_v1 = vsub.f32 1.0, %v2315_v36  ;;  %v2233_v21 = vand.u32 2147483647, %v4646_v33  ;;  %vm2321_vm4 = vmor %vm2319_vm3, %vm2320_vm1 }
 0xbff   :  { %vm2229_vm13 = vweird.f32 %v4646_v33  ;;  %v2277_v34 = vsel %vm4689_vm12, %v4638_v44, %v2273_v5  ;;  %v2323_v44 = vand.u32 2147483647, %v4636_v17  ;;  %vm2169_vm3 = vweird.f32 %v4613_v53 }
 0xc00   :  { %3444 = vmatmul.msk.f32.vlgmr.msrb.gmra.mxu1 %vm467_vm7, %v2208_v43  ;;  %v4661_v37 = vpop.xlane.xlu0 %2126  ;;  %v2267_v59 = vsel %vm2264_vm8, %v2266_v28, %v2262_v62  ;;  %v2317_v11 = vmul.f32 %v4650_v40, %v2316_v1  ;;  %v2236_v43 = vor.u32 1.1754944e-38, %v2235_v2  ;;  %vm2234_vm2 = vcmp.eq.f32.partialorder %v2233_v21, 8.507059e+37 }
 0xc01   :  { %3727 = vrcp.f32 %v4661_v37  ;;  %v2268_v19 = vmul.f32 %v4549_v63, %v2267_v59  ;;  %v2282_v10 = vsel %vm2279_vm15, %v2281_v47, %v2277_v34  ;;  %v3568_v28 = vpack.i.bf16 %v4428_v57, %v4408_v23 }
 0xc02   :  { %v2318_v14 = vadd.f32 %v4650_v40, %v2317_v11  ;;  %v2283_v26 = vmul.f32 %v4563_v58, %v2282_v10  ;;  %vm2324_vm8 = vcmp.eq.f32.partialorder %v2323_v44, 8.507059e+37  ;;  %vm2334_vm12 = vweird.f32 %v4661_v37 }
 0xc03   :  { %v3726_v50 = vpop.eup %3725  ;;  %v2338_v2 = vand.u32 2147483647, %v4661_v37 }
 0xc04   :  { %v2225_v31 = vmul.f32 %v3726_v50, %v4646_v33  ;;  %v3555_v32 = vpop.permute.xlu1 %3554  ;;  %vm2230_vm11 = vweird.f32 %v3726_v50  ;;  %v2325_v33 = vand.u32 2147483648, %v4636_v17  ;;  %v2322_v41 = vsel %vm2321_vm4, %v4650_v40, %v2318_v14 }
 0xc05   :  { %v3556_v24 = vunpack.i.l.bf16 %v3555_v32  ;;  %v3557_v3 = vunpack.i.h.bf16 %v3555_v32  ;;  %vm2231_vm14 = vmor %vm2229_vm13, %vm2230_vm11  ;;  %vm2339_vm1 = vcmp.eq.f32.partialorder %v2338_v2, 8.507059e+37 }
 0xc06   :  { %v2226_v45 = vsub.f32 1.0, %v2225_v31  ;;  %v2326_v59 = vor.u32 1.1754944e-38, %v2325_v33 }
 0xc07   :  { %v4674_v49 = vpop.eup %3727  ;;  %2540 = vmatpush.msrb.mxu3 %v3556_v24  ;;  %v2340_v24 = vand.u32 2147483648, %v4661_v37 }
 0xc08   :  { %v2227_v15 = vmul.f32 %v3726_v50, %v2226_v45  ;;  %3445 = vmatmul.msk.f32.gmra.mxu1 %vm467_vm7, %v2223_v22  ;;  %v2109_v7 = vpop.xlane.xlu2 %2108  ;;  %v2330_v4 = vmul.f32 %v4674_v49, %v4661_v37  ;;  %vm2335_vm10 = vweird.f32 %v4674_v49  ;;  %v2403_v39 = vpop.f32.mrf.mxu3 }
 0xc09   :  { %2541 = vmatpush.msrb.mxu3 %v3557_v3  ;;  %3564 = vrot.lane.b32.xlu2 %v3563_v46, %s3828_s26  ;;  %3729 = vrcp.f32 %v2109_v7  ;;  %v2250_v31 = vand.u32 2147483648, %v2109_v7  ;;  %v2248_v40 = vand.u32 2147483647, %v2109_v7  ;;  %vm2244_vm11 = vweird.f32 %v2109_v7  ;;  %vm2336_vm15 = vmor %vm2334_vm12, %vm2335_vm10 }
 0xc0a   :  { %v2228_v20 = vadd.f32 %v3726_v50, %v2227_v15  ;;  %3448 = vmatmul.msk.f32.vlgmr.msrb.gmra.mxu3 %vm467_vm7, %v2268_v19  ;;  %v2331_v36 = vsub.f32 1.0, %v2330_v4  ;;  %v2341_v25 = vor.u32 1.1754944e-38, %v2340_v24  ;;  %3731 = vrcp.f32 %v4613_v53 }
 0xc0b   :  { %2683 = vmatpush.msra.mxu3 %v2655_v54  ;;  %v2251_v22 = vor.u32 1.1754944e-38, %v2250_v31  ;;  %3733 = vrcp.f32 %v4615_v60  ;;  %vm2184_vm10 = vweird.f32 %v4615_v60 }
 0xc0c   :  { %v2232_v18 = vsel %vm2231_vm14, %v3726_v50, %v2228_v20  ;;  %v2332_v1 = vmul.f32 %v4674_v49, %v2331_v36  ;;  %vm2249_vm14 = vcmp.eq.f32.partialorder %v2248_v40, 8.507059e+37  ;;  %v2173_v36 = vand.u32 2147483647, %v4613_v53 }
 0xc0d   :  { %v2237_v13 = vsel %vm2234_vm2, %v2236_v43, %v2232_v18 }
 0xc0e   :  { %v2238_v62 = vmul.f32 %v4576_v61, %v2237_v13  ;;  %v2327_v61 = vsel %vm2324_vm8, %v2326_v59, %v2322_v41  ;;  %v2333_v58 = vadd.f32 %v4674_v49, %v2332_v1  ;;  %v2175_v13 = vand.u32 2147483648, %v4613_v53 }
 0xc0f   :  { %v3730_v56 = vpop.eup %3729  ;;  %v2328_v5 = vmul.f32 %v4570_v51, %v2327_v61 }
 0xc10   :  { %v2240_v50 = vmul.f32 %v3730_v56, %v2109_v7  ;;  %3446 = vmatmul.msk.f32.vlgmr.msra.gmra.mxu2 %vm467_vm7, %v2238_v62  ;;  %vm2245_vm9 = vweird.f32 %v3730_v56  ;;  %v2337_v19 = vsel %vm2336_vm15, %v4674_v49, %v2333_v58  ;;  %v3732_v49 = vpop.eup %3731 }
 0xc11   :  { %3569 = vrot.lane.b32.xlu2 %v3568_v28, %s3828_s26  ;;  %vm2246_vm13 = vmor %vm2244_vm11, %vm2245_vm9  ;;  %v2342_v51 = vsel %vm2339_vm1, %v2341_v25, %v2337_v19  ;;  %v2165_v21 = vmul.f32 %v3732_v49, %v4613_v53  ;;  %v3734_v7 = vpop.eup %3733  ;;  %vm2170_vm2 = vweird.f32 %v3732_v49  ;;  %v2190_v53 = vand.u32 2147483648, %v4615_v60 }
 0xc12   :  { %v2241_v17 = vsub.f32 1.0, %v2240_v50  ;;  %3449 = vmatmul.msk.f32.gmra.mxu3 %vm467_vm7, %v2283_v26  ;;  %v2343_v37 = vmul.f32 %v4582_v12, %v2342_v51  ;;  %v2180_v12 = vmul.f32 %v3734_v7, %v4615_v60  ;;  %vm4749_vm4 = vmor %vm2169_vm3, %vm2170_vm2  ;;  %vm2185_vm8 = vweird.f32 %v3734_v7 }
 0xc13   :  { %v3560_v23 = vpop.permute.xlu0 %3559  ;;  %v2166_v4 = vsub.f32 1.0, %v2165_v21  ;;  %v2176_v50 = vor.u32 1.1754944e-38, %v2175_v13  ;;  %v2188_v26 = vand.u32 2147483647, %v4615_v60  ;;  %vm2174_vm9 = vcmp.eq.f32.partialorder %v2173_v36, 8.507059e+37  ;;  %vm4763_vm11 = vmor %vm2184_vm10, %vm2185_vm8 }
 0xc14   :  { %v2242_v57 = vmul.f32 %v3730_v56, %v2241_v17  ;;  %v3561_v32 = vunpack.i.l.bf16 %v3560_v23  ;;  %v3562_v45 = vunpack.i.h.bf16 %v3560_v23  ;;  %v2406_v15 = vpop.f32.mrf.mxu3  ;;  %v2181_v20 = vsub.f32 1.0, %v2180_v12 }
 0xc15   :  { %v2167_v63 = vmul.f32 %v3732_v49, %v2166_v4  ;;  %v2191_v24 = vor.u32 1.1754944e-38, %v2190_v53  ;;  %vm2189_vm12 = vcmp.eq.f32.partialorder %v2188_v26, 8.507059e+37 }
 0xc16   :  { %v2243_v46 = vadd.f32 %v3730_v56, %v2242_v57  ;;  %2610 = vmatpush.msra.mxu1 %v3561_v32  ;;  %v2182_v14 = vmul.f32 %v3734_v7, %v2181_v20  ;;  %v2748_v57 = vld [vmem:[#allocation2 + $0x168] sm:$0xff] }
 0xc17   :  { %v2168_v43 = vadd.f32 %v3732_v49, %v2167_v63 }
 0xc18   :  { %2611 = vmatpush.msra.mxu1 %v3562_v45  ;;  %v2247_v48 = vsel %vm2246_vm13, %v3730_v56, %v2243_v46  ;;  %v2183_v28 = vadd.f32 %v3734_v7, %v2182_v14  ;;  %v2794_v14 = vld [vmem:[#allocation2 + $0x170] sm:$0xff] }
 0xc19   :  { %3574 = vrot.lane.b32.xlu2 %v3573_v55, %s3828_s26  ;;  %3452 = vmatmul.msk.f32.vlgmr.msra.gmra.mxu1 %vm467_vm7, %v2328_v5  ;;  %v2252_v3 = vsel %vm2249_vm14, %v2251_v22, %v2247_v48  ;;  %v2172_v62 = vsel %vm4749_vm4, %v3732_v49, %v2168_v43 }
 0xc1a   :  { %3456 = vmatmul.msk.f32.vlgmr.msra.gmra.mxu3 %vm190_vm6, %v2403_v39  ;;  %v2253_v11 = vmul.f32 %v4591_v0, %v2252_v3  ;;  %v2177_v17 = vsel %vm2174_vm9, %v2176_v50, %v2172_v62  ;;  %v2187_v55 = vsel %vm4763_vm11, %v3734_v7, %v2183_v28  ;;  %2776 = vmatpush.msrb.mxu1 %v2748_v57 }
 0xc1b   :  { %v2178_v5 = vmul.f32 %v4539_v38, %v2177_v17  ;;  %v2192_v48 = vsel %vm2189_vm12, %v2191_v24, %v2187_v55 }
 0xc1c   :  { %3447 = vmatmul.msk.f32.gmra.mxu2 %vm467_vm7, %v2253_v11 }
 0xc21   :  { %3453 = vmatmul.msk.f32.gmra.mxu1 %vm467_vm7, %v2343_v37 }
 0xc22   :  { %3457 = vmatmul.msk.f32.gmra.mxu3 %vm190_vm6, %v2406_v15  ;;  %v2193_v15 = vmul.f32 %v4544_v9, %v2192_v48 }
 0xc2f   :  { %v4735_v54 = vpop.xlane.xlu1 %2117 }
 0xc30   :  { %3735 = vrcp.f32 %v4735_v54  ;;  %vm2289_vm4 = vweird.f32 %v4735_v54  ;;  %v2295_v4 = vand.u32 2147483648, %v4735_v54  ;;  %v2293_v9 = vand.u32 2147483647, %v4735_v54 }
 0xc32   :  { %vm2294_vm11 = vcmp.eq.f32.partialorder %v2293_v9, 8.507059e+37 }
 0xc36   :  { %v4740_v47 = vpop.eup %3735 }
 0xc37   :  { %v2285_v44 = vmul.f32 %v4740_v47, %v4735_v54  ;;  %vm2290_vm2 = vweird.f32 %v4740_v47 }
 0xc38   :  { %vm4785_vm8 = vmor %vm2289_vm4, %vm2290_vm2 }
 0xc39   :  { %v2286_v61 = vsub.f32 1.0, %v2285_v44 }
 0xc3b   :  { %v2287_v2 = vmul.f32 %v4740_v47, %v2286_v61 }
 0xc3d   :  { %v2288_v49 = vadd.f32 %v4740_v47, %v2287_v2 }
 0xc3e   :  { %v4733_v0 = vpop.xlane.xlu0 %2132 }
 0xc3f   :  { %3737 = vrcp.f32 %v4733_v0  ;;  %v2370_v12 = vand.u32 2147483648, %v4733_v0  ;;  %vm2364_vm9 = vweird.f32 %v4733_v0  ;;  %v2292_v36 = vsel %vm4785_vm8, %v4740_v47, %v2288_v49 }
 0xc41   :  { %v2371_v54 = vor.u32 1.1754944e-38, %v2370_v12 }
 0xc45   :  { %v4744_v33 = vpop.eup %3737 }
 0xc46   :  { %v4742_v18 = vpop.xlane.xlu0 %2120  ;;  %v2360_v56 = vmul.f32 %v4744_v33, %v4733_v0  ;;  %vm2365_vm3 = vweird.f32 %v4744_v33 }
 0xc47   :  { %vm4793_vm10 = vmor %vm2364_vm9, %vm2365_vm3  ;;  %v2308_v26 = vand.u32 2147483647, %v4742_v18 }
 0xc48   :  { %v2361_v40 = vsub.f32 1.0, %v2360_v56 }
 0xc4a   :  { %v2362_v39 = vmul.f32 %v4744_v33, %v2361_v40 }
 0xc4c   :  { %v2363_v21 = vadd.f32 %v4744_v33, %v2362_v39 }
 0xc64   :  { %v2130_v34 = vpop.xlane.xlu2 %2129 }
 0xc65   :  { %3739 = vrcp.f32 %v2130_v34  ;;  %v2355_v60 = vand.u32 2147483648, %v2130_v34  ;;  %v2353_v22 = vand.u32 2147483647, %v2130_v34  ;;  %vm2349_vm14 = vweird.f32 %v2130_v34 }
 0xc66   :  { %3741 = vrcp.f32 %v4742_v18 }
 0xc67   :  { %v2356_v25 = vor.u32 1.1754944e-38, %v2355_v60  ;;  %vm2354_vm1 = vcmp.eq.f32.partialorder %v2353_v22, 8.507059e+37 }
 0xc6b   :  { %v3740_v41 = vpop.eup %3739 }
 0xc6c   :  { %v2345_v59 = vmul.f32 %v3740_v41, %v2130_v34  ;;  %v3565_v1 = vpop.permute.xlu2 %3564  ;;  %v4769_v58 = vpop.eup %3741  ;;  %vm2350_vm13 = vweird.f32 %v3740_v41  ;;  %v2368_v34 = vand.u32 2147483647, %v4733_v0  ;;  %v2296_v0 = vor.u32 1.1754944e-38, %v2295_v4 }
 0xc6d   :  { %v3566_v31 = vunpack.i.l.bf16 %v3565_v1  ;;  %v3567_v46 = vunpack.i.h.bf16 %v3565_v1  ;;  %v2300_v3 = vmul.f32 %v4769_v58, %v4742_v18  ;;  %vm2351_vm15 = vmor %vm2349_vm14, %vm2350_vm13  ;;  %vm2305_vm13 = vweird.f32 %v4769_v58 }
 0xc6e   :  { %v2346_v32 = vsub.f32 1.0, %v2345_v59  ;;  %vm2369_vm12 = vcmp.eq.f32.partialorder %v2368_v34, 8.507059e+37  ;;  %v2297_v62 = vsel %vm2294_vm11, %v2296_v0, %v2292_v36  ;;  %vm2304_vm14 = vweird.f32 %v4742_v18  ;;  %v2702_v59 = vld [vmem:[#allocation2 + $0x160] sm:$0xff] }
 0xc6f   :  { %2435 = vmatpush.msra.mxu0 %v3566_v31  ;;  %v2301_v7 = vsub.f32 1.0, %v2300_v3 }
 0xc70   :  { %v2347_v45 = vmul.f32 %v3740_v41, %v2346_v32 }
 0xc71   :  { %2436 = vmatpush.msra.mxu0 %v3567_v46  ;;  %v2302_v10 = vmul.f32 %v4769_v58, %v2301_v7 }
 0xc72   :  { %v2348_v19 = vadd.f32 %v3740_v41, %v2347_v45  ;;  %3442 = vmatmul.msk.f32.vlgmr.msra.gmra.mxu0 %vm467_vm7, %v2178_v5  ;;  %v3587_v5 = vld [vmem:[#allocation2 + $0x178] ss:$0 sm:$0xff] }
 0xc73   :  { %v2303_v47 = vadd.f32 %v4769_v58, %v2302_v10 }
 0xc74   :  { %v2352_v11 = vsel %vm2351_vm15, %v3740_v41, %v2348_v19  ;;  %v3570_v51 = vpop.permute.xlu2 %3569  ;;  %v2310_v41 = vand.u32 2147483648, %v4742_v18  ;;  %vm2306_vm15 = vmor %vm2304_vm14, %vm2305_vm13 }
 0xc75   :  { %v2357_v38 = vsel %vm2354_vm1, %v2356_v25, %v2352_v11  ;;  %v3571_v37 = vunpack.i.l.bf16 %v3570_v51  ;;  %v3572_v63 = vunpack.i.h.bf16 %v3570_v51  ;;  %v2307_v1 = vsel %vm2306_vm15, %v4769_v58, %v2303_v47 }
 0xc76   :  { %v2358_v43 = vmul.f32 %v4628_v42, %v2357_v38  ;;  %v2367_v42 = vsel %vm4793_vm10, %v4744_v33, %v2363_v21  ;;  %v2298_v33 = vmul.f32 %v4599_v6, %v2297_v62  ;;  %v2311_v17 = vor.u32 1.1754944e-38, %v2310_v41 }
 0xc77   :  { %2645 = vmatpush.msrb.mxu2 %v3571_v37  ;;  %v2372_v28 = vsel %vm2369_vm12, %v2371_v54, %v2367_v42  ;;  %vm2309_vm1 = vcmp.eq.f32.partialorder %v2308_v26, 8.507059e+37 }
 0xc78   :  { %v2373_v53 = vmul.f32 %v4605_v27, %v2372_v28  ;;  %v2312_v31 = vsel %vm2309_vm1, %v2311_v17, %v2307_v1 }
 0xc79   :  { %2646 = vmatpush.msrb.mxu2 %v3572_v63  ;;  %v2313_v6 = vmul.f32 %v4609_v8, %v2312_v31 }
 0xc7a   :  { %3443 = vmatmul.msk.f32.gmra.mxu0 %vm467_vm7, %v2193_v15  ;;  %3454 = vmatmul.msk.f32.vlgmr.msrb.gmra.mxu2 %vm467_vm7, %v2358_v43 }
 0xc7b   :  { %2822 = vmatpush.msra.mxu2 %v2794_v14 }
 0xc7c   :  { %v3575_v44 = vpop.permute.xlu2 %3574 }
 0xc7d   :  { %v3576_v56 = vunpack.i.l.bf16 %v3575_v44  ;;  %v3577_v50 = vunpack.i.h.bf16 %v3575_v44  ;;  %v2473_v61 = vpop.f32.mrf.mxu1 }
 0xc7f   :  { %2575 = vmatpush.msrb.mxu0 %v3576_v56 }
 0xc81   :  { %2576 = vmatpush.msrb.mxu0 %v3577_v50 }
 0xc82   :  { %3450 = vmatmul.msk.f32.vlgmr.msrb.gmra.mxu0 %vm467_vm7, %v2298_v33  ;;  %3455 = vmatmul.msk.f32.gmra.mxu2 %vm467_vm7, %v2373_v53 }
 0xc83   :  { %2730 = vmatpush.msra.mxu0 %v2702_v59 }
 0xc85   :  { %v2476_v18 = vpop.f32.mrf.mxu1 }
 0xc8a   :  { %3451 = vmatmul.msk.f32.gmra.mxu0 %vm467_vm7, %v2313_v6 }
 0xc8d   :  { %v2543_v27 = vpop.f32.mrf.mxu3 }
 0xc8e   :  { %3464 = vmatmul.msk.f32.vlgmr.msrb.gmra.mxu1 %vm190_vm6, %v2543_v27 }
 0xc92   :  { %3460 = vmatmul.msk.f32.vlgmr.msra.gmra.mxu0 %vm190_vm6, %v2473_v61 }
 0xc93   :  { %v2508_v8 = vpop.f32.mrf.mxu2 }
 0xc95   :  { %v2546_v23 = vpop.f32.mrf.mxu3 }
 0xc96   :  { %3465 = vmatmul.msk.f32.gmra.mxu1 %vm190_vm6, %v2546_v23  ;;  %v2613_v57 = vpop.f32.mrf.mxu1 }
 0xc97   :  { %3468 = vmatmul.msk.f32.vlgmr.msra.gmra.mxu2 %vm190_vm6, %v2613_v57 }
 0xc9a   :  { %3461 = vmatmul.msk.f32.gmra.mxu0 %vm190_vm6, %v2476_v18 }
 0xc9d   :  { %v2685_v22 = vpop.f32.mrf.mxu3 }
 0xc9e   :  { %v2616_v40 = vpop.f32.mrf.mxu1  ;;  %v2698_v48 = vadd.f32 %v3587_v5, %v2685_v22  ;;  %v2945_v22 = vld [vmem:[#allocation2 + $0x198] sm:$0xff] }
 0xc9f   :  { %3469 = vmatmul.msk.f32.gmra.mxu2 %vm190_vm6, %v2616_v40  ;;  %v2511_v32 = vpop.f32.mrf.mxu2 }
 0xca2   :  { %3462 = vmatmul.msk.f32.gmra.mxu0 %vm190_vm6, %v2508_v8 }
 0xca5   :  { %v2688_v19 = vpop.f32.mrf.mxu3 }
 0xca6   :  { %v2699_v38 = vadd.f32 %v3587_v5, %v2688_v19 }
 0xcaa   :  { %3463 = vmatmul.msk.f32.gmra.mxu0 %vm190_vm6, %v2511_v32 }
 0xcef   :  { %v2438_v55 = vpop.f32.mrf.mxu0 }
 0xcf0   :  { %3458 = vmatmul.msk.f32.gmra.mxu3 %vm190_vm6, %v2438_v55 }
 0xcf7   :  { %v2441_v58 = vpop.f32.mrf.mxu0 }
 0xcf8   :  { %3459 = vmatmul.msk.f32.gmra.mxu3 %vm190_vm6, %v2441_v58 }
 0xcfd   :  { %v2648_v24 = vpop.f32.mrf.mxu2 }
 0xcfe   :  { %3470 = vmatmul.msk.f32.gmra.mxu2 %vm190_vm6, %v2648_v24 }
 0xcff   :  { %v2578_v60 = vpop.f32.mrf.mxu0 }
 0xd00   :  { %3466 = vmatmul.msk.f32.gmra.mxu1 %vm190_vm6, %v2578_v60  ;;  %v2947_v60 = vld [vmem:[#allocation2 + $0x1a8] sm:$0xff] }
 0xd01   :  { %2974 = vmatpush.msrb.mxu3 %v2947_v60  ;;  %v2996_v60 = vld [vmem:[#allocation2 + $0x1c0] sm:$0xff] }
 0xd05   :  { %v2651_v46 = vpop.f32.mrf.mxu2 }
 0xd06   :  { %3471 = vmatmul.msk.f32.gmra.mxu2 %vm190_vm6, %v2651_v46 }
 0xd07   :  { %v2581_v45 = vpop.f32.mrf.mxu0 }
 0xd08   :  { %3467 = vmatmul.msk.f32.gmra.mxu1 %vm190_vm6, %v2581_v45  ;;  %v2946_v45 = vld [vmem:[#allocation2 + $0x1a0] sm:$0xff] }
 0xd09   :  { %2975 = vmatpush.msrb.mxu3 %v2946_v45  ;;  %v2995_v45 = vld [vmem:[#allocation2 + $0x1b8] sm:$0xff] }
 0xd0b   :  { %v2778_v3 = vpop.f32.mrf.mxu1  ;;  %2976 = vmatpush.msrb.mxu3 %v2945_v22 }
 0xd0f   :  { %v2732_v2 = vpop.f32.mrf.mxu0 }
 0xd10   :  { %v2744_v39 = vadd.f32 %v2732_v2, %v2698_v48 }
 0xd12   :  { %v2790_v25 = vadd.f32 %v2778_v3, %v2744_v39 }
 0xd13   :  { %v2781_v7 = vpop.f32.mrf.mxu1 }
 0xd17   :  { %v2735_v11 = vpop.f32.mrf.mxu0 }
 0xd18   :  { %v2745_v15 = vadd.f32 %v2735_v11, %v2699_v38 }
 0xd1a   :  { %v2824_v51 = vpop.f32.mrf.mxu2  ;;  %v2791_v4 = vadd.f32 %v2781_v7, %v2745_v15 }
 0xd1b   :  { %v2836_v37 = vadd.f32 %v2824_v51, %v2790_v25 }
 0xd1d   :  { %v2840_v49 = vadd.f32 %v2836_v37, %v4355_v52 }
 0xd1f   :  { %v2846_v21 = vsel %vm116_vm5, %v2840_v49, 0.0  ;;  %v2738_v14 = vpop.f32.mrf.mxu0 }
 0xd20   :  { %2847 = vadd.xlane.f32.xlu1 %v2846_v21 }
 0xd22   :  { %v2827_v12 = vpop.f32.mrf.mxu2 }
 0xd23   :  { %v2837_v63 = vadd.f32 %v2827_v12, %v2791_v4  ;;  %v4858_v4 = vld [vmem:[#allocation2 + $0x180] ss:$0 sm:$0xff] }
 0xd25   :  { %v2841_v20 = vadd.f32 %v2837_v63, %v4360_v30 }
 0xd27   :  { %v2849_v9 = vsel %vm116_vm5, %v2841_v20, 0.0  ;;  %v2741_v62 = vpop.f32.mrf.mxu0 }
 0xd28   :  { %2850 = vadd.xlane.f32.xlu0 %v2849_v9 }
 0xd73   :  { %v2691_v34 = vpop.f32.mrf.mxu3 }
 0xd74   :  { %v2700_v43 = vadd.f32 %v3587_v5, %v2691_v34 }
 0xd76   :  { %v2746_v36 = vadd.f32 %v2738_v14, %v2700_v43 }
 0xd7b   :  { %v2694_v10 = vpop.f32.mrf.mxu3 }
 0xd7c   :  { %v2701_v0 = vadd.f32 %v3587_v5, %v2694_v10  ;;  %v2944_v5 = vld [vmem:[#allocation2 + $0x190] sm:$0xff] }
 0xd7d   :  { %v2784_v13 = vpop.f32.mrf.mxu1  ;;  %2977 = vmatpush.msrb.mxu3 %v2944_v5 }
 0xd7e   :  { %v2792_v42 = vadd.f32 %v2784_v13, %v2746_v36  ;;  %v2747_v28 = vadd.f32 %v2741_v62, %v2701_v0 }
 0xd81   :  { %v2830_v52 = vpop.f32.mrf.mxu2 }
 0xd82   :  { %v2838_v54 = vadd.f32 %v2830_v52, %v2792_v42 }
 0xd84   :  { %v2842_v44 = vadd.f32 %v2838_v54, %v4366_v35 }
 0xd85   :  { %v2787_v56 = vpop.f32.mrf.mxu1 }
 0xd86   :  { %v2852_v30 = vsel %vm116_vm5, %v2842_v44, 0.0  ;;  %v2793_v47 = vadd.f32 %v2787_v56, %v2747_v28  ;;  %v3002_v56 = vld [vmem:[#allocation2 + $0x1f0] sm:$0xff]  ;;  %v3001_v28 = vld [vmem:[#allocation2 + $0x1e8] sm:$0xff] }
 0xd87   :  { %2853 = vadd.xlane.f32.xlu2 %v2852_v30  ;;  %3025 = vmatpush.msrb.mxu0 %v3002_v56  ;;  %v3000_v30 = vld [vmem:[#allocation2 + $0x1e0] sm:$0xff] }
 0xd89   :  { %v2833_v41 = vpop.f32.mrf.mxu2  ;;  %3026 = vmatpush.msrb.mxu0 %v3001_v28 }
 0xd8a   :  { %v2839_v50 = vadd.f32 %v2833_v41, %v2793_v47 }
 0xd8b   :  { %3027 = vmatpush.msrb.mxu0 %v3000_v30 }
 0xd8c   :  { %v2843_v33 = vadd.f32 %v2839_v50, %v4371_v16  ;;  %v2999_v50 = vld [vmem:[#allocation2 + $0x1d8] sm:$0xff] }
 0xd8d   :  { %3028 = vmatpush.msrb.mxu0 %v2999_v50 }
 0xd8e   :  { %v2855_v53 = vsel %vm116_vm5, %v2843_v33, 0.0 }
 0xd8f   :  { %2856 = vadd.xlane.f32.xlu1 %v2855_v53 }
 0xd93   :  { %v2848_v26 = vpop.xlane.xlu1 %2847 }
 0xd94   :  { %v2858_v59 = vmul.f32 %v2848_v26, %v4287_v29  ;;  %v2998_v26 = vld [vmem:[#allocation2 + $0x1d0] sm:$0xff] }
 0xd95   :  { %3029 = vmatpush.msrb.mxu0 %v2998_v26 }
 0xd96   :  { %v2862_v1 = vsub.f32 %v2840_v49, %v2858_v59 }
 0xd98   :  { %v2866_v17 = vmul.f32 %v2862_v1, %v2862_v1 }
 0xd9a   :  { %v2870_v35 = vsel %vm116_vm5, %v2866_v17, 0.0 }
 0xd9b   :  { %2871 = vadd.xlane.f32.xlu0 %v2870_v35  ;;  %v2851_v61 = vpop.xlane.xlu0 %2850 }
 0xd9c   :  { %v2859_v31 = vmul.f32 %v2851_v61, %v4287_v29 }
 0xd9e   :  { %v2863_v6 = vsub.f32 %v2841_v20, %v2859_v31  ;;  %v4860_v20 = vld [vmem:[#allocation2 + $0x188] ss:$0 sm:$0xff] }
 0xda0   :  { %v2867_v27 = vmul.f32 %v2863_v6, %v2863_v6 }
 0xda2   :  { %v2873_v18 = vsel %vm116_vm5, %v2867_v27, 0.0 }
 0xda3   :  { %2874 = vadd.xlane.f32.xlu1 %v2873_v18 }
 0xdfa   :  { %v2854_v16 = vpop.xlane.xlu2 %2853 }
 0xdfb   :  { %v2860_v23 = vmul.f32 %v2854_v16, %v4287_v29 }
 0xdfd   :  { %v4845_v57 = vsub.f32 %v2842_v44, %v2860_v23 }
 0xdff   :  { %v2868_v40 = vmul.f32 %v4845_v57, %v4845_v57 }
 0xe01   :  { %v2876_v8 = vsel %vm116_vm5, %v2868_v40, 0.0 }
 0xe02   :  { %2877 = vadd.xlane.f32.xlu0 %v2876_v8  ;;  %v2857_v32 = vpop.xlane.xlu1 %2856 }
 0xe03   :  { %v2861_v55 = vmul.f32 %v2857_v32, %v4287_v29 }
 0xe05   :  { %v4851_v58 = vsub.f32 %v2843_v33, %v2861_v55 }
 0xe07   :  { %v2869_v24 = vmul.f32 %v4851_v58, %v4851_v58 }
 0xe09   :  { %v2879_v46 = vsel %vm116_vm5, %v2869_v24, 0.0  ;;  %v2997_v24 = vld [vmem:[#allocation2 + $0x1c8] sm:$0xff] }
 0xe0a   :  { %2880 = vadd.xlane.f32.xlu1 %v2879_v46  ;;  %3030 = vmatpush.msrb.mxu0 %v2997_v24 }
 0xe0c   :  { %3031 = vmatpush.msrb.mxu0 %v2996_v60 }
 0xe0e   :  { %v2872_v2 = vpop.xlane.xlu0 %2871  ;;  %3032 = vmatpush.msrb.mxu0 %v2995_v45 }
 0xe0f   :  { %v2882_v48 = vmul.f32 %v2872_v2, %v4287_v29  ;;  %v3590_v2 = vld [vmem:[#allocation2 + $0x1b0] ss:$0 sm:$0xff] }
 0xe11   :  { %v2886_v39 = vadd.f32 1e-05, %v2882_v48 }
 0xe13   :  { %3743 = vrsqrt.f32 %v2886_v39  ;;  %vm2896_vm7 = vweird.f32 %v2886_v39 }
 0xe16   :  { %v2875_v3 = vpop.xlane.xlu1 %2874 }
 0xe17   :  { %v2883_v19 = vmul.f32 %v2875_v3, %v4287_v29 }
 0xe19   :  { %v3744_v25 = vpop.eup %3743  ;;  %v2887_v11 = vadd.f32 1e-05, %v2883_v19 }
 0xe1a   :  { %v2891_v51 = vmul.f32 %v3744_v25, %v2886_v39  ;;  %vm2897_vm6 = vweird.f32 %v3744_v25 }
 0xe1b   :  { %3745 = vrsqrt.f32 %v2887_v11  ;;  %vm2898_vm2 = vmor %vm2896_vm7, %vm2897_vm6  ;;  %vm2906_vm4 = vweird.f32 %v2887_v11 }
 0xe1c   :  { %v2892_v38 = vmul.f32 %v3744_v25, %v2891_v51 }
 0xe1e   :  { %v2893_v37 = vmul.f32 0.5, %v2892_v38 }
 0xe20   :  { %v2894_v15 = vsub.f32 1.5, %v2893_v37 }
 0xe21   :  { %v3746_v49 = vpop.eup %3745 }
 0xe22   :  { %v2895_v21 = vmul.f32 %v3744_v25, %v2894_v15  ;;  %v2901_v7 = vmul.f32 %v3746_v49, %v2887_v11  ;;  %vm2907_vm3 = vweird.f32 %v3746_v49 }
 0xe23   :  { %vm2908_vm8 = vmor %vm2906_vm4, %vm2907_vm3 }
 0xe24   :  { %v2899_v12 = vsel %vm2898_vm2, %v3744_v25, %v2895_v21  ;;  %v2902_v63 = vmul.f32 %v3746_v49, %v2901_v7  ;;  %v3591_v21 = vld [vmem:[#allocation2 + $0x1f8] ss:$0 sm:$0xff] }
 0xe25   :  { %v2930_v9 = vmul.f32 %v2899_v12, %v2862_v1 }
 0xe26   :  { %v2903_v34 = vmul.f32 0.5, %v2902_v63 }
 0xe27   :  { %v2935_v43 = vmul.f32 %v4858_v4, %v2930_v9 }
 0xe28   :  { %v2904_v14 = vsub.f32 1.5, %v2903_v34 }
 0xe29   :  { %v4864_v13 = vadd.f32 %v4860_v20, %v2935_v43 }
 0xe2a   :  { %v2905_v36 = vmul.f32 %v3746_v49, %v2904_v14 }
 0xe2b   :  { %3472 = vmatmul.msk.f32.vlgmr.msrb.gmra.mxu3 %vm116_vm5, %v4864_v13 }
 0xe2c   :  { %v2909_v10 = vsel %vm2908_vm8, %v3746_v49, %v2905_v36 }
 0xe2d   :  { %v2931_v42 = vmul.f32 %v2909_v10, %v2863_v6 }
 0xe2f   :  { %v2936_v52 = vmul.f32 %v4858_v4, %v2931_v42 }
 0xe31   :  { %v4870_v0 = vadd.f32 %v4860_v20, %v2936_v52 }
 0xe33   :  { %3473 = vmatmul.msk.f32.gmra.mxu3 %vm116_vm5, %v4870_v0 }
 0xe75   :  { %v2878_v54 = vpop.xlane.xlu0 %2877 }
 0xe76   :  { %v2884_v44 = vmul.f32 %v2878_v54, %v4287_v29 }
 0xe78   :  { %v2888_v62 = vadd.f32 1e-05, %v2884_v44 }
 0xe7a   :  { %3747 = vrsqrt.f32 %v2888_v62  ;;  %vm2916_vm10 = vweird.f32 %v2888_v62 }
 0xe7d   :  { %v2881_v47 = vpop.xlane.xlu1 %2880 }
 0xe7e   :  { %v2885_v41 = vmul.f32 %v2881_v47, %v4287_v29 }
 0xe80   :  { %v3748_v33 = vpop.eup %3747  ;;  %v2889_v53 = vadd.f32 1e-05, %v2885_v41 }
 0xe81   :  { %v2911_v59 = vmul.f32 %v3748_v33, %v2888_v62  ;;  %vm2917_vm9 = vweird.f32 %v3748_v33 }
 0xe82   :  { %3749 = vrsqrt.f32 %v2889_v53  ;;  %vm2918_vm11 = vmor %vm2916_vm10, %vm2917_vm9  ;;  %vm2926_vm13 = vweird.f32 %v2889_v53 }
 0xe83   :  { %v2912_v1 = vmul.f32 %v3748_v33, %v2911_v59 }
 0xe85   :  { %v2913_v17 = vmul.f32 0.5, %v2912_v1 }
 0xe87   :  { %v2914_v35 = vsub.f32 1.5, %v2913_v17 }
 0xe88   :  { %v3750_v61 = vpop.eup %3749 }
 0xe89   :  { %v2915_v31 = vmul.f32 %v3748_v33, %v2914_v35  ;;  %v2921_v6 = vmul.f32 %v3750_v61, %v2889_v53  ;;  %vm2927_vm12 = vweird.f32 %v3750_v61 }
 0xe8a   :  { %vm2928_vm14 = vmor %vm2926_vm13, %vm2927_vm12 }
 0xe8b   :  { %v2919_v27 = vsel %vm2918_vm11, %v3748_v33, %v2915_v31  ;;  %v2922_v18 = vmul.f32 %v3750_v61, %v2921_v6 }
 0xe8c   :  { %v2932_v16 = vmul.f32 %v2919_v27, %v4845_v57 }
 0xe8d   :  { %v2923_v23 = vmul.f32 0.5, %v2922_v18 }
 0xe8e   :  { %v2937_v40 = vmul.f32 %v4858_v4, %v2932_v16 }
 0xe8f   :  { %v2924_v8 = vsub.f32 1.5, %v2923_v23 }
 0xe90   :  { %v2942_v32 = vadd.f32 %v4860_v20, %v2937_v40 }
 0xe91   :  { %v2925_v55 = vmul.f32 %v3750_v61, %v2924_v8 }
 0xe92   :  { %3474 = vmatmul.msk.f32.gmra.mxu3 %vm116_vm5, %v2942_v32 }
 0xe93   :  { %v2929_v46 = vsel %vm2928_vm14, %v3750_v61, %v2925_v55 }
 0xe94   :  { %v2933_v22 = vmul.f32 %v2929_v46, %v4851_v58 }
 0xe96   :  { %v2938_v57 = vmul.f32 %v4858_v4, %v2933_v22 }
 0xe98   :  { %v2943_v5 = vadd.f32 %v4860_v20, %v2938_v57 }
 0xe9a   :  { %3475 = vmatmul.msk.f32.gmra.mxu3 %vm116_vm5, %v2943_v5 }
 0xeae   :  { %v2979_v48 = vpop.f32.mrf.mxu3 }
 0xeaf   :  { %v2980_v39 = vadd.f32 %v3590_v2, %v2979_v48  ;;  %v3592_v48 = vld [vmem:[#allocation2 + $0x200] ss:$0 sm:$0xff] }
 0xeb1   :  { %v2991_v3 = vmax.f32 %v2980_v39, 0.0 }
 0xeb3   :  { %3476 = vmatmul.msk.f32.vlgmr.msrb.gmra.mxu0 %vm68_vm0, %v2991_v3 }
 0xeb6   :  { %v2982_v19 = vpop.f32.mrf.mxu3 }
 0xeb7   :  { %v2983_v25 = vadd.f32 %v3590_v2, %v2982_v19 }
 0xeb9   :  { %v2992_v11 = vmax.f32 %v2983_v25, 0.0  ;;  %v3593_v25 = vld [vmem:[#allocation2 + $0x208] ss:$0 sm:$0xff] }
 0xebb   :  { %3477 = vmatmul.msk.f32.gmra.mxu0 %vm68_vm0, %v2992_v11 }
 0xf15   :  { %v2985_v58 = vpop.f32.mrf.mxu3 }
 0xf16   :  { %v2986_v51 = vadd.f32 %v3590_v2, %v2985_v58 }
 0xf18   :  { %v2993_v38 = vmax.f32 %v2986_v51, 0.0 }
 0xf1a   :  { %3478 = vmatmul.msk.f32.gmra.mxu0 %vm68_vm0, %v2993_v38 }
 0xf1d   :  { %v2988_v37 = vpop.f32.mrf.mxu3 }
 0xf1e   :  { %v2989_v15 = vadd.f32 %v3590_v2, %v2988_v37 }
 0xf20   :  { %v2994_v49 = vmax.f32 %v2989_v15, 0.0 }
 0xf22   :  { %3479 = vmatmul.msk.f32.gmra.mxu0 %vm68_vm0, %v2994_v49 }
 0xf30   :  { %v3034_v7 = vpop.f32.mrf.mxu0 }
 0xf31   :  { %v3035_v4 = vadd.f32 %v3591_v21, %v3034_v7 }
 0xf33   :  { %v3046_v12 = vadd.f32 %v3035_v4, %v4864_v13 }
 0xf35   :  { %v3052_v63 = vsel %vm116_vm5, %v3046_v12, 0.0 }
 0xf36   :  { %3053 = vadd.xlane.f32.xlu0 %v3052_v63 }
 0xf38   :  { %v3037_v20 = vpop.f32.mrf.mxu0 }
 0xf39   :  { %v3038_v9 = vadd.f32 %v3591_v21, %v3037_v20 }
 0xf3b   :  { %v3047_v34 = vadd.f32 %v3038_v9, %v4870_v0 }
 0xf3d   :  { %v3055_v43 = vsel %vm116_vm5, %v3047_v34, 0.0 }
 0xf3e   :  { %3056 = vadd.xlane.f32.xlu1 %v3055_v43 }
 0xf97   :  { %v3040_v14 = vpop.f32.mrf.mxu0 }
 0xf98   :  { %v3041_v36 = vadd.f32 %v3591_v21, %v3040_v14 }
 0xf9a   :  { %v3048_v10 = vadd.f32 %v3041_v36, %v2942_v32 }
 0xf9c   :  { %v3058_v42 = vsel %vm116_vm5, %v3048_v10, 0.0 }
 0xf9d   :  { %3059 = vadd.xlane.f32.xlu0 %v3058_v42 }
 0xf9f   :  { %v3043_v52 = vpop.f32.mrf.mxu0 }
 0xfa0   :  { %v3044_v54 = vadd.f32 %v3591_v21, %v3043_v52 }
 0xfa2   :  { %v3049_v44 = vadd.f32 %v3044_v54, %v2943_v5 }
 0xfa4   :  { %v3061_v13 = vsel %vm116_vm5, %v3049_v44, 0.0 }
 0xfa5   :  { %3062 = vadd.xlane.f32.xlu1 %v3061_v13 }
 0xfa9   :  { %v3054_v62 = vpop.xlane.xlu0 %3053 }
 0xfaa   :  { %v3064_v56 = vmul.f32 %v3054_v62, %v4287_v29 }
 0xfac   :  { %v3068_v28 = vsub.f32 %v3046_v12, %v3064_v56 }
 0xfae   :  { %v3072_v0 = vmul.f32 %v3068_v28, %v3068_v28 }
 0xfb0   :  { %v3076_v30 = vsel %vm116_vm5, %v3072_v0, 0.0 }
 0xfb1   :  { %3077 = vadd.xlane.f32.xlu0 %v3076_v30  ;;  %v3057_v47 = vpop.xlane.xlu1 %3056 }
 0xfb2   :  { %v3065_v41 = vmul.f32 %v3057_v47, %v4287_v29 }
 0xfb4   :  { %v3069_v50 = vsub.f32 %v3047_v34, %v3065_v41 }
 0xfb6   :  { %v3073_v33 = vmul.f32 %v3069_v50, %v3069_v50 }
 0xfb8   :  { %v3079_v53 = vsel %vm116_vm5, %v3073_v33, 0.0 }
 0xfb9   :  { %3080 = vadd.xlane.f32.xlu1 %v3079_v53 }
0x1010   :  { %v3060_v26 = vpop.xlane.xlu0 %3059 }
0x1011   :  { %v3066_v59 = vmul.f32 %v3060_v26, %v4287_v29 }
0x1013   :  { %v4899_v1 = vsub.f32 %v3048_v10, %v3066_v59 }
0x1015   :  { %v3074_v17 = vmul.f32 %v4899_v1, %v4899_v1 }
0x1017   :  { %v3082_v35 = vsel %vm116_vm5, %v3074_v17, 0.0 }
0x1018   :  { %3083 = vadd.xlane.f32.xlu2 %v3082_v35  ;;  %v3063_v61 = vpop.xlane.xlu1 %3062 }
0x1019   :  { %v3067_v31 = vmul.f32 %v3063_v61, %v4287_v29 }
0x101b   :  { %v4905_v6 = vsub.f32 %v3049_v44, %v3067_v31 }
0x101d   :  { %v3075_v27 = vmul.f32 %v4905_v6, %v4905_v6 }
0x101f   :  { %v3085_v18 = vsel %vm116_vm5, %v3075_v27, 0.0 }
0x1020   :  { %3086 = vadd.xlane.f32.xlu0 %v3085_v18 }
0x1024   :  { %v3078_v16 = vpop.xlane.xlu0 %3077 }
0x1025   :  { %v3088_v23 = vmul.f32 %v3078_v16, %v4287_v29 }
0x1027   :  { %v3092_v40 = vadd.f32 1e-05, %v3088_v23 }
0x1029   :  { %3751 = vrsqrt.f32 %v3092_v40  ;;  %vm3102_vm15 = vweird.f32 %v3092_v40 }
0x102c   :  { %v3081_v8 = vpop.xlane.xlu1 %3080 }
0x102d   :  { %v3089_v32 = vmul.f32 %v3081_v8, %v4287_v29 }
0x102f   :  { %v3752_v55 = vpop.eup %3751  ;;  %v3093_v24 = vadd.f32 1e-05, %v3089_v32 }
0x1030   :  { %v3097_v60 = vmul.f32 %v3752_v55, %v3092_v40  ;;  %vm3103_vm0 = vweird.f32 %v3752_v55 }
0x1031   :  { %3753 = vrsqrt.f32 %v3093_v24  ;;  %vm3104_vm1 = vmor %vm3102_vm15, %vm3103_vm0  ;;  %vm3112_vm7 = vweird.f32 %v3093_v24 }
0x1032   :  { %v3098_v46 = vmul.f32 %v3752_v55, %v3097_v60 }
0x1034   :  { %v3099_v45 = vmul.f32 0.5, %v3098_v46 }
0x1036   :  { %v3100_v22 = vsub.f32 1.5, %v3099_v45 }
0x1037   :  { %v3754_v57 = vpop.eup %3753 }
0x1038   :  { %v3101_v5 = vmul.f32 %v3752_v55, %v3100_v22  ;;  %v3107_v2 = vmul.f32 %v3754_v57, %v3093_v24  ;;  %vm3113_vm6 = vweird.f32 %v3754_v57 }
0x1039   :  { %vm3114_vm2 = vmor %vm3112_vm7, %vm3113_vm6 }
0x103a   :  { %v3108_v39 = vmul.f32 %v3754_v57, %v3107_v2  ;;  %v3105_v3 = vsel %vm3104_vm1, %v3752_v55, %v3101_v5 }
0x103b   :  { %v3136_v19 = vmul.f32 %v3105_v3, %v3068_v28  ;;  %v3252_v3 = vld [vmem:[#allocation2 + $0x230] sm:$0xff] }
0x103c   :  { %v3109_v11 = vmul.f32 0.5, %v3108_v39 }
0x103d   :  { %v3141_v58 = vmul.f32 %v3592_v48, %v3136_v19  ;;  %v3251_v19 = vld [vmem:[#allocation2 + $0x228] sm:$0xff] }
0x103e   :  { %v3110_v51 = vsub.f32 1.5, %v3109_v11 }
0x103f   :  { %v3146_v38 = vadd.f32 %v3593_v25, %v3141_v58 }
0x1040   :  { %v3111_v37 = vmul.f32 %v3754_v57, %v3110_v51 }
0x1041   :  { %v3152_v15 = vsel %vm116_vm5, %v3146_v38, 0.0 }
0x1042   :  { %3153 = vadd.xlane.f32.xlu1 %v3152_v15  ;;  %v3115_v49 = vsel %vm3114_vm2, %v3754_v57, %v3111_v37 }
0x1043   :  { %v3137_v21 = vmul.f32 %v3115_v49, %v3069_v50 }
0x1045   :  { %v3142_v7 = vmul.f32 %v3592_v48, %v3137_v21 }
0x1047   :  { %v3147_v4 = vadd.f32 %v3593_v25, %v3142_v7 }
0x1049   :  { %v3155_v12 = vsel %vm116_vm5, %v3147_v4, 0.0 }
0x104a   :  { %3156 = vadd.xlane.f32.xlu2 %v3155_v12 }
0x108b   :  { %v3084_v63 = vpop.xlane.xlu2 %3083 }
0x108c   :  { %v3090_v20 = vmul.f32 %v3084_v63, %v4287_v29 }
0x108e   :  { %v3094_v9 = vadd.f32 1e-05, %v3090_v20 }
0x1090   :  { %3755 = vrsqrt.f32 %v3094_v9  ;;  %vm3122_vm4 = vweird.f32 %v3094_v9 }
0x1093   :  { %v3087_v34 = vpop.xlane.xlu0 %3086 }
0x1094   :  { %v3091_v43 = vmul.f32 %v3087_v34, %v4287_v29  ;;  %v3594_v34 = vld [vmem:[#allocation2 + $0x210] ss:$0 sm:$0xff] }
0x1096   :  { %v3756_v14 = vpop.eup %3755  ;;  %v3095_v36 = vadd.f32 1e-05, %v3091_v43 }
0x1097   :  { %v3117_v10 = vmul.f32 %v3756_v14, %v3094_v9  ;;  %vm3123_vm3 = vweird.f32 %v3756_v14 }
0x1098   :  { %3757 = vrsqrt.f32 %v3095_v36  ;;  %vm3124_vm8 = vmor %vm3122_vm4, %vm3123_vm3  ;;  %vm3132_vm10 = vweird.f32 %v3095_v36 }
0x1099   :  { %v3118_v42 = vmul.f32 %v3756_v14, %v3117_v10 }
0x109b   :  { %v3119_v52 = vmul.f32 0.5, %v3118_v42 }
0x109d   :  { %v3120_v54 = vsub.f32 1.5, %v3119_v52 }
0x109e   :  { %v3758_v44 = vpop.eup %3757 }
0x109f   :  { %v3121_v13 = vmul.f32 %v3756_v14, %v3120_v54  ;;  %v3127_v62 = vmul.f32 %v3758_v44, %v3095_v36  ;;  %vm3133_vm9 = vweird.f32 %v3758_v44  ;;  %v3595_v36 = vld [vmem:[#allocation2 + $0x218] ss:$0 sm:$0xff] }
0x10a0   :  { %vm3134_vm11 = vmor %vm3132_vm10, %vm3133_vm9 }
0x10a1   :  { %v3128_v56 = vmul.f32 %v3758_v44, %v3127_v62  ;;  %v3125_v28 = vsel %vm3124_vm8, %v3756_v14, %v3121_v13 }
0x10a2   :  { %v3138_v0 = vmul.f32 %v3125_v28, %v4899_v1 }
0x10a3   :  { %v3129_v30 = vmul.f32 0.5, %v3128_v56 }
0x10a4   :  { %v3143_v47 = vmul.f32 %v3592_v48, %v3138_v0 }
0x10a5   :  { %v3130_v41 = vsub.f32 1.5, %v3129_v30 }
0x10a6   :  { %v3148_v50 = vadd.f32 %v3593_v25, %v3143_v47 }
0x10a7   :  { %v3131_v33 = vmul.f32 %v3758_v44, %v3130_v41 }
0x10a8   :  { %v3158_v53 = vsel %vm116_vm5, %v3148_v50, 0.0 }
0x10a9   :  { %3159 = vadd.xlane.f32.xlu0 %v3158_v53  ;;  %v3135_v26 = vsel %vm3134_vm11, %v3758_v44, %v3131_v33 }
0x10aa   :  { %v3139_v59 = vmul.f32 %v3135_v26, %v4905_v6 }
0x10ac   :  { %v3144_v17 = vmul.f32 %v3592_v48, %v3139_v59  ;;  %v3253_v48 = vld [vmem:[#allocation2 + $0x238] sm:$0xff] }
0x10ad   :  { %3280 = vmatpush.msra.mxu1 %v3253_v48 }
0x10ae   :  { %v3149_v35 = vadd.f32 %v3593_v25, %v3144_v17  ;;  %v3250_v25 = vld [vmem:[#allocation2 + $0x220] sm:$0xff] }
0x10af   :  { %3281 = vmatpush.msra.mxu1 %v3252_v3 }
0x10b0   :  { %v3161_v61 = vsel %vm116_vm5, %v3149_v35, 0.0 }
0x10b1   :  { %3162 = vadd.xlane.f32.xlu1 %v3161_v61  ;;  %3282 = vmatpush.msra.mxu1 %v3251_v19 }
0x10b3   :  { %3283 = vmatpush.msra.mxu1 %v3250_v25 }
0x10b5   :  { %v3154_v1 = vpop.xlane.xlu1 %3153 }
0x10b6   :  { %v3164_v31 = vmul.f32 %v3154_v1, %v4287_v29 }
0x10b8   :  { %v3168_v27 = vsub.f32 %v3146_v38, %v3164_v31 }
0x10ba   :  { %v3172_v18 = vmul.f32 %v3168_v27, %v3168_v27 }
0x10bc   :  { %v3176_v16 = vsel %vm116_vm5, %v3172_v18, 0.0 }
0x10bd   :  { %v3157_v23 = vpop.xlane.xlu2 %3156  ;;  %3177 = vadd.xlane.f32.xlu2 %v3176_v16 }
0x10be   :  { %v3165_v40 = vmul.f32 %v3157_v23, %v4287_v29 }
0x10c0   :  { %v3169_v8 = vsub.f32 %v3147_v4, %v3165_v40 }
0x10c2   :  { %v3173_v32 = vmul.f32 %v3169_v8, %v3169_v8 }
0x10c4   :  { %v3179_v6 = vsel %vm116_vm5, %v3173_v32, 0.0 }
0x10c5   :  { %3180 = vadd.xlane.f32.xlu0 %v3179_v6 }
0x111c   :  { %v3160_v55 = vpop.xlane.xlu0 %3159 }
0x111d   :  { %v3166_v24 = vmul.f32 %v3160_v55, %v4287_v29 }
0x111f   :  { %v4925_v60 = vsub.f32 %v3148_v50, %v3166_v24 }
0x1121   :  { %v3174_v46 = vmul.f32 %v4925_v60, %v4925_v60 }
0x1123   :  { %v3182_v45 = vsel %vm116_vm5, %v3174_v46, 0.0 }
0x1124   :  { %3183 = vadd.xlane.f32.xlu1 %v3182_v45  ;;  %v3163_v22 = vpop.xlane.xlu1 %3162 }
0x1125   :  { %v3167_v57 = vmul.f32 %v3163_v22, %v4287_v29  ;;  %v3596_v22 = vld [vmem:[#allocation2 + $0x240] ss:$0 sm:$0xff] }
0x1127   :  { %v4931_v5 = vsub.f32 %v3149_v35, %v3167_v57 }
0x1129   :  { %v3175_v2 = vmul.f32 %v4931_v5, %v4931_v5 }
0x112b   :  { %v3185_v39 = vsel %vm116_vm5, %v3175_v2, 0.0 }
0x112c   :  { %3186 = vadd.xlane.f32.xlu2 %v3185_v39 }
0x1130   :  { %v3178_v11 = vpop.xlane.xlu2 %3177 }
0x1131   :  { %v3188_v58 = vmul.f32 %v3178_v11, %v4287_v29 }
0x1133   :  { %v3192_v51 = vadd.f32 1e-05, %v3188_v58 }
0x1135   :  { %3759 = vrsqrt.f32 %v3192_v51  ;;  %vm3202_vm13 = vweird.f32 %v3192_v51 }
0x1138   :  { %v3181_v38 = vpop.xlane.xlu0 %3180 }
0x1139   :  { %v3189_v37 = vmul.f32 %v3181_v38, %v4287_v29 }
0x113b   :  { %v3760_v15 = vpop.eup %3759  ;;  %v3193_v49 = vadd.f32 1e-05, %v3189_v37 }
0x113c   :  { %v3197_v21 = vmul.f32 %v3760_v15, %v3192_v51  ;;  %vm3203_vm12 = vweird.f32 %v3760_v15 }
0x113d   :  { %3761 = vrsqrt.f32 %v3193_v49  ;;  %vm3204_vm14 = vmor %vm3202_vm13, %vm3203_vm12  ;;  %vm3212_vm15 = vweird.f32 %v3193_v49 }
0x113e   :  { %v3198_v7 = vmul.f32 %v3760_v15, %v3197_v21 }
0x1140   :  { %v3199_v4 = vmul.f32 0.5, %v3198_v7 }
0x1142   :  { %v3200_v12 = vsub.f32 1.5, %v3199_v4 }
0x1143   :  { %v3762_v63 = vpop.eup %3761 }
0x1144   :  { %v3201_v20 = vmul.f32 %v3760_v15, %v3200_v12  ;;  %v3207_v9 = vmul.f32 %v3762_v63, %v3193_v49  ;;  %vm3213_vm0 = vweird.f32 %v3762_v63 }
0x1145   :  { %vm3214_vm1 = vmor %vm3212_vm15, %vm3213_vm0 }
0x1146   :  { %v3205_v43 = vsel %vm3204_vm14, %v3760_v15, %v3201_v20  ;;  %v3208_v14 = vmul.f32 %v3762_v63, %v3207_v9 }
0x1147   :  { %v3236_v10 = vmul.f32 %v3205_v43, %v3168_v27 }
0x1148   :  { %v3209_v42 = vmul.f32 0.5, %v3208_v14 }
0x1149   :  { %v3241_v52 = vmul.f32 %v3594_v34, %v3236_v10 }
0x114a   :  { %v3210_v54 = vsub.f32 1.5, %v3209_v42 }
0x114b   :  { %v3246_v44 = vadd.f32 %v3595_v36, %v3241_v52 }
0x114c   :  { %v3211_v13 = vmul.f32 %v3762_v63, %v3210_v54 }
0x114d   :  { %3480 = vmatmul.msk.f32.vlgmr.msra.gmra.mxu1 %vm116_vm5, %v3246_v44 }
0x114e   :  { %v3215_v62 = vsel %vm3214_vm1, %v3762_v63, %v3211_v13 }
0x114f   :  { %v3237_v56 = vmul.f32 %v3215_v62, %v3169_v8 }
0x1151   :  { %v3242_v28 = vmul.f32 %v3594_v34, %v3237_v56 }
0x1153   :  { %v3247_v0 = vadd.f32 %v3595_v36, %v3242_v28 }
0x1155   :  { %3481 = vmatmul.msk.f32.gmra.mxu1 %vm116_vm5, %v3247_v0 }
0x1197   :  { %v3184_v30 = vpop.xlane.xlu1 %3183 }
0x1198   :  { %v3190_v47 = vmul.f32 %v3184_v30, %v4287_v29 }
0x119a   :  { %v3194_v41 = vadd.f32 1e-05, %v3190_v47 }
0x119c   :  { %3763 = vrsqrt.f32 %v3194_v41  ;;  %vm3222_vm7 = vweird.f32 %v3194_v41 }
0x119f   :  { %v3187_v50 = vpop.xlane.xlu2 %3186 }
0x11a0   :  { %v3191_v33 = vmul.f32 %v3187_v50, %v4287_v29 }
0x11a2   :  { %v3764_v53 = vpop.eup %3763  ;;  %v3195_v26 = vadd.f32 1e-05, %v3191_v33 }
0x11a3   :  { %v3217_v59 = vmul.f32 %v3764_v53, %v3194_v41  ;;  %vm3223_vm6 = vweird.f32 %v3764_v53 }
0x11a4   :  { %3765 = vrsqrt.f32 %v3195_v26  ;;  %vm3224_vm2 = vmor %vm3222_vm7, %vm3223_vm6  ;;  %vm3232_vm4 = vweird.f32 %v3195_v26 }
0x11a5   :  { %v3218_v17 = vmul.f32 %v3764_v53, %v3217_v59 }
0x11a7   :  { %v3219_v35 = vmul.f32 0.5, %v3218_v17 }
0x11a9   :  { %v3220_v61 = vsub.f32 1.5, %v3219_v35 }
0x11aa   :  { %v3766_v1 = vpop.eup %3765 }
0x11ab   :  { %v3221_v31 = vmul.f32 %v3764_v53, %v3220_v61  ;;  %v3227_v27 = vmul.f32 %v3766_v1, %v3195_v26  ;;  %vm3233_vm3 = vweird.f32 %v3766_v1 }
0x11ac   :  { %vm3234_vm8 = vmor %vm3232_vm4, %vm3233_vm3 }
0x11ad   :  { %v3225_v18 = vsel %vm3224_vm2, %v3764_v53, %v3221_v31  ;;  %v3228_v16 = vmul.f32 %v3766_v1, %v3227_v27 }
0x11ae   :  { %v3238_v23 = vmul.f32 %v3225_v18, %v4925_v60 }
0x11af   :  { %v3229_v40 = vmul.f32 0.5, %v3228_v16 }
0x11b0   :  { %v3243_v8 = vmul.f32 %v3594_v34, %v3238_v23 }
0x11b1   :  { %v3230_v29 = vsub.f32 1.5, %v3229_v40 }
0x11b2   :  { %v3248_v32 = vadd.f32 %v3595_v36, %v3243_v8 }
0x11b3   :  { %v3231_v6 = vmul.f32 %v3766_v1, %v3230_v29 }
0x11b4   :  { %3482 = vmatmul.msk.f32.gmra.mxu1 %vm116_vm5, %v3248_v32 }
0x11b5   :  { %v3235_v55 = vsel %vm3234_vm8, %v3766_v1, %v3231_v6 }
0x11b6   :  { %v3239_v24 = vmul.f32 %v3235_v55, %v4931_v5 }
0x11b8   :  { %v3244_v46 = vmul.f32 %v3594_v34, %v3239_v24 }
0x11ba   :  { %v3249_v45 = vadd.f32 %v3595_v36, %v3244_v46 }
0x11bc   :  { %3483 = vmatmul.msk.f32.gmra.mxu1 %vm116_vm5, %v3249_v45 }
0x11ca   :  { %v3285_v57 = vpop.f32.mrf.mxu1 }
0x11cb   :  { %v3286_v60 = vadd.f32 %v3596_v22, %v3285_v57 }
0x11cd   :  { %3297 = vst [vmem:[#allocation5] sm:$0xff] %v3286_v60 }
0x11d2   :  { %v3288_v2 = vpop.f32.mrf.mxu1 }
0x11d3   :  { %v3289_v48 = vadd.f32 %v3596_v22, %v3288_v2 }
0x11d5   :  { %3298 = vst [vmem:[#allocation5 + $0x8] sm:$0xff] %v3289_v48 }
0x1231   :  { %v3291_v39 = vpop.f32.mrf.mxu1 }
0x1232   :  { %v3292_v3 = vadd.f32 %v3596_v22, %v3291_v39 }
0x1234   :  { %3299 = vst [vmem:[#allocation5 + $0x10] sm:$0xff] %v3292_v3 }
0x1239   :  { %v3294_v5 = vpop.f32.mrf.mxu1 }
0x123a   :  { %v3295_v19 = vadd.f32 %v3596_v22, %v3294_v5 }
0x123c   :  { %3300 = vst [vmem:[#allocation5 + $0x18] sm:$0xff] %v3295_v19 }
0x123d   :  { %3313 = dma.vmem_to_hbm [thread:$0]  %s3306_s28, 512, %s3308_s3, [#allocation4], %s3820_s14, %s3820_s14, %s3821_s15  }
0x123e   :  { %3817 = dma.done.wait [#allocation4], 512  }
0x123f   :  { %3818 = vsyncadd [#allocation4], 4294966784 }
0x1240   :  { %3318 = vsyncpa [#allocation3], 1 }
0x1241   :  { %3319 = vsyncpa [#allocation4], 1 }

</bundles_post_ra>
